<compile_context>
chip_gen: v7x
topology: tpu7x:2x2x1
jax: 0.10.0
libtpu: 0.0.40
codegen_flags: <defaults>
</compile_context>

<pallas_src>
import functools

import jax
import jax.numpy as jnp
from jax import lax
from jax.experimental import pallas as pl
from jax.experimental.pallas import tpu as pltpu


def _pad2d(a, ph, pw):
    """Zero-pad a small 2-D register value by (ph, pw) on each side (concats)."""
    if pw:
        zc = jnp.zeros((a.shape[0], pw), a.dtype)
        a = jnp.concatenate([zc, a, zc], axis=1)
    if ph:
        zr = jnp.zeros((ph, a.shape[1]), a.dtype)
        a = jnp.concatenate([zr, a, zr], axis=0)
    return a


def _fused_convt_kernel(x_ref, w0_ref, b0_ref, w2v_ref, o_ref, *,
                        NB, C0in, C0out, KH0, KW0, H, W,
                        C2out, KH2, KW2, SW2):
    """NB batch elems of ConvT(w0,b0,s=1) -> ConvT(w2, s=(1,SW2)), phase-split.

    x_ref   : (NB, C0in, H, W)                        VMEM
    w0_ref  : (C0in*C0out*KH0*KW0,)                   SMEM (PyTorch layout, flat)
    b0_ref  : (C0out,)                                SMEM
    w2v_ref : (C0out*KH2*(KW2//SW2)*SW2, C2out*Mw)    VMEM lane-packed stage-2 taps
    o_ref   : (NB, SW2, Ho2, C2out*Mw)                VMEM phase/co-packed output
    """
    f32 = jnp.float32
    Ho1 = (H - 1) + KH0
    Wo1 = (W - 1) + KW0
    Ho2 = (Ho1 - 1) + KH2
    Wo2 = (Wo1 - 1) * SW2 + KW2
    T = KW2 // SW2          # stage-2 taps per W phase
    Mw = Wo2 // SW2         # output columns per W phase
    Qm1 = T - 1             # W padding of v1 needed per side

    def w0_tap(kh, kw, co, ci):   # flipped-tap SMEM scalar, static index math
        return w0_ref[((ci * C0out + co) * KH0 + (KH0 - 1 - kh)) * KW0
                      + (KW0 - 1 - kw)]

    for nb in range(NB):
        # ---- stage 1: v1 = ConvT2d(x; w0, b0, stride=1), all in registers ----
        xpad = [_pad2d(x_ref[nb, ci].astype(f32), KH0 - 1, KW0 - 1)
                for ci in range(C0in)]
        acc1 = [jnp.zeros((Ho1, Wo1), f32) for _ in range(C0out)]
        for ci in range(C0in):
            for kh in range(KH0):
                band = xpad[ci][kh:kh + Ho1, :]
                for kw in range(KW0):
                    win = band[:, kw:kw + Wo1]
                    for co in range(C0out):
                        acc1[co] = acc1[co] + w0_tap(kh, kw, co, ci) * win
        v1 = [acc1[co] + b0_ref[co] for co in range(C0out)]

        # ---- stage 2: phase-decomposed ConvT2d(v1; w2, stride=(1, SW2)) ------
        # out[co, oh, m*SW2+p] = sum_{ci,kh,q} v1[ci, oh-kh, m-q] * w2[ci,co,kh,q*SW2+p]
        # co is lane-packed: acc2[p][oh, co*Mw+m] accumulates all output channels.
        acc2 = [jnp.zeros((Ho2, C2out * Mw), f32) for _ in range(SW2)]
        for ci in range(C0out):
            v1p = _pad2d(v1[ci], KH2 - 1, Qm1)
            for q in range(T):
                band = v1p[:, Qm1 - q:Qm1 - q + Mw]                 # (Hpad, Mw)
                band_t = jnp.concatenate([band] * C2out, axis=1)    # lane-pack co
                for kh in range(KH2):
                    win = band_t[KH2 - 1 - kh:KH2 - 1 - kh + Ho2, :]
                    base = ((ci * KH2 + kh) * T + q) * SW2
                    for p in range(SW2):
                        acc2[p] = acc2[p] + win * w2v_ref[base + p]
        for p in range(SW2):
            o_ref[nb, p] = acc2[p].astype(o_ref.dtype)


def _is_multi_tensorcore():
    """True only for chips with >1 TensorCore per device (v7x)."""
    try:
        kind = jax.devices()[0].device_kind.lower()
    except Exception:
        return False
    return ("v7" in kind) or ("7x" in kind)


def fused_double_conv_transpose(x, w0, b0, w2, *, stride2):
    """v1 = ConvT2d(x, w0, b0); out = ConvT2d(v1, w2, stride=stride2). One kernel.

    x  : (N, C0in, H, W)          NCHW
    w0 : (C0in, C0out, KH0, KW0)  PyTorch ConvTranspose2d weight layout
    b0 : (C0out,)
    w2 : (C0out, C2out, KH2, KW2)
    """
    N, C0in, H, W = x.shape
    assert w0.shape[0] == C0in
    _, C0out, KH0, KW0 = w0.shape
    assert w2.shape[0] == C0out
    _, C2out, KH2, KW2 = w2.shape
    SH2, SW2 = stride2
    assert SH2 == 1          # module uses stride=(1, 2); only W has phases
    assert KW2 % SW2 == 0    # clean phase decomposition (true for (2,4)/(1,2))

    Ho1 = (H - 1) + KH0
    Wo1 = (W - 1) + KW0
    Ho2 = (Ho1 - 1) * SH2 + KH2
    Wo2 = (Wo1 - 1) * SW2 + KW2
    T = KW2 // SW2
    Mw = Wo2 // SW2
    rows = C0out * KH2 * T * SW2

    # Lane-packed stage-2 weights: row r=((ci*KH2+kh)*T+q)*SW2+p holds
    # w2[ci, co, kh, q*SW2+p] replicated Mw times per output-channel lane group.
    w2r = w2.astype(jnp.float32).reshape(C0out, C2out, KH2, T, SW2)
    w2t = jnp.transpose(w2r, (0, 2, 3, 4, 1)).reshape(rows, C2out)
    w2v = jnp.repeat(w2t, Mw, axis=1)                      # (rows, C2out*Mw)

    if _is_multi_tensorcore() and N > 1:
        # v7x: one batch element per grid step -> one per TensorCore.
        NB, steps = 1, N
        x_map = lambda n: (n, 0, 0, 0)
        o_map = lambda n: (n, 0, 0, 0)
    else:
        # v5e/v6e (single TC): fold the whole batch into one grid step.
        NB, steps = N, 1
        x_map = lambda n: (0, 0, 0, 0)
        o_map = lambda n: (0, 0, 0, 0)

    kernel = functools.partial(
        _fused_convt_kernel,
        NB=NB, C0in=C0in, C0out=C0out, KH0=KH0, KW0=KW0, H=H, W=W,
        C2out=C2out, KH2=KH2, KW2=KW2, SW2=SW2)

    out_p = pl.pallas_call(
        kernel,
        out_shape=jax.ShapeDtypeStruct((N, SW2, Ho2, C2out * Mw), x.dtype),
        grid=(steps,),
        in_specs=[
            pl.BlockSpec((NB, C0in, H, W), x_map),
            pl.BlockSpec(memory_space=pltpu.MemorySpace.SMEM),   # w0 (flat)
            pl.BlockSpec(memory_space=pltpu.MemorySpace.SMEM),   # b0
            pl.BlockSpec((rows, C2out * Mw), lambda n: (0, 0)),  # w2v (VMEM const)
        ],
        out_specs=pl.BlockSpec((NB, SW2, Ho2, C2out * Mw), o_map),
        compiler_params=pltpu.CompilerParams(
            dimension_semantics=("parallel",)),
    )(x, w0.reshape(-1).astype(jnp.float32), b0.astype(jnp.float32), w2v)

    # Un-pack (phase, co-lane-group) layout back to NCHW (tiny XLA rearrange).
    out = out_p.reshape(N, SW2, Ho2, C2out, Mw)
    out = jnp.transpose(out, (0, 3, 2, 4, 1)).reshape(N, C2out, Ho2, Wo2)
    return out


@jax.jit
def model_forward(x, params):
    w0, b0, w1, w2 = params
    # v3 = conv2d_1(v1.detach()) never reaches the returned value: removed (DCE).
    # .detach() is a no-op here (no autograd).
    del w1
    return fused_double_conv_transpose(x, w0, b0, w2, stride2=(1, 2))


def _convt_reference(x, w, b, stride):
    """Independent XLA reference (lhs-dilated conv) for a correctness check."""
    Cin, Cout, KH, KW = w.shape
    w_oihw = jnp.transpose(jnp.flip(w, axis=(2, 3)), (1, 0, 2, 3))
    out = lax.conv_general_dilated(
        x, w_oihw, window_strides=(1, 1),
        padding=[(KH - 1, KH - 1), (KW - 1, KW - 1)],
        lhs_dilation=stride,
        dimension_numbers=("NCHW", "OIHW", "NCHW"))
    if b is not None:
        out = out + b.reshape(1, -1, 1, 1)
    return out


if __name__ == "__main__":
    key = jax.random.PRNGKey(0)
    kx, k0, kb, k1, k2 = jax.random.split(key, 5)

    # Small input, NCHW, 2 channels (consistent with conv2d's in_channels).
    x = jax.random.normal(kx, (2, 2, 8, 6), jnp.float32)

    # PyTorch ConvTranspose2d weight layout: (in_channels, out_channels, kH, kW)
    w0 = 0.1 * jax.random.normal(k0, (2, 2, 3, 3), jnp.float32)   # conv2d
    b0 = 0.1 * jax.random.normal(kb, (2,), jnp.float32)
    w1 = 0.1 * jax.random.normal(k1, (2, 2, 5, 3), jnp.float32)   # conv2d_1 (dead)
    w2 = 0.1 * jax.random.normal(k2, (2, 5, 2, 4), jnp.float32)   # conv2d_2

    out = model_forward(x, (w0, b0, w1, w2))
    out = jax.block_until_ready(out)

    # Sanity check against an independent XLA implementation of the same chain.
    v1_ref = _convt_reference(x, w0, b0, (1, 1))
    v5_ref = _convt_reference(v1_ref, w2, None, (1, 2))
    assert out.shape == v5_ref.shape == (2, 5, 11, 18), out.shape
    assert jnp.allclose(out, v5_ref, atol=1e-4, rtol=1e-4)

    print("KERNEL_OK")
</pallas_src>

<mosaic_0001>
module attributes {stable_mosaic.version = 11 : i64} {
  func.func @_fused_convt_kernel(%arg0: i32, %arg1: memref<2x2x8x6xf32, #tpu.memory_space<vmem>>, %arg2: memref<36xf32, #tpu.memory_space<smem>>, %arg3: memref<2xf32, #tpu.memory_space<smem>>, %arg4: memref<16x45xf32, #tpu.memory_space<vmem>>, %arg5: memref<2x2x11x45xf32, #tpu.memory_space<vmem>>) attributes {dimension_semantics = [#tpu.dimension_semantics<parallel>], iteration_bounds = array<i64: 1>, scalar_prefetch = 0 : i64, scratch_operands = 0 : i64, tpu.core_type = #tpu.core_type<tc>, window_params = [{pipeline_mode = #tpu.pipeline_mode<synchronous>, transform_indices = @transform_0, window_bounds = array<i64: 2, 2, 8, 6>}, {transform_indices = @transform_1, window_bounds = array<i64: 36>}, {transform_indices = @transform_2, window_bounds = array<i64: 2>}, {pipeline_mode = #tpu.pipeline_mode<synchronous>, transform_indices = @transform_3, window_bounds = array<i64: 16, 45>}, {pipeline_mode = #tpu.pipeline_mode<synchronous>, transform_indices = @transform_4, window_bounds = array<i64: 2, 2, 11, 45>}]} {
    %c0 = arith.constant 0 : index
    %c0_0 = arith.constant 0 : index
    %c0_1 = arith.constant 0 : index
    %c0_2 = arith.constant 0 : index
    %0 = vector.load %arg1[%c0, %c0_0, %c0_1, %c0_2] : memref<2x2x8x6xf32, #tpu.memory_space<vmem>>, vector<1x1x8x6xf32>
    %1 = vector.shape_cast %0 : vector<1x1x8x6xf32> to vector<8x6xf32>
    %cst = arith.constant 0.000000e+00 : f32
    %2 = vector.broadcast %cst : f32 to vector<8x2xf32>
    %3 = tpu.concatenate %2, %1, %2 in 1 : vector<8x2xf32>, vector<8x6xf32>, vector<8x2xf32> -> vector<8x10xf32>
    %cst_3 = arith.constant 0.000000e+00 : f32
    %4 = vector.broadcast %cst_3 : f32 to vector<2x10xf32>
    %5 = tpu.concatenate %4, %3, %4 in 0 : vector<2x10xf32>, vector<8x10xf32>, vector<2x10xf32> -> vector<12x10xf32>
    %c0_4 = arith.constant 0 : index
    %c1 = arith.constant 1 : index
    %c0_5 = arith.constant 0 : index
    %c0_6 = arith.constant 0 : index
    %6 = vector.load %arg1[%c0_4, %c1, %c0_5, %c0_6] : memref<2x2x8x6xf32, #tpu.memory_space<vmem>>, vector<1x1x8x6xf32>
    %7 = vector.shape_cast %6 : vector<1x1x8x6xf32> to vector<8x6xf32>
    %cst_7 = arith.constant 0.000000e+00 : f32
    %8 = vector.broadcast %cst_7 : f32 to vector<8x2xf32>
    %9 = tpu.concatenate %8, %7, %8 in 1 : vector<8x2xf32>, vector<8x6xf32>, vector<8x2xf32> -> vector<8x10xf32>
    %cst_8 = arith.constant 0.000000e+00 : f32
    %10 = vector.broadcast %cst_8 : f32 to vector<2x10xf32>
    %11 = tpu.concatenate %10, %9, %10 in 0 : vector<2x10xf32>, vector<8x10xf32>, vector<2x10xf32> -> vector<12x10xf32>
    %cst_9 = arith.constant 0.000000e+00 : f32
    %12 = vector.broadcast %cst_9 : f32 to vector<10x8xf32>
    %cst_10 = arith.constant 0.000000e+00 : f32
    %13 = vector.broadcast %cst_10 : f32 to vector<10x8xf32>
    %14 = vector.extract_strided_slice %5 {offsets = [0, 0], sizes = [10, 10], strides = [1, 1]} : vector<12x10xf32> to vector<10x10xf32>
    %15 = vector.extract_strided_slice %14 {offsets = [0, 0], sizes = [10, 8], strides = [1, 1]} : vector<10x10xf32> to vector<10x8xf32>
    %c8 = arith.constant 8 : index
    %16 = memref.load %arg2[%c8] : memref<36xf32, #tpu.memory_space<smem>>
    %17 = vector.broadcast %16 : f32 to vector<10x8xf32>
    %18 = arith.mulf %17, %15 : vector<10x8xf32>
    %19 = arith.addf %12, %18 : vector<10x8xf32>
    %c17 = arith.constant 17 : index
    %20 = memref.load %arg2[%c17] : memref<36xf32, #tpu.memory_space<smem>>
    %21 = vector.broadcast %20 : f32 to vector<10x8xf32>
    %22 = arith.mulf %21, %15 : vector<10x8xf32>
    %23 = arith.addf %13, %22 : vector<10x8xf32>
    %24 = vector.extract_strided_slice %14 {offsets = [0, 1], sizes = [10, 8], strides = [1, 1]} : vector<10x10xf32> to vector<10x8xf32>
    %c7 = arith.constant 7 : index
    %25 = memref.load %arg2[%c7] : memref<36xf32, #tpu.memory_space<smem>>
    %26 = vector.broadcast %25 : f32 to vector<10x8xf32>
    %27 = arith.mulf %26, %24 : vector<10x8xf32>
    %28 = arith.addf %19, %27 : vector<10x8xf32>
    %c16 = arith.constant 16 : index
    %29 = memref.load %arg2[%c16] : memref<36xf32, #tpu.memory_space<smem>>
    %30 = vector.broadcast %29 : f32 to vector<10x8xf32>
    %31 = arith.mulf %30, %24 : vector<10x8xf32>
    %32 = arith.addf %23, %31 : vector<10x8xf32>
    %33 = vector.extract_strided_slice %14 {offsets = [0, 2], sizes = [10, 8], strides = [1, 1]} : vector<10x10xf32> to vector<10x8xf32>
    %c6 = arith.constant 6 : index
    %34 = memref.load %arg2[%c6] : memref<36xf32, #tpu.memory_space<smem>>
    %35 = vector.broadcast %34 : f32 to vector<10x8xf32>
    %36 = arith.mulf %35, %33 : vector<10x8xf32>
    %37 = arith.addf %28, %36 : vector<10x8xf32>
    %c15 = arith.constant 15 : index
    %38 = memref.load %arg2[%c15] : memref<36xf32, #tpu.memory_space<smem>>
    %39 = vector.broadcast %38 : f32 to vector<10x8xf32>
    %40 = arith.mulf %39, %33 : vector<10x8xf32>
    %41 = arith.addf %32, %40 : vector<10x8xf32>
    %42 = vector.extract_strided_slice %5 {offsets = [1, 0], sizes = [10, 10], strides = [1, 1]} : vector<12x10xf32> to vector<10x10xf32>
    %43 = vector.extract_strided_slice %42 {offsets = [0, 0], sizes = [10, 8], strides = [1, 1]} : vector<10x10xf32> to vector<10x8xf32>
    %c5 = arith.constant 5 : index
    %44 = memref.load %arg2[%c5] : memref<36xf32, #tpu.memory_space<smem>>
    %45 = vector.broadcast %44 : f32 to vector<10x8xf32>
    %46 = arith.mulf %45, %43 : vector<10x8xf32>
    %47 = arith.addf %37, %46 : vector<10x8xf32>
    %c14 = arith.constant 14 : index
    %48 = memref.load %arg2[%c14] : memref<36xf32, #tpu.memory_space<smem>>
    %49 = vector.broadcast %48 : f32 to vector<10x8xf32>
    %50 = arith.mulf %49, %43 : vector<10x8xf32>
    %51 = arith.addf %41, %50 : vector<10x8xf32>
    %52 = vector.extract_strided_slice %42 {offsets = [0, 1], sizes = [10, 8], strides = [1, 1]} : vector<10x10xf32> to vector<10x8xf32>
    %c4 = arith.constant 4 : index
    %53 = memref.load %arg2[%c4] : memref<36xf32, #tpu.memory_space<smem>>
    %54 = vector.broadcast %53 : f32 to vector<10x8xf32>
    %55 = arith.mulf %54, %52 : vector<10x8xf32>
    %56 = arith.addf %47, %55 : vector<10x8xf32>
    %c13 = arith.constant 13 : index
    %57 = memref.load %arg2[%c13] : memref<36xf32, #tpu.memory_space<smem>>
    %58 = vector.broadcast %57 : f32 to vector<10x8xf32>
    %59 = arith.mulf %58, %52 : vector<10x8xf32>
    %60 = arith.addf %51, %59 : vector<10x8xf32>
    %61 = vector.extract_strided_slice %42 {offsets = [0, 2], sizes = [10, 8], strides = [1, 1]} : vector<10x10xf32> to vector<10x8xf32>
    %c3 = arith.constant 3 : index
    %62 = memref.load %arg2[%c3] : memref<36xf32, #tpu.memory_space<smem>>
    %63 = vector.broadcast %62 : f32 to vector<10x8xf32>
    %64 = arith.mulf %63, %61 : vector<10x8xf32>
    %65 = arith.addf %56, %64 : vector<10x8xf32>
    %c12 = arith.constant 12 : index
    %66 = memref.load %arg2[%c12] : memref<36xf32, #tpu.memory_space<smem>>
    %67 = vector.broadcast %66 : f32 to vector<10x8xf32>
    %68 = arith.mulf %67, %61 : vector<10x8xf32>
    %69 = arith.addf %60, %68 : vector<10x8xf32>
    %70 = vector.extract_strided_slice %5 {offsets = [2, 0], sizes = [10, 10], strides = [1, 1]} : vector<12x10xf32> to vector<10x10xf32>
    %71 = vector.extract_strided_slice %70 {offsets = [0, 0], sizes = [10, 8], strides = [1, 1]} : vector<10x10xf32> to vector<10x8xf32>
    %c2 = arith.constant 2 : index
    %72 = memref.load %arg2[%c2] : memref<36xf32, #tpu.memory_space<smem>>
    %73 = vector.broadcast %72 : f32 to vector<10x8xf32>
    %74 = arith.mulf %73, %71 : vector<10x8xf32>
    %75 = arith.addf %65, %74 : vector<10x8xf32>
    %c11 = arith.constant 11 : index
    %76 = memref.load %arg2[%c11] : memref<36xf32, #tpu.memory_space<smem>>
    %77 = vector.broadcast %76 : f32 to vector<10x8xf32>
    %78 = arith.mulf %77, %71 : vector<10x8xf32>
    %79 = arith.addf %69, %78 : vector<10x8xf32>
    %80 = vector.extract_strided_slice %70 {offsets = [0, 1], sizes = [10, 8], strides = [1, 1]} : vector<10x10xf32> to vector<10x8xf32>
    %c1_11 = arith.constant 1 : index
    %81 = memref.load %arg2[%c1_11] : memref<36xf32, #tpu.memory_space<smem>>
    %82 = vector.broadcast %81 : f32 to vector<10x8xf32>
    %83 = arith.mulf %82, %80 : vector<10x8xf32>
    %84 = arith.addf %75, %83 : vector<10x8xf32>
    %c10 = arith.constant 10 : index
    %85 = memref.load %arg2[%c10] : memref<36xf32, #tpu.memory_space<smem>>
    %86 = vector.broadcast %85 : f32 to vector<10x8xf32>
    %87 = arith.mulf %86, %80 : vector<10x8xf32>
    %88 = arith.addf %79, %87 : vector<10x8xf32>
    %89 = vector.extract_strided_slice %70 {offsets = [0, 2], sizes = [10, 8], strides = [1, 1]} : vector<10x10xf32> to vector<10x8xf32>
    %c0_12 = arith.constant 0 : index
    %90 = memref.load %arg2[%c0_12] : memref<36xf32, #tpu.memory_space<smem>>
    %91 = vector.broadcast %90 : f32 to vector<10x8xf32>
    %92 = arith.mulf %91, %89 : vector<10x8xf32>
    %93 = arith.addf %84, %92 : vector<10x8xf32>
    %c9 = arith.constant 9 : index
    %94 = memref.load %arg2[%c9] : memref<36xf32, #tpu.memory_space<smem>>
    %95 = vector.broadcast %94 : f32 to vector<10x8xf32>
    %96 = arith.mulf %95, %89 : vector<10x8xf32>
    %97 = arith.addf %88, %96 : vector<10x8xf32>
    %98 = vector.extract_strided_slice %11 {offsets = [0, 0], sizes = [10, 10], strides = [1, 1]} : vector<12x10xf32> to vector<10x10xf32>
    %99 = vector.extract_strided_slice %98 {offsets = [0, 0], sizes = [10, 8], strides = [1, 1]} : vector<10x10xf32> to vector<10x8xf32>
    %c26 = arith.constant 26 : index
    %100 = memref.load %arg2[%c26] : memref<36xf32, #tpu.memory_space<smem>>
    %101 = vector.broadcast %100 : f32 to vector<10x8xf32>
    %102 = arith.mulf %101, %99 : vector<10x8xf32>
    %103 = arith.addf %93, %102 : vector<10x8xf32>
    %c35 = arith.constant 35 : index
    %104 = memref.load %arg2[%c35] : memref<36xf32, #tpu.memory_space<smem>>
    %105 = vector.broadcast %104 : f32 to vector<10x8xf32>
    %106 = arith.mulf %105, %99 : vector<10x8xf32>
    %107 = arith.addf %97, %106 : vector<10x8xf32>
    %108 = vector.extract_strided_slice %98 {offsets = [0, 1], sizes = [10, 8], strides = [1, 1]} : vector<10x10xf32> to vector<10x8xf32>
    %c25 = arith.constant 25 : index
    %109 = memref.load %arg2[%c25] : memref<36xf32, #tpu.memory_space<smem>>
    %110 = vector.broadcast %109 : f32 to vector<10x8xf32>
    %111 = arith.mulf %110, %108 : vector<10x8xf32>
    %112 = arith.addf %103, %111 : vector<10x8xf32>
    %c34 = arith.constant 34 : index
    %113 = memref.load %arg2[%c34] : memref<36xf32, #tpu.memory_space<smem>>
    %114 = vector.broadcast %113 : f32 to vector<10x8xf32>
    %115 = arith.mulf %114, %108 : vector<10x8xf32>
    %116 = arith.addf %107, %115 : vector<10x8xf32>
    %117 = vector.extract_strided_slice %98 {offsets = [0, 2], sizes = [10, 8], strides = [1, 1]} : vector<10x10xf32> to vector<10x8xf32>
    %c24 = arith.constant 24 : index
    %118 = memref.load %arg2[%c24] : memref<36xf32, #tpu.memory_space<smem>>
    %119 = vector.broadcast %118 : f32 to vector<10x8xf32>
    %120 = arith.mulf %119, %117 : vector<10x8xf32>
    %121 = arith.addf %112, %120 : vector<10x8xf32>
    %c33 = arith.constant 33 : index
    %122 = memref.load %arg2[%c33] : memref<36xf32, #tpu.memory_space<smem>>
    %123 = vector.broadcast %122 : f32 to vector<10x8xf32>
    %124 = arith.mulf %123, %117 : vector<10x8xf32>
    %125 = arith.addf %116, %124 : vector<10x8xf32>
    %126 = vector.extract_strided_slice %11 {offsets = [1, 0], sizes = [10, 10], strides = [1, 1]} : vector<12x10xf32> to vector<10x10xf32>
    %127 = vector.extract_strided_slice %126 {offsets = [0, 0], sizes = [10, 8], strides = [1, 1]} : vector<10x10xf32> to vector<10x8xf32>
    %c23 = arith.constant 23 : index
    %128 = memref.load %arg2[%c23] : memref<36xf32, #tpu.memory_space<smem>>
    %129 = vector.broadcast %128 : f32 to vector<10x8xf32>
    %130 = arith.mulf %129, %127 : vector<10x8xf32>
    %131 = arith.addf %121, %130 : vector<10x8xf32>
    %c32 = arith.constant 32 : index
    %132 = memref.load %arg2[%c32] : memref<36xf32, #tpu.memory_space<smem>>
    %133 = vector.broadcast %132 : f32 to vector<10x8xf32>
    %134 = arith.mulf %133, %127 : vector<10x8xf32>
    %135 = arith.addf %125, %134 : vector<10x8xf32>
    %136 = vector.extract_strided_slice %126 {offsets = [0, 1], sizes = [10, 8], strides = [1, 1]} : vector<10x10xf32> to vector<10x8xf32>
    %c22 = arith.constant 22 : index
    %137 = memref.load %arg2[%c22] : memref<36xf32, #tpu.memory_space<smem>>
    %138 = vector.broadcast %137 : f32 to vector<10x8xf32>
    %139 = arith.mulf %138, %136 : vector<10x8xf32>
    %140 = arith.addf %131, %139 : vector<10x8xf32>
    %c31 = arith.constant 31 : index
    %141 = memref.load %arg2[%c31] : memref<36xf32, #tpu.memory_space<smem>>
    %142 = vector.broadcast %141 : f32 to vector<10x8xf32>
    %143 = arith.mulf %142, %136 : vector<10x8xf32>
    %144 = arith.addf %135, %143 : vector<10x8xf32>
    %145 = vector.extract_strided_slice %126 {offsets = [0, 2], sizes = [10, 8], strides = [1, 1]} : vector<10x10xf32> to vector<10x8xf32>
    %c21 = arith.constant 21 : index
    %146 = memref.load %arg2[%c21] : memref<36xf32, #tpu.memory_space<smem>>
    %147 = vector.broadcast %146 : f32 to vector<10x8xf32>
    %148 = arith.mulf %147, %145 : vector<10x8xf32>
    %149 = arith.addf %140, %148 : vector<10x8xf32>
    %c30 = arith.constant 30 : index
    %150 = memref.load %arg2[%c30] : memref<36xf32, #tpu.memory_space<smem>>
    %151 = vector.broadcast %150 : f32 to vector<10x8xf32>
    %152 = arith.mulf %151, %145 : vector<10x8xf32>
    %153 = arith.addf %144, %152 : vector<10x8xf32>
    %154 = vector.extract_strided_slice %11 {offsets = [2, 0], sizes = [10, 10], strides = [1, 1]} : vector<12x10xf32> to vector<10x10xf32>
    %155 = vector.extract_strided_slice %154 {offsets = [0, 0], sizes = [10, 8], strides = [1, 1]} : vector<10x10xf32> to vector<10x8xf32>
    %c20 = arith.constant 20 : index
    %156 = memref.load %arg2[%c20] : memref<36xf32, #tpu.memory_space<smem>>
    %157 = vector.broadcast %156 : f32 to vector<10x8xf32>
    %158 = arith.mulf %157, %155 : vector<10x8xf32>
    %159 = arith.addf %149, %158 : vector<10x8xf32>
    %c29 = arith.constant 29 : index
    %160 = memref.load %arg2[%c29] : memref<36xf32, #tpu.memory_space<smem>>
    %161 = vector.broadcast %160 : f32 to vector<10x8xf32>
    %162 = arith.mulf %161, %155 : vector<10x8xf32>
    %163 = arith.addf %153, %162 : vector<10x8xf32>
    %164 = vector.extract_strided_slice %154 {offsets = [0, 1], sizes = [10, 8], strides = [1, 1]} : vector<10x10xf32> to vector<10x8xf32>
    %c19 = arith.constant 19 : index
    %165 = memref.load %arg2[%c19] : memref<36xf32, #tpu.memory_space<smem>>
    %166 = vector.broadcast %165 : f32 to vector<10x8xf32>
    %167 = arith.mulf %166, %164 : vector<10x8xf32>
    %168 = arith.addf %159, %167 : vector<10x8xf32>
    %c28 = arith.constant 28 : index
    %169 = memref.load %arg2[%c28] : memref<36xf32, #tpu.memory_space<smem>>
    %170 = vector.broadcast %169 : f32 to vector<10x8xf32>
    %171 = arith.mulf %170, %164 : vector<10x8xf32>
    %172 = arith.addf %163, %171 : vector<10x8xf32>
    %173 = vector.extract_strided_slice %154 {offsets = [0, 2], sizes = [10, 8], strides = [1, 1]} : vector<10x10xf32> to vector<10x8xf32>
    %c18 = arith.constant 18 : index
    %174 = memref.load %arg2[%c18] : memref<36xf32, #tpu.memory_space<smem>>
    %175 = vector.broadcast %174 : f32 to vector<10x8xf32>
    %176 = arith.mulf %175, %173 : vector<10x8xf32>
    %177 = arith.addf %168, %176 : vector<10x8xf32>
    %c27 = arith.constant 27 : index
    %178 = memref.load %arg2[%c27] : memref<36xf32, #tpu.memory_space<smem>>
    %179 = vector.broadcast %178 : f32 to vector<10x8xf32>
    %180 = arith.mulf %179, %173 : vector<10x8xf32>
    %181 = arith.addf %172, %180 : vector<10x8xf32>
    %c0_13 = arith.constant 0 : index
    %182 = memref.load %arg3[%c0_13] : memref<2xf32, #tpu.memory_space<smem>>
    %183 = vector.broadcast %182 : f32 to vector<10x8xf32>
    %184 = arith.addf %177, %183 : vector<10x8xf32>
    %c1_14 = arith.constant 1 : index
    %185 = memref.load %arg3[%c1_14] : memref<2xf32, #tpu.memory_space<smem>>
    %186 = vector.broadcast %185 : f32 to vector<10x8xf32>
    %187 = arith.addf %181, %186 : vector<10x8xf32>
    %cst_15 = arith.constant 0.000000e+00 : f32
    %188 = vector.broadcast %cst_15 : f32 to vector<11x45xf32>
    %cst_16 = arith.constant 0.000000e+00 : f32
    %189 = vector.broadcast %cst_16 : f32 to vector<11x45xf32>
    %cst_17 = arith.constant 0.000000e+00 : f32
    %190 = vector.broadcast %cst_17 : f32 to vector<10x1xf32>
    %191 = tpu.concatenate %190, %184, %190 in 1 : vector<10x1xf32>, vector<10x8xf32>, vector<10x1xf32> -> vector<10x10xf32>
    %cst_18 = arith.constant 0.000000e+00 : f32
    %192 = vector.broadcast %cst_18 : f32 to vector<1x10xf32>
    %193 = tpu.concatenate %192, %191, %192 in 0 : vector<1x10xf32>, vector<10x10xf32>, vector<1x10xf32> -> vector<12x10xf32>
    %194 = vector.extract_strided_slice %193 {offsets = [0, 1], sizes = [12, 9], strides = [1, 1]} : vector<12x10xf32> to vector<12x9xf32>
    %195 = tpu.concatenate %194, %194, %194, %194, %194 in 1 : vector<12x9xf32>, vector<12x9xf32>, vector<12x9xf32>, vector<12x9xf32>, vector<12x9xf32> -> vector<12x45xf32>
    %196 = vector.extract_strided_slice %195 {offsets = [1, 0], sizes = [11, 45], strides = [1, 1]} : vector<12x45xf32> to vector<11x45xf32>
    %c0_19 = arith.constant 0 : index
    %c0_20 = arith.constant 0 : index
    %197 = vector.load %arg4[%c0_19, %c0_20] : memref<16x45xf32, #tpu.memory_space<vmem>>, vector<1x45xf32>
    %198 = vector.shape_cast %197 : vector<1x45xf32> to vector<45xf32>
    %199 = vector.shape_cast %198 : vector<45xf32> to vector<1x45xf32>
    %200 = vector.broadcast %199 : vector<1x45xf32> to vector<11x45xf32>
    %201 = arith.mulf %196, %200 : vector<11x45xf32>
    %202 = arith.addf %188, %201 : vector<11x45xf32>
    %c1_21 = arith.constant 1 : index
    %c0_22 = arith.constant 0 : index
    %203 = vector.load %arg4[%c1_21, %c0_22] : memref<16x45xf32, #tpu.memory_space<vmem>>, vector<1x45xf32>
    %204 = vector.shape_cast %203 : vector<1x45xf32> to vector<45xf32>
    %205 = vector.shape_cast %204 : vector<45xf32> to vector<1x45xf32>
    %206 = vector.broadcast %205 : vector<1x45xf32> to vector<11x45xf32>
    %207 = arith.mulf %196, %206 : vector<11x45xf32>
    %208 = arith.addf %189, %207 : vector<11x45xf32>
    %209 = vector.extract_strided_slice %195 {offsets = [0, 0], sizes = [11, 45], strides = [1, 1]} : vector<12x45xf32> to vector<11x45xf32>
    %c4_23 = arith.constant 4 : index
    %c0_24 = arith.constant 0 : index
    %210 = vector.load %arg4[%c4_23, %c0_24] : memref<16x45xf32, #tpu.memory_space<vmem>>, vector<1x45xf32>
    %211 = vector.shape_cast %210 : vector<1x45xf32> to vector<45xf32>
    %212 = vector.shape_cast %211 : vector<45xf32> to vector<1x45xf32>
    %213 = vector.broadcast %212 : vector<1x45xf32> to vector<11x45xf32>
    %214 = arith.mulf %209, %213 : vector<11x45xf32>
    %215 = arith.addf %202, %214 : vector<11x45xf32>
    %c5_25 = arith.constant 5 : index
    %c0_26 = arith.constant 0 : index
    %216 = vector.load %arg4[%c5_25, %c0_26] : memref<16x45xf32, #tpu.memory_space<vmem>>, vector<1x45xf32>
    %217 = vector.shape_cast %216 : vector<1x45xf32> to vector<45xf32>
    %218 = vector.shape_cast %217 : vector<45xf32> to vector<1x45xf32>
    %219 = vector.broadcast %218 : vector<1x45xf32> to vector<11x45xf32>
    %220 = arith.mulf %209, %219 : vector<11x45xf32>
    %221 = arith.addf %208, %220 : vector<11x45xf32>
    %222 = vector.extract_strided_slice %193 {offsets = [0, 0], sizes = [12, 9], strides = [1, 1]} : vector<12x10xf32> to vector<12x9xf32>
    %223 = tpu.concatenate %222, %222, %222, %222, %222 in 1 : vector<12x9xf32>, vector<12x9xf32>, vector<12x9xf32>, vector<12x9xf32>, vector<12x9xf32> -> vector<12x45xf32>
    %224 = vector.extract_strided_slice %223 {offsets = [1, 0], sizes = [11, 45], strides = [1, 1]} : vector<12x45xf32> to vector<11x45xf32>
    %c2_27 = arith.constant 2 : index
    %c0_28 = arith.constant 0 : index
    %225 = vector.load %arg4[%c2_27, %c0_28] : memref<16x45xf32, #tpu.memory_space<vmem>>, vector<1x45xf32>
    %226 = vector.shape_cast %225 : vector<1x45xf32> to vector<45xf32>
    %227 = vector.shape_cast %226 : vector<45xf32> to vector<1x45xf32>
    %228 = vector.broadcast %227 : vector<1x45xf32> to vector<11x45xf32>
    %229 = arith.mulf %224, %228 : vector<11x45xf32>
    %230 = arith.addf %215, %229 : vector<11x45xf32>
    %c3_29 = arith.constant 3 : index
    %c0_30 = arith.constant 0 : index
    %231 = vector.load %arg4[%c3_29, %c0_30] : memref<16x45xf32, #tpu.memory_space<vmem>>, vector<1x45xf32>
    %232 = vector.shape_cast %231 : vector<1x45xf32> to vector<45xf32>
    %233 = vector.shape_cast %232 : vector<45xf32> to vector<1x45xf32>
    %234 = vector.broadcast %233 : vector<1x45xf32> to vector<11x45xf32>
    %235 = arith.mulf %224, %234 : vector<11x45xf32>
    %236 = arith.addf %221, %235 : vector<11x45xf32>
    %237 = vector.extract_strided_slice %223 {offsets = [0, 0], sizes = [11, 45], strides = [1, 1]} : vector<12x45xf32> to vector<11x45xf32>
    %c6_31 = arith.constant 6 : index
    %c0_32 = arith.constant 0 : index
    %238 = vector.load %arg4[%c6_31, %c0_32] : memref<16x45xf32, #tpu.memory_space<vmem>>, vector<1x45xf32>
    %239 = vector.shape_cast %238 : vector<1x45xf32> to vector<45xf32>
    %240 = vector.shape_cast %239 : vector<45xf32> to vector<1x45xf32>
    %241 = vector.broadcast %240 : vector<1x45xf32> to vector<11x45xf32>
    %242 = arith.mulf %237, %241 : vector<11x45xf32>
    %243 = arith.addf %230, %242 : vector<11x45xf32>
    %c7_33 = arith.constant 7 : index
    %c0_34 = arith.constant 0 : index
    %244 = vector.load %arg4[%c7_33, %c0_34] : memref<16x45xf32, #tpu.memory_space<vmem>>, vector<1x45xf32>
    %245 = vector.shape_cast %244 : vector<1x45xf32> to vector<45xf32>
    %246 = vector.shape_cast %245 : vector<45xf32> to vector<1x45xf32>
    %247 = vector.broadcast %246 : vector<1x45xf32> to vector<11x45xf32>
    %248 = arith.mulf %237, %247 : vector<11x45xf32>
    %249 = arith.addf %236, %248 : vector<11x45xf32>
    %cst_35 = arith.constant 0.000000e+00 : f32
    %250 = vector.broadcast %cst_35 : f32 to vector<10x1xf32>
    %251 = tpu.concatenate %250, %187, %250 in 1 : vector<10x1xf32>, vector<10x8xf32>, vector<10x1xf32> -> vector<10x10xf32>
    %cst_36 = arith.constant 0.000000e+00 : f32
    %252 = vector.broadcast %cst_36 : f32 to vector<1x10xf32>
    %253 = tpu.concatenate %252, %251, %252 in 0 : vector<1x10xf32>, vector<10x10xf32>, vector<1x10xf32> -> vector<12x10xf32>
    %254 = vector.extract_strided_slice %253 {offsets = [0, 1], sizes = [12, 9], strides = [1, 1]} : vector<12x10xf32> to vector<12x9xf32>
    %255 = tpu.concatenate %254, %254, %254, %254, %254 in 1 : vector<12x9xf32>, vector<12x9xf32>, vector<12x9xf32>, vector<12x9xf32>, vector<12x9xf32> -> vector<12x45xf32>
    %256 = vector.extract_strided_slice %255 {offsets = [1, 0], sizes = [11, 45], strides = [1, 1]} : vector<12x45xf32> to vector<11x45xf32>
    %c8_37 = arith.constant 8 : index
    %c0_38 = arith.constant 0 : index
    %257 = vector.load %arg4[%c8_37, %c0_38] : memref<16x45xf32, #tpu.memory_space<vmem>>, vector<1x45xf32>
    %258 = vector.shape_cast %257 : vector<1x45xf32> to vector<45xf32>
    %259 = vector.shape_cast %258 : vector<45xf32> to vector<1x45xf32>
    %260 = vector.broadcast %259 : vector<1x45xf32> to vector<11x45xf32>
    %261 = arith.mulf %256, %260 : vector<11x45xf32>
    %262 = arith.addf %243, %261 : vector<11x45xf32>
    %c9_39 = arith.constant 9 : index
    %c0_40 = arith.constant 0 : index
    %263 = vector.load %arg4[%c9_39, %c0_40] : memref<16x45xf32, #tpu.memory_space<vmem>>, vector<1x45xf32>
    %264 = vector.shape_cast %263 : vector<1x45xf32> to vector<45xf32>
    %265 = vector.shape_cast %264 : vector<45xf32> to vector<1x45xf32>
    %266 = vector.broadcast %265 : vector<1x45xf32> to vector<11x45xf32>
    %267 = arith.mulf %256, %266 : vector<11x45xf32>
    %268 = arith.addf %249, %267 : vector<11x45xf32>
    %269 = vector.extract_strided_slice %255 {offsets = [0, 0], sizes = [11, 45], strides = [1, 1]} : vector<12x45xf32> to vector<11x45xf32>
    %c12_41 = arith.constant 12 : index
    %c0_42 = arith.constant 0 : index
    %270 = vector.load %arg4[%c12_41, %c0_42] : memref<16x45xf32, #tpu.memory_space<vmem>>, vector<1x45xf32>
    %271 = vector.shape_cast %270 : vector<1x45xf32> to vector<45xf32>
    %272 = vector.shape_cast %271 : vector<45xf32> to vector<1x45xf32>
    %273 = vector.broadcast %272 : vector<1x45xf32> to vector<11x45xf32>
    %274 = arith.mulf %269, %273 : vector<11x45xf32>
    %275 = arith.addf %262, %274 : vector<11x45xf32>
    %c13_43 = arith.constant 13 : index
    %c0_44 = arith.constant 0 : index
    %276 = vector.load %arg4[%c13_43, %c0_44] : memref<16x45xf32, #tpu.memory_space<vmem>>, vector<1x45xf32>
    %277 = vector.shape_cast %276 : vector<1x45xf32> to vector<45xf32>
    %278 = vector.shape_cast %277 : vector<45xf32> to vector<1x45xf32>
    %279 = vector.broadcast %278 : vector<1x45xf32> to vector<11x45xf32>
    %280 = arith.mulf %269, %279 : vector<11x45xf32>
    %281 = arith.addf %268, %280 : vector<11x45xf32>
    %282 = vector.extract_strided_slice %253 {offsets = [0, 0], sizes = [12, 9], strides = [1, 1]} : vector<12x10xf32> to vector<12x9xf32>
    %283 = tpu.concatenate %282, %282, %282, %282, %282 in 1 : vector<12x9xf32>, vector<12x9xf32>, vector<12x9xf32>, vector<12x9xf32>, vector<12x9xf32> -> vector<12x45xf32>
    %284 = vector.extract_strided_slice %283 {offsets = [1, 0], sizes = [11, 45], strides = [1, 1]} : vector<12x45xf32> to vector<11x45xf32>
    %c10_45 = arith.constant 10 : index
    %c0_46 = arith.constant 0 : index
    %285 = vector.load %arg4[%c10_45, %c0_46] : memref<16x45xf32, #tpu.memory_space<vmem>>, vector<1x45xf32>
    %286 = vector.shape_cast %285 : vector<1x45xf32> to vector<45xf32>
    %287 = vector.shape_cast %286 : vector<45xf32> to vector<1x45xf32>
    %288 = vector.broadcast %287 : vector<1x45xf32> to vector<11x45xf32>
    %289 = arith.mulf %284, %288 : vector<11x45xf32>
    %290 = arith.addf %275, %289 : vector<11x45xf32>
    %c11_47 = arith.constant 11 : index
    %c0_48 = arith.constant 0 : index
    %291 = vector.load %arg4[%c11_47, %c0_48] : memref<16x45xf32, #tpu.memory_space<vmem>>, vector<1x45xf32>
    %292 = vector.shape_cast %291 : vector<1x45xf32> to vector<45xf32>
    %293 = vector.shape_cast %292 : vector<45xf32> to vector<1x45xf32>
    %294 = vector.broadcast %293 : vector<1x45xf32> to vector<11x45xf32>
    %295 = arith.mulf %284, %294 : vector<11x45xf32>
    %296 = arith.addf %281, %295 : vector<11x45xf32>
    %297 = vector.extract_strided_slice %283 {offsets = [0, 0], sizes = [11, 45], strides = [1, 1]} : vector<12x45xf32> to vector<11x45xf32>
    %c14_49 = arith.constant 14 : index
    %c0_50 = arith.constant 0 : index
    %298 = vector.load %arg4[%c14_49, %c0_50] : memref<16x45xf32, #tpu.memory_space<vmem>>, vector<1x45xf32>
    %299 = vector.shape_cast %298 : vector<1x45xf32> to vector<45xf32>
    %300 = vector.shape_cast %299 : vector<45xf32> to vector<1x45xf32>
    %301 = vector.broadcast %300 : vector<1x45xf32> to vector<11x45xf32>
    %302 = arith.mulf %297, %301 : vector<11x45xf32>
    %303 = arith.addf %290, %302 : vector<11x45xf32>
    %c15_51 = arith.constant 15 : index
    %c0_52 = arith.constant 0 : index
    %304 = vector.load %arg4[%c15_51, %c0_52] : memref<16x45xf32, #tpu.memory_space<vmem>>, vector<1x45xf32>
    %305 = vector.shape_cast %304 : vector<1x45xf32> to vector<45xf32>
    %306 = vector.shape_cast %305 : vector<45xf32> to vector<1x45xf32>
    %307 = vector.broadcast %306 : vector<1x45xf32> to vector<11x45xf32>
    %308 = arith.mulf %297, %307 : vector<11x45xf32>
    %309 = arith.addf %296, %308 : vector<11x45xf32>
    %c0_53 = arith.constant 0 : index
    %c0_54 = arith.constant 0 : index
    %c0_55 = arith.constant 0 : index
    %c0_56 = arith.constant 0 : index
    %310 = vector.load %arg5[%c0_53, %c0_54, %c0_55, %c0_56] : memref<2x2x11x45xf32, #tpu.memory_space<vmem>>, vector<1x1x11x45xf32>
    %311 = vector.shape_cast %310 : vector<1x1x11x45xf32> to vector<11x45xf32>
    %312 = vector.shape_cast %303 : vector<11x45xf32> to vector<1x1x11x45xf32>
    tpu.vector_store %arg5[%c0_53, %c0_54, %c0_55, %c0_56], %312 {strides = array<i32>} : memref<2x2x11x45xf32, #tpu.memory_space<vmem>>, vector<1x1x11x45xf32>,
    %c0_57 = arith.constant 0 : index
    %c1_58 = arith.constant 1 : index
    %c0_59 = arith.constant 0 : index
    %c0_60 = arith.constant 0 : index
    %313 = vector.load %arg5[%c0_57, %c1_58, %c0_59, %c0_60] : memref<2x2x11x45xf32, #tpu.memory_space<vmem>>, vector<1x1x11x45xf32>
    %314 = vector.shape_cast %313 : vector<1x1x11x45xf32> to vector<11x45xf32>
    %315 = vector.shape_cast %309 : vector<11x45xf32> to vector<1x1x11x45xf32>
    tpu.vector_store %arg5[%c0_57, %c1_58, %c0_59, %c0_60], %315 {strides = array<i32>} : memref<2x2x11x45xf32, #tpu.memory_space<vmem>>, vector<1x1x11x45xf32>,
    %c1_61 = arith.constant 1 : index
    %c0_62 = arith.constant 0 : index
    %c0_63 = arith.constant 0 : index
    %c0_64 = arith.constant 0 : index
    %316 = vector.load %arg1[%c1_61, %c0_62, %c0_63, %c0_64] : memref<2x2x8x6xf32, #tpu.memory_space<vmem>>, vector<1x1x8x6xf32>
    %317 = vector.shape_cast %316 : vector<1x1x8x6xf32> to vector<8x6xf32>
    %cst_65 = arith.constant 0.000000e+00 : f32
    %318 = vector.broadcast %cst_65 : f32 to vector<8x2xf32>
    %319 = tpu.concatenate %318, %317, %318 in 1 : vector<8x2xf32>, vector<8x6xf32>, vector<8x2xf32> -> vector<8x10xf32>
    %cst_66 = arith.constant 0.000000e+00 : f32
    %320 = vector.broadcast %cst_66 : f32 to vector<2x10xf32>
    %321 = tpu.concatenate %320, %319, %320 in 0 : vector<2x10xf32>, vector<8x10xf32>, vector<2x10xf32> -> vector<12x10xf32>
    %c1_67 = arith.constant 1 : index
    %c1_68 = arith.constant 1 : index
    %c0_69 = arith.constant 0 : index
    %c0_70 = arith.constant 0 : index
    %322 = vector.load %arg1[%c1_67, %c1_68, %c0_69, %c0_70] : memref<2x2x8x6xf32, #tpu.memory_space<vmem>>, vector<1x1x8x6xf32>
    %323 = vector.shape_cast %322 : vector<1x1x8x6xf32> to vector<8x6xf32>
    %cst_71 = arith.constant 0.000000e+00 : f32
    %324 = vector.broadcast %cst_71 : f32 to vector<8x2xf32>
    %325 = tpu.concatenate %324, %323, %324 in 1 : vector<8x2xf32>, vector<8x6xf32>, vector<8x2xf32> -> vector<8x10xf32>
    %cst_72 = arith.constant 0.000000e+00 : f32
    %326 = vector.broadcast %cst_72 : f32 to vector<2x10xf32>
    %327 = tpu.concatenate %326, %325, %326 in 0 : vector<2x10xf32>, vector<8x10xf32>, vector<2x10xf32> -> vector<12x10xf32>
    %cst_73 = arith.constant 0.000000e+00 : f32
    %328 = vector.broadcast %cst_73 : f32 to vector<10x8xf32>
    %cst_74 = arith.constant 0.000000e+00 : f32
    %329 = vector.broadcast %cst_74 : f32 to vector<10x8xf32>
    %330 = vector.extract_strided_slice %321 {offsets = [0, 0], sizes = [10, 10], strides = [1, 1]} : vector<12x10xf32> to vector<10x10xf32>
    %331 = vector.extract_strided_slice %330 {offsets = [0, 0], sizes = [10, 8], strides = [1, 1]} : vector<10x10xf32> to vector<10x8xf32>
    %c8_75 = arith.constant 8 : index
    %332 = memref.load %arg2[%c8_75] : memref<36xf32, #tpu.memory_space<smem>>
    %333 = vector.broadcast %332 : f32 to vector<10x8xf32>
    %334 = arith.mulf %333, %331 : vector<10x8xf32>
    %335 = arith.addf %328, %334 : vector<10x8xf32>
    %c17_76 = arith.constant 17 : index
    %336 = memref.load %arg2[%c17_76] : memref<36xf32, #tpu.memory_space<smem>>
    %337 = vector.broadcast %336 : f32 to vector<10x8xf32>
    %338 = arith.mulf %337, %331 : vector<10x8xf32>
    %339 = arith.addf %329, %338 : vector<10x8xf32>
    %340 = vector.extract_strided_slice %330 {offsets = [0, 1], sizes = [10, 8], strides = [1, 1]} : vector<10x10xf32> to vector<10x8xf32>
    %c7_77 = arith.constant 7 : index
    %341 = memref.load %arg2[%c7_77] : memref<36xf32, #tpu.memory_space<smem>>
    %342 = vector.broadcast %341 : f32 to vector<10x8xf32>
    %343 = arith.mulf %342, %340 : vector<10x8xf32>
    %344 = arith.addf %335, %343 : vector<10x8xf32>
    %c16_78 = arith.constant 16 : index
    %345 = memref.load %arg2[%c16_78] : memref<36xf32, #tpu.memory_space<smem>>
    %346 = vector.broadcast %345 : f32 to vector<10x8xf32>
    %347 = arith.mulf %346, %340 : vector<10x8xf32>
    %348 = arith.addf %339, %347 : vector<10x8xf32>
    %349 = vector.extract_strided_slice %330 {offsets = [0, 2], sizes = [10, 8], strides = [1, 1]} : vector<10x10xf32> to vector<10x8xf32>
    %c6_79 = arith.constant 6 : index
    %350 = memref.load %arg2[%c6_79] : memref<36xf32, #tpu.memory_space<smem>>
    %351 = vector.broadcast %350 : f32 to vector<10x8xf32>
    %352 = arith.mulf %351, %349 : vector<10x8xf32>
    %353 = arith.addf %344, %352 : vector<10x8xf32>
    %c15_80 = arith.constant 15 : index
    %354 = memref.load %arg2[%c15_80] : memref<36xf32, #tpu.memory_space<smem>>
    %355 = vector.broadcast %354 : f32 to vector<10x8xf32>
    %356 = arith.mulf %355, %349 : vector<10x8xf32>
    %357 = arith.addf %348, %356 : vector<10x8xf32>
    %358 = vector.extract_strided_slice %321 {offsets = [1, 0], sizes = [10, 10], strides = [1, 1]} : vector<12x10xf32> to vector<10x10xf32>
    %359 = vector.extract_strided_slice %358 {offsets = [0, 0], sizes = [10, 8], strides = [1, 1]} : vector<10x10xf32> to vector<10x8xf32>
    %c5_81 = arith.constant 5 : index
    %360 = memref.load %arg2[%c5_81] : memref<36xf32, #tpu.memory_space<smem>>
    %361 = vector.broadcast %360 : f32 to vector<10x8xf32>
    %362 = arith.mulf %361, %359 : vector<10x8xf32>
    %363 = arith.addf %353, %362 : vector<10x8xf32>
    %c14_82 = arith.constant 14 : index
    %364 = memref.load %arg2[%c14_82] : memref<36xf32, #tpu.memory_space<smem>>
    %365 = vector.broadcast %364 : f32 to vector<10x8xf32>
    %366 = arith.mulf %365, %359 : vector<10x8xf32>
    %367 = arith.addf %357, %366 : vector<10x8xf32>
    %368 = vector.extract_strided_slice %358 {offsets = [0, 1], sizes = [10, 8], strides = [1, 1]} : vector<10x10xf32> to vector<10x8xf32>
    %c4_83 = arith.constant 4 : index
    %369 = memref.load %arg2[%c4_83] : memref<36xf32, #tpu.memory_space<smem>>
    %370 = vector.broadcast %369 : f32 to vector<10x8xf32>
    %371 = arith.mulf %370, %368 : vector<10x8xf32>
    %372 = arith.addf %363, %371 : vector<10x8xf32>
    %c13_84 = arith.constant 13 : index
    %373 = memref.load %arg2[%c13_84] : memref<36xf32, #tpu.memory_space<smem>>
    %374 = vector.broadcast %373 : f32 to vector<10x8xf32>
    %375 = arith.mulf %374, %368 : vector<10x8xf32>
    %376 = arith.addf %367, %375 : vector<10x8xf32>
    %377 = vector.extract_strided_slice %358 {offsets = [0, 2], sizes = [10, 8], strides = [1, 1]} : vector<10x10xf32> to vector<10x8xf32>
    %c3_85 = arith.constant 3 : index
    %378 = memref.load %arg2[%c3_85] : memref<36xf32, #tpu.memory_space<smem>>
    %379 = vector.broadcast %378 : f32 to vector<10x8xf32>
    %380 = arith.mulf %379, %377 : vector<10x8xf32>
    %381 = arith.addf %372, %380 : vector<10x8xf32>
    %c12_86 = arith.constant 12 : index
    %382 = memref.load %arg2[%c12_86] : memref<36xf32, #tpu.memory_space<smem>>
    %383 = vector.broadcast %382 : f32 to vector<10x8xf32>
    %384 = arith.mulf %383, %377 : vector<10x8xf32>
    %385 = arith.addf %376, %384 : vector<10x8xf32>
    %386 = vector.extract_strided_slice %321 {offsets = [2, 0], sizes = [10, 10], strides = [1, 1]} : vector<12x10xf32> to vector<10x10xf32>
    %387 = vector.extract_strided_slice %386 {offsets = [0, 0], sizes = [10, 8], strides = [1, 1]} : vector<10x10xf32> to vector<10x8xf32>
    %c2_87 = arith.constant 2 : index
    %388 = memref.load %arg2[%c2_87] : memref<36xf32, #tpu.memory_space<smem>>
    %389 = vector.broadcast %388 : f32 to vector<10x8xf32>
    %390 = arith.mulf %389, %387 : vector<10x8xf32>
    %391 = arith.addf %381, %390 : vector<10x8xf32>
    %c11_88 = arith.constant 11 : index
    %392 = memref.load %arg2[%c11_88] : memref<36xf32, #tpu.memory_space<smem>>
    %393 = vector.broadcast %392 : f32 to vector<10x8xf32>
    %394 = arith.mulf %393, %387 : vector<10x8xf32>
    %395 = arith.addf %385, %394 : vector<10x8xf32>
    %396 = vector.extract_strided_slice %386 {offsets = [0, 1], sizes = [10, 8], strides = [1, 1]} : vector<10x10xf32> to vector<10x8xf32>
    %c1_89 = arith.constant 1 : index
    %397 = memref.load %arg2[%c1_89] : memref<36xf32, #tpu.memory_space<smem>>
    %398 = vector.broadcast %397 : f32 to vector<10x8xf32>
    %399 = arith.mulf %398, %396 : vector<10x8xf32>
    %400 = arith.addf %391, %399 : vector<10x8xf32>
    %c10_90 = arith.constant 10 : index
    %401 = memref.load %arg2[%c10_90] : memref<36xf32, #tpu.memory_space<smem>>
    %402 = vector.broadcast %401 : f32 to vector<10x8xf32>
    %403 = arith.mulf %402, %396 : vector<10x8xf32>
    %404 = arith.addf %395, %403 : vector<10x8xf32>
    %405 = vector.extract_strided_slice %386 {offsets = [0, 2], sizes = [10, 8], strides = [1, 1]} : vector<10x10xf32> to vector<10x8xf32>
    %c0_91 = arith.constant 0 : index
    %406 = memref.load %arg2[%c0_91] : memref<36xf32, #tpu.memory_space<smem>>
    %407 = vector.broadcast %406 : f32 to vector<10x8xf32>
    %408 = arith.mulf %407, %405 : vector<10x8xf32>
    %409 = arith.addf %400, %408 : vector<10x8xf32>
    %c9_92 = arith.constant 9 : index
    %410 = memref.load %arg2[%c9_92] : memref<36xf32, #tpu.memory_space<smem>>
    %411 = vector.broadcast %410 : f32 to vector<10x8xf32>
    %412 = arith.mulf %411, %405 : vector<10x8xf32>
    %413 = arith.addf %404, %412 : vector<10x8xf32>
    %414 = vector.extract_strided_slice %327 {offsets = [0, 0], sizes = [10, 10], strides = [1, 1]} : vector<12x10xf32> to vector<10x10xf32>
    %415 = vector.extract_strided_slice %414 {offsets = [0, 0], sizes = [10, 8], strides = [1, 1]} : vector<10x10xf32> to vector<10x8xf32>
    %c26_93 = arith.constant 26 : index
    %416 = memref.load %arg2[%c26_93] : memref<36xf32, #tpu.memory_space<smem>>
    %417 = vector.broadcast %416 : f32 to vector<10x8xf32>
    %418 = arith.mulf %417, %415 : vector<10x8xf32>
    %419 = arith.addf %409, %418 : vector<10x8xf32>
    %c35_94 = arith.constant 35 : index
    %420 = memref.load %arg2[%c35_94] : memref<36xf32, #tpu.memory_space<smem>>
    %421 = vector.broadcast %420 : f32 to vector<10x8xf32>
    %422 = arith.mulf %421, %415 : vector<10x8xf32>
    %423 = arith.addf %413, %422 : vector<10x8xf32>
    %424 = vector.extract_strided_slice %414 {offsets = [0, 1], sizes = [10, 8], strides = [1, 1]} : vector<10x10xf32> to vector<10x8xf32>
    %c25_95 = arith.constant 25 : index
    %425 = memref.load %arg2[%c25_95] : memref<36xf32, #tpu.memory_space<smem>>
    %426 = vector.broadcast %425 : f32 to vector<10x8xf32>
    %427 = arith.mulf %426, %424 : vector<10x8xf32>
    %428 = arith.addf %419, %427 : vector<10x8xf32>
    %c34_96 = arith.constant 34 : index
    %429 = memref.load %arg2[%c34_96] : memref<36xf32, #tpu.memory_space<smem>>
    %430 = vector.broadcast %429 : f32 to vector<10x8xf32>
    %431 = arith.mulf %430, %424 : vector<10x8xf32>
    %432 = arith.addf %423, %431 : vector<10x8xf32>
    %433 = vector.extract_strided_slice %414 {offsets = [0, 2], sizes = [10, 8], strides = [1, 1]} : vector<10x10xf32> to vector<10x8xf32>
    %c24_97 = arith.constant 24 : index
    %434 = memref.load %arg2[%c24_97] : memref<36xf32, #tpu.memory_space<smem>>
    %435 = vector.broadcast %434 : f32 to vector<10x8xf32>
    %436 = arith.mulf %435, %433 : vector<10x8xf32>
    %437 = arith.addf %428, %436 : vector<10x8xf32>
    %c33_98 = arith.constant 33 : index
    %438 = memref.load %arg2[%c33_98] : memref<36xf32, #tpu.memory_space<smem>>
    %439 = vector.broadcast %438 : f32 to vector<10x8xf32>
    %440 = arith.mulf %439, %433 : vector<10x8xf32>
    %441 = arith.addf %432, %440 : vector<10x8xf32>
    %442 = vector.extract_strided_slice %327 {offsets = [1, 0], sizes = [10, 10], strides = [1, 1]} : vector<12x10xf32> to vector<10x10xf32>
    %443 = vector.extract_strided_slice %442 {offsets = [0, 0], sizes = [10, 8], strides = [1, 1]} : vector<10x10xf32> to vector<10x8xf32>
    %c23_99 = arith.constant 23 : index
    %444 = memref.load %arg2[%c23_99] : memref<36xf32, #tpu.memory_space<smem>>
    %445 = vector.broadcast %444 : f32 to vector<10x8xf32>
    %446 = arith.mulf %445, %443 : vector<10x8xf32>
    %447 = arith.addf %437, %446 : vector<10x8xf32>
    %c32_100 = arith.constant 32 : index
    %448 = memref.load %arg2[%c32_100] : memref<36xf32, #tpu.memory_space<smem>>
    %449 = vector.broadcast %448 : f32 to vector<10x8xf32>
    %450 = arith.mulf %449, %443 : vector<10x8xf32>
    %451 = arith.addf %441, %450 : vector<10x8xf32>
    %452 = vector.extract_strided_slice %442 {offsets = [0, 1], sizes = [10, 8], strides = [1, 1]} : vector<10x10xf32> to vector<10x8xf32>
    %c22_101 = arith.constant 22 : index
    %453 = memref.load %arg2[%c22_101] : memref<36xf32, #tpu.memory_space<smem>>
    %454 = vector.broadcast %453 : f32 to vector<10x8xf32>
    %455 = arith.mulf %454, %452 : vector<10x8xf32>
    %456 = arith.addf %447, %455 : vector<10x8xf32>
    %c31_102 = arith.constant 31 : index
    %457 = memref.load %arg2[%c31_102] : memref<36xf32, #tpu.memory_space<smem>>
    %458 = vector.broadcast %457 : f32 to vector<10x8xf32>
    %459 = arith.mulf %458, %452 : vector<10x8xf32>
    %460 = arith.addf %451, %459 : vector<10x8xf32>
    %461 = vector.extract_strided_slice %442 {offsets = [0, 2], sizes = [10, 8], strides = [1, 1]} : vector<10x10xf32> to vector<10x8xf32>
    %c21_103 = arith.constant 21 : index
    %462 = memref.load %arg2[%c21_103] : memref<36xf32, #tpu.memory_space<smem>>
    %463 = vector.broadcast %462 : f32 to vector<10x8xf32>
    %464 = arith.mulf %463, %461 : vector<10x8xf32>
    %465 = arith.addf %456, %464 : vector<10x8xf32>
    %c30_104 = arith.constant 30 : index
    %466 = memref.load %arg2[%c30_104] : memref<36xf32, #tpu.memory_space<smem>>
    %467 = vector.broadcast %466 : f32 to vector<10x8xf32>
    %468 = arith.mulf %467, %461 : vector<10x8xf32>
    %469 = arith.addf %460, %468 : vector<10x8xf32>
    %470 = vector.extract_strided_slice %327 {offsets = [2, 0], sizes = [10, 10], strides = [1, 1]} : vector<12x10xf32> to vector<10x10xf32>
    %471 = vector.extract_strided_slice %470 {offsets = [0, 0], sizes = [10, 8], strides = [1, 1]} : vector<10x10xf32> to vector<10x8xf32>
    %c20_105 = arith.constant 20 : index
    %472 = memref.load %arg2[%c20_105] : memref<36xf32, #tpu.memory_space<smem>>
    %473 = vector.broadcast %472 : f32 to vector<10x8xf32>
    %474 = arith.mulf %473, %471 : vector<10x8xf32>
    %475 = arith.addf %465, %474 : vector<10x8xf32>
    %c29_106 = arith.constant 29 : index
    %476 = memref.load %arg2[%c29_106] : memref<36xf32, #tpu.memory_space<smem>>
    %477 = vector.broadcast %476 : f32 to vector<10x8xf32>
    %478 = arith.mulf %477, %471 : vector<10x8xf32>
    %479 = arith.addf %469, %478 : vector<10x8xf32>
    %480 = vector.extract_strided_slice %470 {offsets = [0, 1], sizes = [10, 8], strides = [1, 1]} : vector<10x10xf32> to vector<10x8xf32>
    %c19_107 = arith.constant 19 : index
    %481 = memref.load %arg2[%c19_107] : memref<36xf32, #tpu.memory_space<smem>>
    %482 = vector.broadcast %481 : f32 to vector<10x8xf32>
    %483 = arith.mulf %482, %480 : vector<10x8xf32>
    %484 = arith.addf %475, %483 : vector<10x8xf32>
    %c28_108 = arith.constant 28 : index
    %485 = memref.load %arg2[%c28_108] : memref<36xf32, #tpu.memory_space<smem>>
    %486 = vector.broadcast %485 : f32 to vector<10x8xf32>
    %487 = arith.mulf %486, %480 : vector<10x8xf32>
    %488 = arith.addf %479, %487 : vector<10x8xf32>
    %489 = vector.extract_strided_slice %470 {offsets = [0, 2], sizes = [10, 8], strides = [1, 1]} : vector<10x10xf32> to vector<10x8xf32>
    %c18_109 = arith.constant 18 : index
    %490 = memref.load %arg2[%c18_109] : memref<36xf32, #tpu.memory_space<smem>>
    %491 = vector.broadcast %490 : f32 to vector<10x8xf32>
    %492 = arith.mulf %491, %489 : vector<10x8xf32>
    %493 = arith.addf %484, %492 : vector<10x8xf32>
    %c27_110 = arith.constant 27 : index
    %494 = memref.load %arg2[%c27_110] : memref<36xf32, #tpu.memory_space<smem>>
    %495 = vector.broadcast %494 : f32 to vector<10x8xf32>
    %496 = arith.mulf %495, %489 : vector<10x8xf32>
    %497 = arith.addf %488, %496 : vector<10x8xf32>
    %c0_111 = arith.constant 0 : index
    %498 = memref.load %arg3[%c0_111] : memref<2xf32, #tpu.memory_space<smem>>
    %499 = vector.broadcast %498 : f32 to vector<10x8xf32>
    %500 = arith.addf %493, %499 : vector<10x8xf32>
    %c1_112 = arith.constant 1 : index
    %501 = memref.load %arg3[%c1_112] : memref<2xf32, #tpu.memory_space<smem>>
    %502 = vector.broadcast %501 : f32 to vector<10x8xf32>
    %503 = arith.addf %497, %502 : vector<10x8xf32>
    %cst_113 = arith.constant 0.000000e+00 : f32
    %504 = vector.broadcast %cst_113 : f32 to vector<11x45xf32>
    %cst_114 = arith.constant 0.000000e+00 : f32
    %505 = vector.broadcast %cst_114 : f32 to vector<11x45xf32>
    %cst_115 = arith.constant 0.000000e+00 : f32
    %506 = vector.broadcast %cst_115 : f32 to vector<10x1xf32>
    %507 = tpu.concatenate %506, %500, %506 in 1 : vector<10x1xf32>, vector<10x8xf32>, vector<10x1xf32> -> vector<10x10xf32>
    %cst_116 = arith.constant 0.000000e+00 : f32
    %508 = vector.broadcast %cst_116 : f32 to vector<1x10xf32>
    %509 = tpu.concatenate %508, %507, %508 in 0 : vector<1x10xf32>, vector<10x10xf32>, vector<1x10xf32> -> vector<12x10xf32>
    %510 = vector.extract_strided_slice %509 {offsets = [0, 1], sizes = [12, 9], strides = [1, 1]} : vector<12x10xf32> to vector<12x9xf32>
    %511 = tpu.concatenate %510, %510, %510, %510, %510 in 1 : vector<12x9xf32>, vector<12x9xf32>, vector<12x9xf32>, vector<12x9xf32>, vector<12x9xf32> -> vector<12x45xf32>
    %512 = vector.extract_strided_slice %511 {offsets = [1, 0], sizes = [11, 45], strides = [1, 1]} : vector<12x45xf32> to vector<11x45xf32>
    %c0_117 = arith.constant 0 : index
    %c0_118 = arith.constant 0 : index
    %513 = vector.load %arg4[%c0_117, %c0_118] : memref<16x45xf32, #tpu.memory_space<vmem>>, vector<1x45xf32>
    %514 = vector.shape_cast %513 : vector<1x45xf32> to vector<45xf32>
    %515 = vector.shape_cast %514 : vector<45xf32> to vector<1x45xf32>
    %516 = vector.broadcast %515 : vector<1x45xf32> to vector<11x45xf32>
    %517 = arith.mulf %512, %516 : vector<11x45xf32>
    %518 = arith.addf %504, %517 : vector<11x45xf32>
    %c1_119 = arith.constant 1 : index
    %c0_120 = arith.constant 0 : index
    %519 = vector.load %arg4[%c1_119, %c0_120] : memref<16x45xf32, #tpu.memory_space<vmem>>, vector<1x45xf32>
    %520 = vector.shape_cast %519 : vector<1x45xf32> to vector<45xf32>
    %521 = vector.shape_cast %520 : vector<45xf32> to vector<1x45xf32>
    %522 = vector.broadcast %521 : vector<1x45xf32> to vector<11x45xf32>
    %523 = arith.mulf %512, %522 : vector<11x45xf32>
    %524 = arith.addf %505, %523 : vector<11x45xf32>
    %525 = vector.extract_strided_slice %511 {offsets = [0, 0], sizes = [11, 45], strides = [1, 1]} : vector<12x45xf32> to vector<11x45xf32>
    %c4_121 = arith.constant 4 : index
    %c0_122 = arith.constant 0 : index
    %526 = vector.load %arg4[%c4_121, %c0_122] : memref<16x45xf32, #tpu.memory_space<vmem>>, vector<1x45xf32>
    %527 = vector.shape_cast %526 : vector<1x45xf32> to vector<45xf32>
    %528 = vector.shape_cast %527 : vector<45xf32> to vector<1x45xf32>
    %529 = vector.broadcast %528 : vector<1x45xf32> to vector<11x45xf32>
    %530 = arith.mulf %525, %529 : vector<11x45xf32>
    %531 = arith.addf %518, %530 : vector<11x45xf32>
    %c5_123 = arith.constant 5 : index
    %c0_124 = arith.constant 0 : index
    %532 = vector.load %arg4[%c5_123, %c0_124] : memref<16x45xf32, #tpu.memory_space<vmem>>, vector<1x45xf32>
    %533 = vector.shape_cast %532 : vector<1x45xf32> to vector<45xf32>
    %534 = vector.shape_cast %533 : vector<45xf32> to vector<1x45xf32>
    %535 = vector.broadcast %534 : vector<1x45xf32> to vector<11x45xf32>
    %536 = arith.mulf %525, %535 : vector<11x45xf32>
    %537 = arith.addf %524, %536 : vector<11x45xf32>
    %538 = vector.extract_strided_slice %509 {offsets = [0, 0], sizes = [12, 9], strides = [1, 1]} : vector<12x10xf32> to vector<12x9xf32>
    %539 = tpu.concatenate %538, %538, %538, %538, %538 in 1 : vector<12x9xf32>, vector<12x9xf32>, vector<12x9xf32>, vector<12x9xf32>, vector<12x9xf32> -> vector<12x45xf32>
    %540 = vector.extract_strided_slice %539 {offsets = [1, 0], sizes = [11, 45], strides = [1, 1]} : vector<12x45xf32> to vector<11x45xf32>
    %c2_125 = arith.constant 2 : index
    %c0_126 = arith.constant 0 : index
    %541 = vector.load %arg4[%c2_125, %c0_126] : memref<16x45xf32, #tpu.memory_space<vmem>>, vector<1x45xf32>
    %542 = vector.shape_cast %541 : vector<1x45xf32> to vector<45xf32>
    %543 = vector.shape_cast %542 : vector<45xf32> to vector<1x45xf32>
    %544 = vector.broadcast %543 : vector<1x45xf32> to vector<11x45xf32>
    %545 = arith.mulf %540, %544 : vector<11x45xf32>
    %546 = arith.addf %531, %545 : vector<11x45xf32>
    %c3_127 = arith.constant 3 : index
    %c0_128 = arith.constant 0 : index
    %547 = vector.load %arg4[%c3_127, %c0_128] : memref<16x45xf32, #tpu.memory_space<vmem>>, vector<1x45xf32>
    %548 = vector.shape_cast %547 : vector<1x45xf32> to vector<45xf32>
    %549 = vector.shape_cast %548 : vector<45xf32> to vector<1x45xf32>
    %550 = vector.broadcast %549 : vector<1x45xf32> to vector<11x45xf32>
    %551 = arith.mulf %540, %550 : vector<11x45xf32>
    %552 = arith.addf %537, %551 : vector<11x45xf32>
    %553 = vector.extract_strided_slice %539 {offsets = [0, 0], sizes = [11, 45], strides = [1, 1]} : vector<12x45xf32> to vector<11x45xf32>
    %c6_129 = arith.constant 6 : index
    %c0_130 = arith.constant 0 : index
    %554 = vector.load %arg4[%c6_129, %c0_130] : memref<16x45xf32, #tpu.memory_space<vmem>>, vector<1x45xf32>
    %555 = vector.shape_cast %554 : vector<1x45xf32> to vector<45xf32>
    %556 = vector.shape_cast %555 : vector<45xf32> to vector<1x45xf32>
    %557 = vector.broadcast %556 : vector<1x45xf32> to vector<11x45xf32>
    %558 = arith.mulf %553, %557 : vector<11x45xf32>
    %559 = arith.addf %546, %558 : vector<11x45xf32>
    %c7_131 = arith.constant 7 : index
    %c0_132 = arith.constant 0 : index
    %560 = vector.load %arg4[%c7_131, %c0_132] : memref<16x45xf32, #tpu.memory_space<vmem>>, vector<1x45xf32>
    %561 = vector.shape_cast %560 : vector<1x45xf32> to vector<45xf32>
    %562 = vector.shape_cast %561 : vector<45xf32> to vector<1x45xf32>
    %563 = vector.broadcast %562 : vector<1x45xf32> to vector<11x45xf32>
    %564 = arith.mulf %553, %563 : vector<11x45xf32>
    %565 = arith.addf %552, %564 : vector<11x45xf32>
    %cst_133 = arith.constant 0.000000e+00 : f32
    %566 = vector.broadcast %cst_133 : f32 to vector<10x1xf32>
    %567 = tpu.concatenate %566, %503, %566 in 1 : vector<10x1xf32>, vector<10x8xf32>, vector<10x1xf32> -> vector<10x10xf32>
    %cst_134 = arith.constant 0.000000e+00 : f32
    %568 = vector.broadcast %cst_134 : f32 to vector<1x10xf32>
    %569 = tpu.concatenate %568, %567, %568 in 0 : vector<1x10xf32>, vector<10x10xf32>, vector<1x10xf32> -> vector<12x10xf32>
    %570 = vector.extract_strided_slice %569 {offsets = [0, 1], sizes = [12, 9], strides = [1, 1]} : vector<12x10xf32> to vector<12x9xf32>
    %571 = tpu.concatenate %570, %570, %570, %570, %570 in 1 : vector<12x9xf32>, vector<12x9xf32>, vector<12x9xf32>, vector<12x9xf32>, vector<12x9xf32> -> vector<12x45xf32>
    %572 = vector.extract_strided_slice %571 {offsets = [1, 0], sizes = [11, 45], strides = [1, 1]} : vector<12x45xf32> to vector<11x45xf32>
    %c8_135 = arith.constant 8 : index
    %c0_136 = arith.constant 0 : index
    %573 = vector.load %arg4[%c8_135, %c0_136] : memref<16x45xf32, #tpu.memory_space<vmem>>, vector<1x45xf32>
    %574 = vector.shape_cast %573 : vector<1x45xf32> to vector<45xf32>
    %575 = vector.shape_cast %574 : vector<45xf32> to vector<1x45xf32>
    %576 = vector.broadcast %575 : vector<1x45xf32> to vector<11x45xf32>
    %577 = arith.mulf %572, %576 : vector<11x45xf32>
    %578 = arith.addf %559, %577 : vector<11x45xf32>
    %c9_137 = arith.constant 9 : index
    %c0_138 = arith.constant 0 : index
    %579 = vector.load %arg4[%c9_137, %c0_138] : memref<16x45xf32, #tpu.memory_space<vmem>>, vector<1x45xf32>
    %580 = vector.shape_cast %579 : vector<1x45xf32> to vector<45xf32>
    %581 = vector.shape_cast %580 : vector<45xf32> to vector<1x45xf32>
    %582 = vector.broadcast %581 : vector<1x45xf32> to vector<11x45xf32>
    %583 = arith.mulf %572, %582 : vector<11x45xf32>
    %584 = arith.addf %565, %583 : vector<11x45xf32>
    %585 = vector.extract_strided_slice %571 {offsets = [0, 0], sizes = [11, 45], strides = [1, 1]} : vector<12x45xf32> to vector<11x45xf32>
    %c12_139 = arith.constant 12 : index
    %c0_140 = arith.constant 0 : index
    %586 = vector.load %arg4[%c12_139, %c0_140] : memref<16x45xf32, #tpu.memory_space<vmem>>, vector<1x45xf32>
    %587 = vector.shape_cast %586 : vector<1x45xf32> to vector<45xf32>
    %588 = vector.shape_cast %587 : vector<45xf32> to vector<1x45xf32>
    %589 = vector.broadcast %588 : vector<1x45xf32> to vector<11x45xf32>
    %590 = arith.mulf %585, %589 : vector<11x45xf32>
    %591 = arith.addf %578, %590 : vector<11x45xf32>
    %c13_141 = arith.constant 13 : index
    %c0_142 = arith.constant 0 : index
    %592 = vector.load %arg4[%c13_141, %c0_142] : memref<16x45xf32, #tpu.memory_space<vmem>>, vector<1x45xf32>
    %593 = vector.shape_cast %592 : vector<1x45xf32> to vector<45xf32>
    %594 = vector.shape_cast %593 : vector<45xf32> to vector<1x45xf32>
    %595 = vector.broadcast %594 : vector<1x45xf32> to vector<11x45xf32>
    %596 = arith.mulf %585, %595 : vector<11x45xf32>
    %597 = arith.addf %584, %596 : vector<11x45xf32>
    %598 = vector.extract_strided_slice %569 {offsets = [0, 0], sizes = [12, 9], strides = [1, 1]} : vector<12x10xf32> to vector<12x9xf32>
    %599 = tpu.concatenate %598, %598, %598, %598, %598 in 1 : vector<12x9xf32>, vector<12x9xf32>, vector<12x9xf32>, vector<12x9xf32>, vector<12x9xf32> -> vector<12x45xf32>
    %600 = vector.extract_strided_slice %599 {offsets = [1, 0], sizes = [11, 45], strides = [1, 1]} : vector<12x45xf32> to vector<11x45xf32>
    %c10_143 = arith.constant 10 : index
    %c0_144 = arith.constant 0 : index
    %601 = vector.load %arg4[%c10_143, %c0_144] : memref<16x45xf32, #tpu.memory_space<vmem>>, vector<1x45xf32>
    %602 = vector.shape_cast %601 : vector<1x45xf32> to vector<45xf32>
    %603 = vector.shape_cast %602 : vector<45xf32> to vector<1x45xf32>
    %604 = vector.broadcast %603 : vector<1x45xf32> to vector<11x45xf32>
    %605 = arith.mulf %600, %604 : vector<11x45xf32>
    %606 = arith.addf %591, %605 : vector<11x45xf32>
    %c11_145 = arith.constant 11 : index
    %c0_146 = arith.constant 0 : index
    %607 = vector.load %arg4[%c11_145, %c0_146] : memref<16x45xf32, #tpu.memory_space<vmem>>, vector<1x45xf32>
    %608 = vector.shape_cast %607 : vector<1x45xf32> to vector<45xf32>
    %609 = vector.shape_cast %608 : vector<45xf32> to vector<1x45xf32>
    %610 = vector.broadcast %609 : vector<1x45xf32> to vector<11x45xf32>
    %611 = arith.mulf %600, %610 : vector<11x45xf32>
    %612 = arith.addf %597, %611 : vector<11x45xf32>
    %613 = vector.extract_strided_slice %599 {offsets = [0, 0], sizes = [11, 45], strides = [1, 1]} : vector<12x45xf32> to vector<11x45xf32>
    %c14_147 = arith.constant 14 : index
    %c0_148 = arith.constant 0 : index
    %614 = vector.load %arg4[%c14_147, %c0_148] : memref<16x45xf32, #tpu.memory_space<vmem>>, vector<1x45xf32>
    %615 = vector.shape_cast %614 : vector<1x45xf32> to vector<45xf32>
    %616 = vector.shape_cast %615 : vector<45xf32> to vector<1x45xf32>
    %617 = vector.broadcast %616 : vector<1x45xf32> to vector<11x45xf32>
    %618 = arith.mulf %613, %617 : vector<11x45xf32>
    %619 = arith.addf %606, %618 : vector<11x45xf32>
    %c15_149 = arith.constant 15 : index
    %c0_150 = arith.constant 0 : index
    %620 = vector.load %arg4[%c15_149, %c0_150] : memref<16x45xf32, #tpu.memory_space<vmem>>, vector<1x45xf32>
    %621 = vector.shape_cast %620 : vector<1x45xf32> to vector<45xf32>
    %622 = vector.shape_cast %621 : vector<45xf32> to vector<1x45xf32>
    %623 = vector.broadcast %622 : vector<1x45xf32> to vector<11x45xf32>
    %624 = arith.mulf %613, %623 : vector<11x45xf32>
    %625 = arith.addf %612, %624 : vector<11x45xf32>
    %c1_151 = arith.constant 1 : index
    %c0_152 = arith.constant 0 : index
    %c0_153 = arith.constant 0 : index
    %c0_154 = arith.constant 0 : index
    %626 = vector.load %arg5[%c1_151, %c0_152, %c0_153, %c0_154] : memref<2x2x11x45xf32, #tpu.memory_space<vmem>>, vector<1x1x11x45xf32>
    %627 = vector.shape_cast %626 : vector<1x1x11x45xf32> to vector<11x45xf32>
    %628 = vector.shape_cast %619 : vector<11x45xf32> to vector<1x1x11x45xf32>
    tpu.vector_store %arg5[%c1_151, %c0_152, %c0_153, %c0_154], %628 {strides = array<i32>} : memref<2x2x11x45xf32, #tpu.memory_space<vmem>>, vector<1x1x11x45xf32>,
    %c1_155 = arith.constant 1 : index
    %c1_156 = arith.constant 1 : index
    %c0_157 = arith.constant 0 : index
    %c0_158 = arith.constant 0 : index
    %629 = vector.load %arg5[%c1_155, %c1_156, %c0_157, %c0_158] : memref<2x2x11x45xf32, #tpu.memory_space<vmem>>, vector<1x1x11x45xf32>
    %630 = vector.shape_cast %629 : vector<1x1x11x45xf32> to vector<11x45xf32>
    %631 = vector.shape_cast %625 : vector<11x45xf32> to vector<1x1x11x45xf32>
    tpu.vector_store %arg5[%c1_155, %c1_156, %c0_157, %c0_158], %631 {strides = array<i32>} : memref<2x2x11x45xf32, #tpu.memory_space<vmem>>, vector<1x1x11x45xf32>,
    return
  }
  func.func @transform_0(%arg0: i32) -> (i32, i32, i32, i32) {
    %c0_i32 = arith.constant 0 : i32
    %c0_i32_0 = arith.constant 0 : i32
    %c0_i32_1 = arith.constant 0 : i32
    %c0_i32_2 = arith.constant 0 : i32
    %c0_i32_3 = arith.constant 0 : i32
    return %c0_i32, %c0_i32_0, %c0_i32_1, %c0_i32_2 : i32, i32, i32, i32
  }
  func.func @transform_1(%arg0: i32) -> i32 {
    %c0_i32 = arith.constant 0 : i32
    %c0_i32_0 = arith.constant 0 : i32
    return %c0_i32 : i32
  }
  func.func @transform_2(%arg0: i32) -> i32 {
    %c0_i32 = arith.constant 0 : i32
    %c0_i32_0 = arith.constant 0 : i32
    return %c0_i32 : i32
  }
  func.func @transform_3(%arg0: i32) -> (i32, i32) {
    %c0_i32 = arith.constant 0 : i32
    %c0_i32_0 = arith.constant 0 : i32
    %c0_i32_1 = arith.constant 0 : i32
    return %c0_i32, %c0_i32_0 : i32, i32
  }
  func.func @transform_4(%arg0: i32) -> (i32, i32, i32, i32) {
    %c0_i32 = arith.constant 0 : i32
    %c0_i32_0 = arith.constant 0 : i32
    %c0_i32_1 = arith.constant 0 : i32
    %c0_i32_2 = arith.constant 0 : i32
    %c0_i32_3 = arith.constant 0 : i32
    return %c0_i32, %c0_i32_0, %c0_i32_1, %c0_i32_2 : i32, i32, i32, i32
  }
}

</mosaic_0001>

<bundles_post_ra>
// kernel: model_forward.1
= control target key start
LH: loop header
LB: loop body
LE: loop exit
PB: predicated region body
PF: predicated region fallthrough
CT: control target
= control target key end

     0   :  { %9 = vsyncpa [#allocation3], 0  ;;  %s3916_s0 = inlined_call_operand.vmem [shape: f32[2,2,8,6], index: 0, kind: input, shape index: {}]   ;;  %s3917_s1 = inlined_call_operand.vmem [shape: f32[36], index: 1, kind: input, shape index: {}]   ;;  %s3918_s2 = inlined_call_operand.vmem [shape: f32[2], index: 2, kind: input, shape index: {}]   ;;  %s3919_s3 = inlined_call_operand.vmem [shape: f32[16,45], index: 3, kind: input, shape index: {}]   ;;  %s3920_s4 = inlined_call_operand.vmem [shape: f32[2,2,11,45], index: 4, kind: output, shape index: {}]  }
   0x1   :  { %s19_s17 = sshll.u32 %s3917_s1, 4  ;;  %s20_s17 = int_to_ptr.vmem [resolvable:$true] %s19_s17 }
   0x2   :  { %10 = vsyncpa [#allocation5], 0  ;;  %s29_s20 = sshll.u32 %s3918_s2, 4  ;;  %s2063_s21 = scalar_lea.vmem %s20_s17, 16  ;;  %s30_s20 = int_to_ptr.vmem [resolvable:$true] %s29_s20 }
   0x3   :  { %p2064_p0 = scmp.ne.s32.totalorder %s20_s17, %s2063_s21  ;;  %p2068_p1 = scmp.lt.s32.totalorder %s20_s17, %s20_s17 }
   0x4   :  { %p2069_p2 = scmp.lt.s32.totalorder %s2063_s21, %s2063_s21 }
   0x6   :  { %p2070_p3 = por %p2069_p2, %p2068_p1 }
   0x8   :  { %p2071_p4 = pnand %p2070_p3, %p2064_p0 }
   0xa   :  { %2074 = shalt.err (!%p2071_p4)
}
   0xb   :  { %s2091_s22 = smov [#allocation2]   ;;  %s2075_s23 = scalar_lea.vmem %s30_s20, 16 }
   0xc   :  { %22 = dma.vmem_to_smem %s20_s17, 16, %s2091_s22, [#allocation3]  }
   0xd   :  { %p2076_p5 = scmp.ne.s32.totalorder %s30_s20, %s2075_s23  ;;  %p2080_p6 = scmp.lt.s32.totalorder %s30_s20, %s30_s20 }
   0xe   :  { %p2081_p7 = scmp.lt.s32.totalorder %s2075_s23, %s2075_s23 }
  0x10   :  { %p2082_p8 = por %p2081_p7, %p2080_p6 }
  0x12   :  { %p2083_p9 = pnand %p2082_p8, %p2076_p5 }
  0x14   :  { %2086 = shalt.err (!%p2083_p9)
}
  0x15   :  { %s2092_s1 = smov [#allocation4]  }
  0x16   :  { %32 = dma.vmem_to_smem %s30_s20, 16, %s2092_s1, [#allocation5]  }
  0x17   :  { %2087 = dma.done.wait [#allocation3], 16  }
  0x18   :  { %2088 = vsyncadd [#allocation3], 4294967280 }
  0x19   :  { %2089 = dma.done.wait [#allocation5], 16  }
  0x1a   :  { %2090 = vsyncadd [#allocation5], 4294967280 }
  0x1b   :  { %41 = sfence }
  0x1c   :  { %v42_v0 = vld [vmem:[%s3916_s0] sm:$0xff]  ;;  %s2093_s25 = smov 2   ;;  %v1992_v1 = vld [vmem:[%s3916_s0 + $0x18] sm:$0xff]  ;;  %v1936_v2 = vld [vmem:[%s3916_s0 + $0x8] sm:$0xff]  ;;  %s1940_s6 = sld [smem:[#allocation2 + $0x10]]  ;;  %vm47_vm0 = vcmask 15360  }
  0x1d   :  { %44 = vrot.lane.b32.xlu0 %v42_v0, %s2093_s25  ;;  %1008 = vrot.lane.b32.xlu1 %v1992_v1, %s2093_s25  ;;  %v1991_v3 = vld [vmem:[%s3916_s0 + $0x10] sm:$0xff]  ;;  %s1939_s7 = sld [smem:[#allocation2 + $0x7]]  ;;  %s1941_s8 = sld [smem:[#allocation2 + $0x6]]  ;;  %vm49_vm1 = vcmask 64512   ;;  %vm54_vm2 = vcmask 1041408   ;;  %vm144_vm3 = vcmask 1046528  }
  0x1e   :  { %s1942_s9 = sld [smem:[#allocation2 + $0xf]]  ;;  %s1956_s10 = sld [smem:[#allocation2 + $0x19]]  ;;  %vm239_vm4 = vcmask 1045504   ;;  %vm600_vm5 = vcmask 7168   ;;  %vm603_vm6 = vcmask 72704   ;;  %vm608_vm7 = vcmask 1040384  }
  0x1f   :  { %s1957_s11 = sld [smem:[#allocation2 + $0x22]]  ;;  %s2001_s12 = sld [smem:[#allocation2 + $0x4]]  ;;  %vm615_vm8 = vcmask 1042432   ;;  %vm651_vm9 = vcmask 146432   ;;  %vm654_vm10 = vcmask 220160   ;;  %vm657_vm11 = vcmask 293888  }
  0x20   :  { %s2148_s13 = sld [smem:[#allocation2 + $0x3]]  ;;  %s2150_s14 = sld [smem:[#allocation2 + $0xd]]  ;;  %vm985_vm12 = vcmask 367617   ;;  %vm987_vm13 = vcmask 363520  }
  0x21   :  { %60 = vrot.lane.b32.xlu0 %v1936_v2, %s2093_s25  ;;  %s2152_s15 = sld [smem:[#allocation2 + $0xc]]  ;;  %s2154_s16 = sld [smem:[#allocation2 + $0x1]] }
  0x22   :  { %s2156_s17 = sld [smem:[#allocation2 + $0x18]]  ;;  %s2158_s18 = sld [smem:[#allocation2 + $0xa]]  ;;  %v2184_v4 = vstv %s1940_s6 }
  0x23   :  { %s2160_s0 = sld [smem:[#allocation2 + $0x21]]  ;;  %s2162_s19 = sld [smem:[#allocation2 + $0x16]]  ;;  %v2186_v5 = vstv %s1939_s7  ;;  %v2188_v6 = vstv %s1941_s8 }
  0x24   :  { %s2164_s20 = sld [smem:[#allocation2]]  ;;  %s2166_s21 = sld [smem:[#allocation2 + $0x9]]  ;;  %v2194_v7 = vstv %s1942_s9  ;;  %v2196_v8 = vstv %s1956_s10 }
  0x25   :  { %995 = vrot.lane.b32.xlu0 %v1991_v3, %s2093_s25  ;;  %s2168_s22 = sld [smem:[#allocation2 + $0x8]]  ;;  %s2170_s23 = sld [smem:[#allocation2 + $0x5]]  ;;  %v2198_v9 = vstv %s1957_s11  ;;  %v2200_v10 = vstv %s2001_s12 }
  0x26   :  { %s2172_s1 = sld [smem:[#allocation2 + $0x1f]]  ;;  %s2174_s2 = sld [smem:[#allocation2 + $0x15]]  ;;  %v2207_v12 = vstv %s2148_s13  ;;  %v2210_v13 = vstv %s2150_s14 }
  0x27   :  { %s2176_s24 = sld [smem:[#allocation2 + $0x1e]]  ;;  %s2178_s25 = sld [smem:[#allocation2 + $0x13]]  ;;  %v2213_v14 = vstv %s2152_s15  ;;  %v2216_v15 = vstv %s2154_s16 }
  0x28   :  { %s2180_s26 = sld [smem:[#allocation2 + $0x1c]]  ;;  %s2182_s27 = sld [smem:[#allocation2 + $0x12]]  ;;  %v2224_v17 = vstv %s2156_s17  ;;  %v2230_v19 = vstv %s2158_s18 }
  0x29   :  { %s2190_s28 = sld [smem:[#allocation2 + $0x1b]]  ;;  %s2192_s29 = sld [smem:[#allocation2 + $0xe]]  ;;  %v2227_v18 = vstv %s2160_s0  ;;  %v2238_v22 = vstv %s2162_s19 }
  0x2a   :  { %s2202_s30 = sld [smem:[#allocation2 + $0x2]]  ;;  %s2204_s5 = sld [smem:[#allocation2 + $0xb]]  ;;  %v2241_v23 = vstv %s2164_s20  ;;  %v2247_v26 = vstv %s2166_s21 }
  0x2b   :  { %s2218_s6 = sld [smem:[#allocation2 + $0x1a]]  ;;  %s2220_s7 = sld [smem:[#allocation2 + $0x20]]  ;;  %v2253_v28 = vstv %s2168_s22  ;;  %v2265_v33 = vstv %s2170_s23 }
  0x2c   :  { %s2232_s8 = sld [smem:[#allocation2 + $0x17]]  ;;  %s2234_s9 = sld [smem:[#allocation2 + $0x14]]  ;;  %v2256_v30 = vstv %s2172_s1  ;;  %v2259_v31 = vstv %s2174_s2  ;;  %3973 = vst [vmem:[#allocation8_spill] sm:$0xff] %v2265_v33 }
  0x2d   :  { %s2244_s10 = sld [smem:[#allocation2 + $0x1d]]  ;;  %v2262_v32 = vstv %s2176_s24  ;;  %v2272_v36 = vstv %s2178_s25  ;;  %s2094_s11 = smov 127  }
  0x2e   :  { %v2275_v37 = vstv %s2180_s26  ;;  %v2282_v40 = vstv %s2182_s27  ;;  %s2095_s12 = smov 126   ;;  %s1938_s13 = sld [smem:[#allocation2 + $0x11]] }
  0x2f   :  { %v2285_v41 = vstv %s2190_s28  ;;  %v2292_v44 = vstv %s2192_s29  ;;  %s1955_s14 = sld [smem:[#allocation2 + $0x23]]  ;;  %s584_s15 = sld [smem:[#allocation4]] }
  0x30   :  { %3975 = vst [vmem:[#allocation10_spill] sm:$0xff] %v2292_v44  ;;  %v2295_v45 = vstv %s2202_s30  ;;  %v2300_v48 = vstv %s2204_s5  ;;  %s2096_s16 = smov 1   ;;  %s1972_s17 = sld [smem:[#allocation4 + $0x1]] }
  0x31   :  { %3976 = vst [vmem:[#allocation11_spill] sm:$0xff] %v2295_v45  ;;  %3977 = vst [vmem:[#allocation12_spill] sm:$0xff] %v2300_v48  ;;  %v2303_v49 = vstv %s2218_s6  ;;  %v2307_v51 = vstv %s2220_s7  ;;  %s2097_s18 = smov 8   ;;  %s2098_s0 = smov 17  }
  0x32   :  { %3978 = vst [vmem:[#allocation13_spill] sm:$0xff] %v2303_v49  ;;  %3979 = vst [vmem:[#allocation14_spill] sm:$0xff] %v2307_v51  ;;  %v2310_v52 = vstv %s2232_s8  ;;  %v2313_v53 = vstv %s2234_s9  ;;  %s2099_s19 = smov 26   ;;  %s2100_s20 = smov 35  }
  0x33   :  { %3980 = vst [vmem:[#allocation15_spill] sm:$0xff] %v2310_v52  ;;  %3981 = vst [vmem:[#allocation16_spill] sm:$0xff] %v2313_v53  ;;  %v2321_v57 = vstv %s2244_s10  ;;  %s2101_s21 = smov 9   ;;  %s2102_s22 = smov 18  }
  0x34   :  { %3982 = vst [vmem:[#allocation17_spill] sm:$0xff] %v2321_v57  ;;  %s2103_s23 = smov 27   ;;  %s2104_s1 = smov 36  }
  0x8f   :  { %v45_v11 = vpop.permute.xlu0 %44  ;;  %v1009_v20 = vpop.permute.xlu1 %1008 }
  0x90   :  { %v48_v16 = vsel %vm47_vm0, 0.0, %v45_v11  ;;  %v1011_v24 = vsel %vm47_vm0, 0.0, %v1009_v20 }
  0x91   :  { %v50_v21 = vsel %vm49_vm1, %v48_v16, 0.0  ;;  %v2250_v27 = vsel %vm49_vm1, %v1011_v24, 0.0 }
  0x92   :  { %v52_v25 = vrot.slane %v50_v21, 6 }
  0x93   :  { %v61_v29 = vpop.permute.xlu0 %60 }
  0x94   :  { %v2268_v34 = vsel %vm54_vm2, 0.0, %v52_v25  ;;  %v63_v35 = vsel %vm47_vm0, 0.0, %v61_v29  ;;  %v2288_v42 = vsel %vm54_vm2, %v52_v25, 0.0 }
  0x95   :  { %v98_v38 = vmul.f32 %v2184_v4, %v2268_v34  ;;  %v84_v39 = vmul.f32 %v2186_v5, %v2268_v34  ;;  %3974 = vst [vmem:[#allocation9_spill] sm:$0xff] %v2288_v42  ;;  %v64_v43 = vsel %vm49_vm1, %v63_v35, 0.0  ;;  %v112_v54 = vmul.f32 %v2188_v6, %v2268_v34 }
  0x96   :  { %v66_v46 = vrot.slane %v64_v43, 6  ;;  %v85_v55 = vmul.f32 %v2186_v5, %v2288_v42  ;;  %v126_v59 = vmul.f32 %v2194_v7, %v2268_v34  ;;  %v99_v60 = vmul.f32 %v2184_v4, %v2288_v42 }
  0x97   :  { %102 = vrot.lane.b32.xlu0 %v98_v38, %s2094_s11  ;;  %88 = vrot.lane.b32.xlu1 %v84_v39, %s2094_s11  ;;  %v996_v47 = vpop.permute.xlu0 %995  ;;  %v113_v63 = vmul.f32 %v2188_v6, %v2288_v42  ;;  %v2340_v1 = vmul.f32 %v2200_v10, %v2288_v42  ;;  %v127_v2 = vmul.f32 %v2194_v7, %v2288_v42 }
  0x98   :  { %v998_v50 = vsel %vm47_vm0, 0.0, %v996_v47  ;;  %v2324_v58 = vsel %vm54_vm2, 0.0, %v66_v46  ;;  %v2334_v62 = vsel %vm54_vm2, %v66_v46, 0.0  ;;  %v167_v11 = vmul.f32 %v2200_v10, %v2268_v34 }
  0x99   :  { %v999_v56 = vsel %vm49_vm1, %v998_v50, 0.0  ;;  %3983 = vst [vmem:[#allocation18_spill] sm:$0xff] %v2340_v1  ;;  %v2346_v3 = vmul.f32 %v2238_v22, %v2324_v58  ;;  %v184_v16 = vmul.f32 %v2210_v13, %v2268_v34  ;;  %v342_v20 = vmul.f32 %v2196_v8, %v2324_v58 }
  0x9a   :  { %v1001_v0 = vrot.slane %v999_v56, 6  ;;  %v2359_v24 = vmul.f32 %v2210_v13, %v2288_v42  ;;  %v2363_v25 = vmul.f32 %v2207_v12, %v2268_v34  ;;  %v357_v29 = vmul.f32 %v2198_v9, %v2334_v62 }
  0x9b   :  { %116 = vrot.lane.b32.xlu0 %v112_v54, %s2095_s12  ;;  %90 = vrot.lane.b32.xlu1 %v85_v55, %s2094_s11  ;;  %v343_v35 = vmul.f32 %v2196_v8, %v2334_v62  ;;  %v371_v38 = vmul.f32 %v2224_v17, %v2334_v62  ;;  %v2378_v43 = vmul.f32 %v2198_v9, %v2324_v58  ;;  %v188_v50 = vrot.slane %v184_v16, 1 }
  0x9c   :  { %v2355_v21 = vsel %vm54_vm2, 0.0, %v1001_v0  ;;  %3984 = vst [vmem:[#allocation19_spill] sm:$0xff] %v2359_v24  ;;  %v2372_v39 = vsel %vm54_vm2, %v1001_v0, 0.0  ;;  %v2382_v46 = vmul.f32 %v2227_v18, %v2334_v62  ;;  %v2386_v47 = vmul.f32 %v2238_v22, %v2334_v62 }
  0x9d   :  { %v2391_v54 = vmul.f32 %v2224_v17, %v2324_v58  ;;  %v2395_v55 = vmul.f32 %v2227_v18, %v2324_v58  ;;  %v2399_v56 = vmul.f32 %v2200_v10, %v2355_v21  ;;  %v2407_v0 = vmul.f32 %v2207_v12, %v2355_v21 }
  0x9e   :  { %v2412_v49 = vmul.f32 %v2372_v39, %v2188_v6  ;;  %v2416_v57 = vmul.f32 %v2372_v39, %v2184_v4  ;;  %v2424_v53 = vmul.f32 %v2372_v39, %v2194_v7  ;;  %v2430_v16 = vmul.f32 %v2355_v21, %v2188_v6 }
  0x9f   :  { %130 = vrot.lane.b32.xlu0 %v126_v59, %s2095_s12  ;;  %104 = vrot.lane.b32.xlu1 %v99_v60, %s2094_s11  ;;  %v171_v59 = vrot.slane %v167_v11, 1  ;;  %v2403_v60 = vmul.f32 %v2372_v39, %v2186_v5  ;;  %v2420_v11 = vmul.f32 %v2355_v21, %v2186_v5  ;;  %v2435_v52 = vmul.f32 %v2200_v10, %v2372_v39 }
  0xa0   :  { %v2439_v5 = vmul.f32 %v2207_v12, %v2372_v39  ;;  %v2443_v51 = vmul.f32 %v2355_v21, %v2184_v4  ;;  %v2449_v6 = vmul.f32 %v2230_v19, %v2288_v42  ;;  %v2455_v10 = vmul.f32 %v2355_v21, %v2194_v7 }
  0xa1   :  { %v3987_v61 = vrot.slane %v2340_v1, 1  ;;  %v3989_v4 = vrot.slane %v2359_v24, 1  ;;  %v2469_v44 = vmul.f32 %v2207_v12, %v2288_v42  ;;  %v2474_v7 = vmul.f32 %v2241_v23, %v2288_v42 }
  0xa2   :  { %3985 = vst [vmem:[#allocation20_spill] sm:$0xff] %v2443_v51  ;;  %3986 = vst [vmem:[#allocation21_spill] sm:$0xff] %v2449_v6  ;;  %v3931_v51 = vrot.slane %v2449_v6, 2  ;;  %v313_v12 = vmul.f32 %v2247_v26, %v2268_v34 }
  0xa3   :  { %118 = vrot.lane.b32.xlu1 %v113_v63, %s2095_s12  ;;  %346 = vrot.lane.b32.xlu0 %v342_v20, %s2094_s11  ;;  %v279_v63 = vmul.f32 %v2230_v19, %v2268_v34  ;;  %v296_v20 = vmul.f32 %v2241_v23, %v2268_v34  ;;  %v2460_v48 = vsel %vm144_vm3, %v171_v59, %v3987_v61  ;;  %v3992_v59 = vrot.slane %v2250_v27, 6 }
  0xa4   :  { %3988 = vst [vmem:[#allocation22_spill] sm:$0xff] %v2460_v48  ;;  %v2465_v45 = vsel %vm144_vm3, %v188_v50, %v3989_v4  ;;  %3991 = vst [vmem:[#allocation24_spill] sm:$0xff] %v2474_v7  ;;  %v441_v4 = vmul.f32 %v2256_v30, %v2324_v58  ;;  %v317_v50 = vrot.slane %v313_v12, 2  ;;  %v2501_v61 = vmul.f32 %v2256_v30, %v2334_v62 }
  0xa5   :  { %3990 = vst [vmem:[#allocation23_spill] sm:$0xff] %v2465_v45  ;;  %v283_v33 = vrot.slane %v279_v63, 2  ;;  %v300_v1 = vrot.slane %v296_v20, 2  ;;  %v2485_v63 = vsel %vm54_vm2, 0.0, %v3992_v59  ;;  %v458_v59 = vmul.f32 %v2259_v31, %v2324_v58 }
  0xa6   :  { %3993 = vst [vmem:[#allocation25_spill] sm:$0xff] %v2485_v63  ;;  %v445_v6 = vrot.slane %v441_v4, 1  ;;  %v475_v12 = vmul.f32 %v2262_v32, %v2324_v58  ;;  %v3939_v45 = vrot.slane %v2501_v61, 1 }
  0xa7   :  { %132 = vrot.lane.b32.xlu1 %v127_v2, %s2095_s12  ;;  %362 = vrot.lane.b32.xlu0 %v357_v29, %s2094_s11  ;;  %v2490_v20 = vsel %vm239_vm4, %v283_v33, %v3931_v51  ;;  %v3935_v2 = vrot.slane %v2474_v7, 2  ;;  %v2495_v29 = vmul.f32 %v2247_v26, %v2288_v42  ;;  %v2507_v33 = vmul.f32 %v2259_v31, %v2334_v62 }
  0xa8   :  { %3994 = vst [vmem:[#allocation26_spill] sm:$0xff] %v2490_v20  ;;  %v462_v48 = vrot.slane %v458_v59, 1  ;;  %v2523_v7 = vmul.f32 %v2262_v32, %v2334_v62  ;;  %v479_v4 = vrot.slane %v475_v12, 1  ;;  %v2539_v59 = vsel %vm144_vm3, %v445_v6, %v3939_v45 }
  0xa9   :  { %3995 = vst [vmem:[#allocation27_spill] sm:$0xff] %v2495_v29  ;;  %v2512_v51 = vsel %vm239_vm4, %v300_v1, %v3935_v2  ;;  %v3936_v20 = vrot.slane %v2495_v29, 2  ;;  %v3938_v24 = vrot.slane %v2507_v33, 1  ;;  %v535_v12 = vmul.f32 %v2275_v37, %v2324_v58 }
  0xaa   :  { %3996 = vst [vmem:[#allocation28_spill] sm:$0xff] %v2523_v7  ;;  %v2552_v29 = vmul.f32 %v2275_v37, %v2334_v62  ;;  %v552_v6 = vmul.f32 %v2282_v40, %v2324_v58  ;;  %v569_v45 = vmul.f32 %v2285_v41, %v2324_v58 }
  0xab   :  { %348 = vrot.lane.b32.xlu1 %v343_v35, %s2094_s11  ;;  %376 = vrot.lane.b32.xlu0 %v371_v38, %s2095_s12  ;;  %v2528_v1 = vsel %vm239_vm4, %v317_v50, %v3936_v20  ;;  %v518_v35 = vmul.f32 %v2272_v36, %v2324_v58  ;;  %v2534_v38 = vmul.f32 %v2272_v36, %v2334_v62  ;;  %v3940_v50 = vrot.slane %v2523_v7, 1 }
  0xac   :  { %3997 = vst [vmem:[#allocation29_spill] sm:$0xff] %v2528_v1  ;;  %v2544_v2 = vsel %vm144_vm3, %v462_v48, %v3938_v24  ;;  %v539_v24 = vrot.slane %v535_v12, 2  ;;  %v573_v7 = vrot.slane %v569_v45, 2 }
  0xad   :  { %3998 = vst [vmem:[#allocation30_spill] sm:$0xff] %v2534_v38  ;;  %3999 = vst [vmem:[#allocation31_spill] sm:$0xff] %v2544_v2  ;;  %v3943_v20 = vrot.slane %v2534_v38, 2  ;;  %v522_v1 = vrot.slane %v518_v35, 2  ;;  %v2563_v48 = vsel %vm144_vm3, %v479_v4, %v3940_v50  ;;  %v2567_v35 = vmul.f32 %v2282_v40, %v2334_v62 }
  0xae   :  { %4000 = vst [vmem:[#allocation32_spill] sm:$0xff] %v2563_v48  ;;  %v556_v2 = vrot.slane %v552_v6, 2  ;;  %v2579_v4 = vmul.f32 %v2285_v41, %v2334_v62  ;;  %v4001_v50 = vrot.slane %v2250_v27, 6  ;;  %v428_v38 = vrot.slane %v2346_v3, 1 }
  0xaf   :  { %360 = vrot.lane.b32.xlu1 %v2378_v43, %s2094_s11  ;;  %390 = vrot.lane.b32.xlu0 %v2382_v46, %s2095_s12  ;;  %v2574_v43 = vsel %vm239_vm4, %v522_v1, %v3943_v20  ;;  %v3944_v46 = vrot.slane %v2552_v29, 2  ;;  %v2591_v20 = vmul.f32 %v2213_v14, %v2268_v34  ;;  %v4002_v27 = vrot.slane %v2567_v35, 2 }
  0xb0   :  { %v2585_v48 = vsel %vm54_vm2, %v4001_v50, 0.0  ;;  %v3945_v12 = vrot.slane %v2579_v4, 2  ;;  %v4003_v3 = vrot.slane %v2386_v47, 1  ;;  %v1131_v1 = vmul.f32 %v2355_v21, %v2210_v13 }
  0xb1   :  { %v2596_v6 = vsel %vm239_vm4, %v539_v24, %v3944_v46  ;;  %v2606_v45 = vsel %vm239_vm4, %v556_v2, %v4002_v27  ;;  %v2615_v24 = vmul.f32 %v2372_v39, %v2216_v15  ;;  %v1118_v46 = vrot.slane %v2399_v56, 1 }
  0xb2   :  { %v2611_v50 = vsel %vm144_vm3, %v428_v38, %v4003_v3  ;;  %v1208_v2 = vmul.f32 %v2355_v21, %v2216_v15  ;;  %v2628_v38 = vmul.f32 %v2372_v39, %v2210_v13  ;;  %v4006_v3 = vrot.slane %v2435_v52, 1 }
  0xb3   :  { %374 = vrot.lane.b32.xlu1 %v2391_v54, %s2095_s12  ;;  %1038 = vrot.lane.b32.xlu0 %v2403_v60, %s2094_s11  ;;  %4004 = vst [vmem:[#allocation33_spill] sm:$0xff] %v2611_v50  ;;  %v2622_v60 = vsel %vm239_vm4, %v573_v7, %v3945_v12  ;;  %v1152_v7 = vrot.slane %v2407_v0, 1  ;;  %v2641_v12 = vmul.f32 %v2213_v14, %v2288_v42  ;;  %v4008_v13 = vrot.slane %v2439_v5, 1 }
  0xb4   :  { %4005 = vst [vmem:[#allocation34_spill] sm:$0xff] %v2622_v60  ;;  %v2634_v56 = vsel %vm144_vm3, %v1118_v46, %v4006_v3  ;;  %v2646_v50 = vmul.f32 %v2372_v39, %v2241_v23  ;;  %v1242_v27 = vmul.f32 %v2355_v21, %v2241_v23  ;;  %v1212_v46 = vrot.slane %v1208_v2, 2 }
  0xb5   :  { %4007 = vst [vmem:[#allocation35_spill] sm:$0xff] %v2634_v56  ;;  %v2657_v0 = vsel %vm144_vm3, %v1152_v7, %v4008_v13  ;;  %v2661_v3 = vmul.f32 %v2372_v39, %v2213_v14  ;;  %v1165_v54 = vmul.f32 %v2355_v21, %v2213_v14  ;;  %v1135_v56 = vrot.slane %v1131_v1, 1 }
  0xb6   :  { %v4010_v60 = vrot.slane %v2615_v24, 2  ;;  %v2678_v13 = vmul.f32 %v2372_v39, %v2230_v19  ;;  %v1225_v14 = vmul.f32 %v2355_v21, %v2230_v19  ;;  %v4011_v1 = vrot.slane %v2628_v38, 1 }
  0xb7   :  { %388 = vrot.lane.b32.xlu1 %v2395_v55, %s2095_s12  ;;  %1066 = vrot.lane.b32.xlu0 %v2412_v49, %s2095_s12  ;;  %v2668_v55 = vmul.f32 %v2585_v48, %v2196_v8  ;;  %v1246_v49 = vrot.slane %v1242_v27, 2  ;;  %v3946_v2 = vrot.slane %v2661_v3, 1  ;;  %v4012_v27 = vrot.slane %v2646_v50, 2 }
  0xb8   :  { %v2673_v7 = vsel %vm239_vm4, %v1212_v46, %v4010_v60  ;;  %v2685_v23 = vsel %vm144_vm3, %v1135_v56, %v4011_v1  ;;  %v1169_v60 = vrot.slane %v1165_v54, 1  ;;  %v2694_v46 = vmul.f32 %v2585_v48, %v2224_v17 }
  0xb9   :  { %4009 = vst [vmem:[#allocation36_spill] sm:$0xff] %v2668_v55  ;;  %v2690_v55 = vsel %vm239_vm4, %v1246_v49, %v4012_v27  ;;  %v2703_v56 = vmul.f32 %v2485_v63, %v2196_v8  ;;  %v2707_v49 = vmul.f32 %v2372_v39, %v2253_v28  ;;  %v2711_v54 = vmul.f32 %v2372_v39, %v2247_v26 }
  0xba   :  { %v1229_v1 = vrot.slane %v1225_v14, 2  ;;  %v1370_v8 = vmul.f32 %v2485_v63, %v2238_v22  ;;  %v2725_v19 = vmul.f32 %v2585_v48, %v2238_v22  ;;  %v4018_v14 = vrot.slane %v2678_v13, 2 }
  0xbb   :  { %1052 = vrot.lane.b32.xlu0 %v2416_v57, %s2094_s11  ;;  %1036 = vrot.lane.b32.xlu1 %v2420_v11, %s2094_s11  ;;  %4013 = vst [vmem:[#allocation37_spill] sm:$0xff] %v2707_v49  ;;  %4014 = vst [vmem:[#allocation38_spill] sm:$0xff] %v2711_v54  ;;  %v2716_v57 = vsel %vm144_vm3, %v1169_v60, %v3946_v2  ;;  %v1259_v11 = vmul.f32 %v2355_v21, %v2247_v26 }
  0xbc   :  { %4015 = vst [vmem:[#allocation39_spill] sm:$0xff] %v2725_v19  ;;  %v2729_v49 = vmul.f32 %v2485_v63, %v2224_v17  ;;  %v2733_v60 = vmul.f32 %v2355_v21, %v2253_v28  ;;  %v2737_v26 = vmul.f32 %v2216_v15, %v2268_v34  ;;  %v2742_v2 = vsel %vm239_vm4, %v1229_v1, %v4018_v14 }
  0xbd   :  { %4019 = vst [vmem:[#allocation42_spill] sm:$0xff] %v2742_v2  ;;  %v2746_v22 = vmul.f32 %v2585_v48, %v2198_v9  ;;  %v1263_v27 = vrot.slane %v1259_v11, 2  ;;  %v2757_v1 = vmul.f32 %v2585_v48, %v2259_v31  ;;  %v1374_v14 = vrot.slane %v1370_v8, 1 }
  0xbe   :  { %4016 = vst [vmem:[#allocation40_spill] sm:$0xff] %v2729_v49  ;;  %4017 = vst [vmem:[#allocation41_spill] sm:$0xff] %v2733_v60  ;;  %v1404_v60 = vmul.f32 %v2485_v63, %v2259_v31  ;;  %v4022_v11 = vrot.slane %v2711_v54, 2  ;;  %v2774_v17 = vmul.f32 %v2485_v63, %v2198_v9  ;;  %v4026_v8 = vrot.slane %v2725_v19, 1  ;;  %v4028_v49 = vld [vmem:[#allocation8_spill] sm:$0xff] }
  0xbf   :  { %4020 = vst [vmem:[#allocation43_spill] sm:$0xff] %v2746_v22  ;;  %1080 = vrot.lane.b32.xlu0 %v2424_v53, %s2095_s12  ;;  %1064 = vrot.lane.b32.xlu1 %v2430_v16, %s2095_s12  ;;  %4021 = vst [vmem:[#allocation44_spill] sm:$0xff] %v2757_v1  ;;  %v2761_v22 = vmul.f32 %v2216_v15, %v2288_v42  ;;  %v2770_v16 = vmul.f32 %v2585_v48, %v2227_v18 }
  0xc0   :  { %v2766_v53 = vsel %vm239_vm4, %v1263_v27, %v4022_v11  ;;  %4025 = vst [vmem:[#allocation47_spill] sm:$0xff] %v2774_v17  ;;  %v2780_v15 = vsel %vm144_vm3, %v1374_v14, %v4026_v8  ;;  %v2784_v2 = vmul.f32 %v4028_v49, %v2355_v21  ;;  %v2788_v27 = vmul.f32 %v4028_v49, %v2372_v39  ;;  %v4030_v17 = vld [vmem:[#allocation20_spill] sm:$0xff] }
  0xc1   :  { %4023 = vst [vmem:[#allocation45_spill] sm:$0xff] %v2766_v53  ;;  %4024 = vst [vmem:[#allocation46_spill] sm:$0xff] %v2770_v16  ;;  %v1464_v11 = vmul.f32 %v2485_v63, %v2272_v36  ;;  %v2794_v9 = vmul.f32 %v2585_v48, %v2272_v36  ;;  %v1408_v31 = vrot.slane %v1404_v60, 1  ;;  %v140_v14 = vmul.f32 %v4028_v49, %v2268_v34  ;;  %v4038_v36 = vld [vmem:[#allocation10_spill] sm:$0xff] }
  0xc2   :  { %4027 = vst [vmem:[#allocation48_spill] sm:$0xff] %v2780_v15  ;;  %v4029_v8 = vrot.slane %v2386_v47, 1  ;;  %v4031_v16 = vrot.slane %v2469_v44, 1  ;;  %v4032_v15 = vrot.slane %v2363_v25, 1  ;;  %v2813_v60 = vmul.f32 %v4028_v49, %v2288_v42 }
  0xc3   :  { %1050 = vrot.lane.b32.xlu1 %v4030_v17, %s2094_s11  ;;  %v1387_v47 = vmul.f32 %v2485_v63, %v2256_v30  ;;  %v4034_v17 = vrot.slane %v2757_v1, 1  ;;  %v145_v25 = vrot.slane %v140_v14, 1  ;;  %v2830_v49 = vmul.f32 %v2485_v63, %v2227_v18 }
  0xc4   :  { %433 = vrot.lane.b32.xlu0 %v4029_v8, %s2094_s11  ;;  %v2808_v53 = vsel %vm144_vm3, %v4032_v15, %v4031_v16  ;;  %4033 = vst [vmem:[#allocation8_spill] sm:$0xff] %v2813_v60  ;;  %v2825_v16 = vmul.f32 %v2585_v48, %v2256_v30  ;;  %v154_v54 = vmul.f32 %v4038_v36, %v2268_v34  ;;  %v4041_v18 = vrot.slane %v2435_v52, 1 }
  0xc5   :  { %v2821_v19 = vsel %vm144_vm3, %v1408_v31, %v4034_v17  ;;  %4037 = vst [vmem:[#allocation50_spill] sm:$0xff] %v2830_v49  ;;  %v2836_v8 = vmul.f32 %v4038_v36, %v2288_v42  ;;  %v1498_v14 = vmul.f32 %v2485_v63, %v2282_v40  ;;  %v2843_v30 = vmul.f32 %v2585_v48, %v2282_v40 }
  0xc6   :  { %4035 = vst [vmem:[#allocation20_spill] sm:$0xff] %v2821_v19  ;;  %4036 = vst [vmem:[#allocation49_spill] sm:$0xff] %v2825_v16  ;;  %v1468_v17 = vrot.slane %v1464_v11, 2  ;;  %v158_v15 = vrot.slane %v154_v54, 1  ;;  %v4042_v31 = vrot.slane %v2813_v60, 1  ;;  %v1421_v40 = vmul.f32 %v2485_v63, %v2262_v32 }
  0xc7   :  { %4039 = vst [vmem:[#allocation10_spill] sm:$0xff] %v2836_v8  ;;  %4040 = vst [vmem:[#allocation51_spill] sm:$0xff] %v2843_v30  ;;  %1078 = vrot.lane.b32.xlu1 %v2455_v10, %s2095_s12  ;;  %v3951_v49 = vrot.slane %v2836_v8, 1  ;;  %v4043_v1 = vrot.slane %v2794_v9, 2  ;;  %v2866_v10 = vmul.f32 %v2585_v48, %v2262_v32  ;;  %v1391_v54 = vrot.slane %v1387_v47, 1  ;;  %v4049_v47 = vld [vmem:[#allocation11_spill] sm:$0xff] }
  0xc8   :  { %1123 = vrot.lane.b32.xlu0 %v4041_v18, %s2094_s11  ;;  %v2854_v19 = vsel %vm144_vm3, %v145_v25, %v4042_v31  ;;  %v1481_v31 = vmul.f32 %v2485_v63, %v2275_v37  ;;  %v2877_v18 = vmul.f32 %v2585_v48, %v2275_v37  ;;  %v1502_v11 = vrot.slane %v1498_v14, 2  ;;  %v4052_v37 = vld [vmem:[#allocation18_spill] sm:$0xff] }
  0xc9   :  { %v2862_v52 = vsel %vm239_vm4, %v1468_v17, %v4043_v1  ;;  %4045 = vst [vmem:[#allocation53_spill] sm:$0xff] %v2866_v10  ;;  %v2871_v25 = vsel %vm144_vm3, %v158_v15, %v3951_v49  ;;  %v4047_v17 = vrot.slane %v2825_v16, 1  ;;  %v235_v8 = vmul.f32 %v4049_v47, %v2268_v34 }
  0xca   :  { %4044 = vst [vmem:[#allocation52_spill] sm:$0xff] %v2862_v52  ;;  %4046 = vst [vmem:[#allocation54_spill] sm:$0xff] %v2877_v18  ;;  %v2889_v15 = vmul.f32 %v4049_v47, %v2288_v42  ;;  %v4051_v49 = vrot.slane %v2439_v5, 1  ;;  %v4053_v14 = vrot.slane %v4052_v37, 1  ;;  %v2905_v60 = vmul.f32 %v2585_v48, %v2285_v41 }
  0xcb   :  { %v2883_v32 = vsel %vm144_vm3, %v1391_v54, %v4047_v17  ;;  %v4054_v54 = vrot.slane %v2843_v30, 2  ;;  %v240_v52 = vrot.slane %v235_v8, 2 }
  0xcc   :  { %4048 = vst [vmem:[#allocation55_spill] sm:$0xff] %v2883_v32  ;;  %4050 = vst [vmem:[#allocation11_spill] sm:$0xff] %v2889_v15  ;;  %1157 = vrot.lane.b32.xlu0 %v4051_v49, %s2095_s12  ;;  %176 = vrot.lane.b32.xlu1 %v4053_v14, %s2094_s11  ;;  %v1425_v32 = vrot.slane %v1421_v40, 1  ;;  %v4057_v49 = vld [vmem:[#allocation12_spill] sm:$0xff]  ;;  %v223_v14 = vrot.slane %v2641_v12, 1  ;;  %v1485_v40 = vrot.slane %v1481_v31, 2 }
  0xcd   :  { %v2901_v17 = vsel %vm239_vm4, %v1502_v11, %v4054_v54  ;;  %4056 = vst [vmem:[#allocation56_spill] sm:$0xff] %v2905_v60  ;;  %v249_v16 = vmul.f32 %v4057_v49, %v2268_v34  ;;  %v2912_v37 = vmul.f32 %v4057_v49, %v2288_v42  ;;  %v4059_v54 = vrot.slane %v2866_v10, 1  ;;  %v4063_v12 = vld [vmem:[#allocation22_spill] sm:$0xff]  ;;  %v4064_v11 = vld [vmem:[#allocation19_spill] sm:$0xff] }
  0xce   :  { %4055 = vst [vmem:[#allocation18_spill] sm:$0xff] %v2901_v17  ;;  %v4061_v17 = vrot.slane %v2889_v15, 2  ;;  %v1515_v42 = vmul.f32 %v2485_v63, %v2285_v41  ;;  %v4065_v10 = vrot.slane %v4064_v11, 1  ;;  %v4069_v11 = vld [vmem:[#allocation14_spill] sm:$0xff]  ;;  %v4070_v31 = vld [vmem:[#allocation15_spill] sm:$0xff] }
  0xcf   :  { %4058 = vst [vmem:[#allocation12_spill] sm:$0xff] %v2912_v37  ;;  %v2919_v1 = vsel %vm144_vm3, %v1425_v32, %v4059_v54  ;;  %v253_v8 = vrot.slane %v249_v16, 2  ;;  %v3958_v5 = vrot.slane %v2912_v37, 2  ;;  %v1092_v16 = vrot.slane %v2784_v2, 1 }
  0xd0   :  { %4060 = vst [vmem:[#allocation57_spill] sm:$0xff] %v2919_v1  ;;  %v2925_v30 = vsel %vm239_vm4, %v240_v52, %v4061_v17  ;;  %174 = vrot.lane.b32.xlu0 %v4063_v12, %s2094_s11  ;;  %193 = vrot.lane.b32.xlu1 %v4065_v10, %s2094_s11  ;;  %v4066_v54 = vrot.slane %v2877_v18, 2  ;;  %v1519_v17 = vrot.slane %v1515_v42, 2  ;;  %v411_v10 = vmul.f32 %v4069_v11, %v2324_v58 }
  0xd1   :  { %4062 = vst [vmem:[#allocation58_spill] sm:$0xff] %v2925_v30  ;;  %v2945_v41 = vsel %vm239_vm4, %v253_v8, %v3958_v5  ;;  %v2951_v12 = vmul.f32 %v4069_v11, %v2334_v62  ;;  %v266_v2 = vrot.slane %v2737_v26, 2  ;;  %v2956_v32 = vmul.f32 %v4070_v31, %v2334_v62  ;;  %v4074_v26 = vld [vmem:[#allocation17_spill] sm:$0xff] }
  0xd2   :  { %v2940_v52 = vsel %vm239_vm4, %v1485_v40, %v4066_v54  ;;  %4068 = vst [vmem:[#allocation19_spill] sm:$0xff] %v2945_v41  ;;  %v4071_v40 = vld [vmem:[#allocation16_spill] sm:$0xff]  ;;  %v4073_v42 = vrot.slane %v2905_v60, 2  ;;  %v415_v37 = vrot.slane %v411_v10, 1  ;;  %v505_v15 = vmul.f32 %v4074_v26, %v2324_v58  ;;  %v4075_v41 = vld [vmem:[#allocation23_spill] sm:$0xff] }
  0xd3   :  { %4067 = vst [vmem:[#allocation22_spill] sm:$0xff] %v2940_v52  ;;  %v492_v54 = vmul.f32 %v4071_v40, %v2324_v58  ;;  %v2962_v8 = vmul.f32 %v4071_v40, %v2334_v62  ;;  %v3963_v52 = vrot.slane %v2951_v12, 1  ;;  %v4076_v1 = vrot.slane %v2469_v44, 1 }
  0xd4   :  { %v2967_v5 = vsel %vm239_vm4, %v1519_v17, %v4073_v42  ;;  %191 = vrot.lane.b32.xlu0 %v4075_v41, %s2094_s11  ;;  %v2981_v17 = vmul.f32 %v4074_v26, %v2334_v62  ;;  %v509_v42 = vrot.slane %v505_v15, 2  ;;  %v398_v41 = vmul.f32 %v4070_v31, %v2324_v58 }
  0xd5   :  { %4072 = vst [vmem:[#allocation14_spill] sm:$0xff] %v2962_v8  ;;  %210 = vrot.lane.b32.xlu1 %v4076_v1, %s2095_s12  ;;  %v496_v18 = vrot.slane %v492_v54, 2  ;;  %v3964_v60 = vrot.slane %v2962_v8, 2  ;;  %v2986_v10 = vsel %vm144_vm3, %v415_v37, %v3963_v52  ;;  %v4079_v44 = vrot.slane %v2788_v27, 1 }
  0xd6   :  { %4077 = vst [vmem:[#allocation15_spill] sm:$0xff] %v2981_v17  ;;  %4078 = vst [vmem:[#allocation16_spill] sm:$0xff] %v2986_v10  ;;  %v1182_v37 = vmul.f32 %v2355_v21, %v4049_v47  ;;  %v3005_v15 = vmul.f32 %v2372_v39, %v4049_v47  ;;  %v402_v52 = vrot.slane %v398_v41, 1  ;;  %v1101_v10 = vmul.f32 %v2355_v21, %v4038_v36 }
  0xd7   :  { %v2993_v1 = vsel %vm144_vm3, %v1092_v16, %v4079_v44  ;;  %v2999_v30 = vsel %vm239_vm4, %v496_v18, %v3964_v60  ;;  %v3011_v16 = vmul.f32 %v2372_v39, %v4038_v36  ;;  %v4081_v44 = vld [vmem:[#allocation13_spill] sm:$0xff]  ;;  %v4083_v18 = vrot.slane %v2981_v17, 2 }
  0xd8   :  { %4080 = vst [vmem:[#allocation17_spill] sm:$0xff] %v2999_v30  ;;  %v3015_v54 = vmul.f32 %v2585_v48, %v4081_v44  ;;  %208 = vrot.lane.b32.xlu0 %v2808_v53, %s2095_s12  ;;  %v1186_v41 = vrot.slane %v1182_v37, 2  ;;  %v3967_v60 = vrot.slane %v3005_v15, 2  ;;  %v1195_v36 = vmul.f32 %v2355_v21, %v4057_v49 }
  0xd9   :  { %227 = vrot.lane.b32.xlu1 %v223_v14, %s2095_s12  ;;  %v3023_v47 = vsel %vm239_vm4, %v509_v42, %v4083_v18  ;;  %v4084_v30 = vrot.slane %v2956_v32, 1  ;;  %v1105_v8 = vrot.slane %v1101_v10, 1  ;;  %v3968_v53 = vrot.slane %v3011_v16, 1 }
  0xda   :  { %4082 = vst [vmem:[#allocation23_spill] sm:$0xff] %v3015_v54  ;;  %v3036_v17 = vmul.f32 %v2372_v39, %v4057_v49  ;;  %v3041_v42 = vsel %vm239_vm4, %v1186_v41, %v3967_v60  ;;  %v1199_v37 = vrot.slane %v1195_v36, 2  ;;  %v3045_v18 = vmul.f32 %v2485_v63, %v4081_v44 }
  0xdb   :  { %v3031_v54 = vsel %vm144_vm3, %v402_v52, %v4084_v30  ;;  %v1344_v30 = vmul.f32 %v2485_v63, %v4070_v31  ;;  %v4086_v52 = vrot.slane %v2591_v20, 1  ;;  %v3055_v49 = vsel %vm144_vm3, %v1105_v8, %v3968_v53  ;;  %v4090_v53 = vld [vmem:[#allocation21_spill] sm:$0xff] }
  0xdc   :  { %4085 = vst [vmem:[#allocation13_spill] sm:$0xff] %v3036_v17  ;;  %v3970_v41 = vrot.slane %v3036_v17, 2  ;;  %v3060_v36 = vmul.f32 %v2585_v48, %v4070_v31  ;;  %v4087_v60 = vrot.slane %v2761_v22, 2  ;;  %v3070_v8 = vmul.f32 %v2585_v48, %v4071_v40 }
  0xdd   :  { %v224_v10 = vsel %vm144_vm3, %v4086_v52, %v223_v14  ;;  %v1348_v20 = vrot.slane %v1344_v30, 1  ;;  %v1438_v14 = vmul.f32 %v2485_v63, %v4071_v40  ;;  %v1451_v40 = vmul.f32 %v2485_v63, %v4074_v26 }
  0xde   :  { %225 = vrot.lane.b32.xlu0 %v224_v10, %s2095_s12  ;;  %271 = vrot.lane.b32.xlu1 %v4087_v60, %s2094_s11  ;;  %v3075_v52 = vsel %vm239_vm4, %v1199_v37, %v3970_v41  ;;  %v1349_v31 = vrot.slane %v3060_v36, 1  ;;  %v1357_v10 = vmul.f32 %v2485_v63, %v4069_v11  ;;  %v3082_v60 = vmul.f32 %v2585_v48, %v4069_v11  ;;  %v4178_v36 = vld [vmem:[#allocation25_spill] sm:$0xff] }
  0xdf   :  { %4088 = vst [vmem:[#allocation59_spill] sm:$0xff] %v3075_v52  ;;  %v1442_v30 = vrot.slane %v1438_v14, 2  ;;  %v3089_v17 = vmul.f32 %v2585_v48, %v4074_v26  ;;  %v4089_v37 = vrot.slane %v2761_v22, 2  ;;  %v4091_v63 = vrot.slane %v4090_v53, 2  ;;  %v4094_v53 = vld [vmem:[#allocation24_spill] sm:$0xff] }
  0xe0   :  { %v3097_v52 = vsel %vm144_vm3, %v1348_v20, %v1349_v31  ;;  %v1361_v11 = vrot.slane %v1357_v10, 1  ;;  %v1362_v14 = vrot.slane %v3082_v60, 1  ;;  %v4092_v26 = vrot.slane %v3070_v8, 2 }
  0xe1   :  { %v268_v41 = vsel %vm239_vm4, %v266_v2, %v4089_v37  ;;  %v1455_v2 = vrot.slane %v1451_v40, 2  ;;  %v3972_v37 = vrot.slane %v3089_v17, 2  ;;  %v4095_v10 = vrot.slane %v4094_v53, 2 }
  0xe2   :  { %269 = vrot.lane.b32.xlu0 %v268_v41, %s2094_s11  ;;  %288 = vrot.lane.b32.xlu1 %v4091_v63, %s2094_s11  ;;  %v3107_v22 = vsel %vm239_vm4, %v1442_v30, %v4092_v26  ;;  %v3113_v20 = vsel %vm144_vm3, %v1361_v11, %v1362_v14  ;;  %v4093_v63 = vld [vmem:[#allocation26_spill] sm:$0xff]  ;;  %v4096_v30 = vld [vmem:[#allocation27_spill] sm:$0xff]  ;;  %v4098_v11 = vld [vmem:[#allocation29_spill] sm:$0xff]  ;;  %v4099_v26 = vrot.slane %v2501_v61, 1 }
  0xe3   :  { %v3118_v41 = vsel %vm239_vm4, %v1455_v2, %v3972_v37  ;;  %v4097_v40 = vrot.slane %v4096_v30, 2  ;;  %v4100_v2 = vrot.slane %v2507_v33, 1  ;;  %v4105_v61 = vld [vmem:[#allocation30_spill] sm:$0xff]  ;;  %v4107_v33 = vrot.slane %v2552_v29, 2  ;;  %v4111_v29 = vld [vmem:[#allocation33_spill] sm:$0xff] }
  0xe4   :  { %v4106_v30 = vrot.slane %v4105_v61, 2  ;;  %v4114_v61 = vrot.slane %v2628_v38, 1  ;;  %v4154_v37 = vld [vmem:[#allocation10_spill] sm:$0xff] }
  0xe6   :  { %286 = vrot.lane.b32.xlu0 %v4093_v63, %s2094_s11  ;;  %305 = vrot.lane.b32.xlu1 %v4095_v10, %s2095_s12  ;;  %v4102_v63 = vld [vmem:[#allocation28_spill] sm:$0xff] }
  0xe7   :  { %v4103_v53 = vrot.slane %v4102_v63, 1  ;;  %v4104_v10 = vld [vmem:[#allocation32_spill] sm:$0xff] }
  0xea   :  { %303 = vrot.lane.b32.xlu0 %v2512_v51, %s2095_s12  ;;  %322 = vrot.lane.b32.xlu1 %v4097_v40, %s2095_s12  ;;  %v4101_v51 = vld [vmem:[#allocation31_spill] sm:$0xff]  ;;  %v4109_v40 = vrot.slane %v2579_v4, 2 }
  0xeb   :  { %v4113_v4 = vld [vmem:[#allocation35_spill] sm:$0xff] }
  0xee   :  { %320 = vrot.lane.b32.xlu0 %v4098_v11, %s2095_s12  ;;  %450 = vrot.lane.b32.xlu1 %v4099_v26, %s2094_s11  ;;  %v3171_v26 = vstv %s1938_s13 }
  0xf2   :  { %448 = vrot.lane.b32.xlu0 %v2539_v59, %s2094_s11  ;;  %467 = vrot.lane.b32.xlu1 %v4100_v2, %s2095_s12  ;;  %v4108_v59 = vrot.slane %v2567_v35, 2  ;;  %v72_v35 = vmul.f32 %v2253_v28, %v2268_v34 }
  0xf6   :  { %465 = vrot.lane.b32.xlu0 %v4101_v51, %s2095_s12  ;;  %484 = vrot.lane.b32.xlu1 %v4103_v53, %s2095_s12  ;;  %v78_v53 = vmul.f32 %v3171_v26, %v2268_v34 }
  0xfa   :  { %482 = vrot.lane.b32.xlu0 %v4104_v10, %s2095_s12  ;;  %527 = vrot.lane.b32.xlu1 %v4106_v30, %s2094_s11 }
  0xfe   :  { %525 = vrot.lane.b32.xlu0 %v2574_v43, %s2094_s11  ;;  %544 = vrot.lane.b32.xlu1 %v4107_v33, %s2094_s11  ;;  %v4110_v43 = vld [vmem:[#allocation34_spill] sm:$0xff] }
 0x102   :  { %542 = vrot.lane.b32.xlu0 %v2596_v6, %s2094_s11  ;;  %561 = vrot.lane.b32.xlu1 %v4108_v59, %s2095_s12 }
 0x106   :  { %559 = vrot.lane.b32.xlu0 %v2606_v45, %s2095_s12  ;;  %578 = vrot.lane.b32.xlu1 %v4109_v40, %s2095_s12  ;;  %v4112_v45 = vrot.slane %v2615_v24, 2 }
 0x109   :  { %v89_v11 = vpop.permute.xlu1 %88  ;;  %v103_v6 = vpop.permute.xlu0 %102 }
 0x10a   :  { %576 = vrot.lane.b32.xlu0 %v4110_v43, %s2095_s12  ;;  %431 = vrot.lane.b32.xlu1 %v4111_v29, %s2094_s11  ;;  %v94_v2 = vadd.f32 %v89_v11, %v72_v35  ;;  %v108_v24 = vadd.f32 %v103_v6, %v78_v53  ;;  %v4115_v43 = vrot.slane %v2646_v50, 2 }
 0x10d   :  { %v3178_v51 = vpop.permute.xlu1 %90  ;;  %v117_v63 = vpop.permute.xlu0 %116 }
 0x10e   :  { %1217 = vrot.lane.b32.xlu0 %v4112_v45, %s2094_s11  ;;  %1121 = vrot.lane.b32.xlu1 %v4113_v4, %s2094_s11  ;;  %v122_v10 = vadd.f32 %v117_v63, %v94_v2  ;;  %v4119_v45 = vld [vmem:[#allocation38_spill] sm:$0xff] }
 0x10f   :  { %v4121_v4 = vld [vmem:[#allocation42_spill] sm:$0xff] }
 0x110   :  { %v3188_v30 = vadd.f32 %v2854_v19, %v122_v10  ;;  %v4116_v19 = vrot.slane %v2661_v3, 1  ;;  %v4118_v3 = vrot.slane %v2678_v13, 2  ;;  %v4120_v13 = vrot.slane %v4119_v45, 2 }
 0x111   :  { %v3190_v33 = vpop.permute.xlu1 %104  ;;  %v131_v59 = vpop.permute.xlu0 %130 }
 0x112   :  { %1140 = vrot.lane.b32.xlu0 %v4114_v61, %s2094_s11  ;;  %1155 = vrot.lane.b32.xlu1 %v2657_v0, %s2095_s12  ;;  %v136_v40 = vadd.f32 %v131_v59, %v108_v24  ;;  %v4126_v24 = vrot.slane %v2788_v27, 1  ;;  %v4132_v27 = vld [vmem:[#allocation48_spill] sm:$0xff] }
 0x114   :  { %v3198_v34 = vadd.f32 %v2871_v25, %v136_v40 }
 0x115   :  { %v3200_v38 = vpop.permute.xlu1 %118  ;;  %v3202_v0 = vpop.permute.xlu0 %346 }
 0x116   :  { %1251 = vrot.lane.b32.xlu0 %v4115_v43, %s2095_s12  ;;  %1215 = vrot.lane.b32.xlu1 %v2673_v7, %s2094_s11  ;;  %v4117_v7 = vld [vmem:[#allocation36_spill] sm:$0xff] }
 0x119   :  { %v3209_v29 = vpop.permute.xlu1 %132  ;;  %v3211_v50 = vpop.permute.xlu0 %362 }
 0x11a   :  { %1174 = vrot.lane.b32.xlu0 %v4116_v19, %s2095_s12  ;;  %1138 = vrot.lane.b32.xlu1 %v2685_v23, %s2094_s11  ;;  %v4127_v19 = vld [vmem:[#allocation43_spill] sm:$0xff] }
 0x11d   :  { %v3217_v25 = vpop.permute.xlu1 %348  ;;  %v3219_v11 = vpop.permute.xlu0 %376 }
 0x11e   :  { %1294 = vrot.lane.b32.xlu0 %v4117_v7, %s2094_s11  ;;  %1249 = vrot.lane.b32.xlu1 %v2690_v55, %s2095_s12  ;;  %v4128_v7 = vld [vmem:[#allocation45_spill] sm:$0xff] }
 0x121   :  { %v3226_v23 = vpop.permute.xlu1 %360  ;;  %v3228_v6 = vpop.permute.xlu0 %390 }
 0x122   :  { %1234 = vrot.lane.b32.xlu0 %v4118_v3, %s2094_s11  ;;  %1172 = vrot.lane.b32.xlu1 %v2716_v57, %s2095_s12  ;;  %v4122_v57 = vld [vmem:[#allocation37_spill] sm:$0xff] }
 0x123   :  { %v4129_v3 = vld [vmem:[#allocation41_spill] sm:$0xff] }
 0x125   :  { %v3234_v55 = vpop.permute.xlu1 %374  ;;  %v1039_v35 = vpop.permute.xlu0 %1038 }
 0x126   :  { %1322 = vrot.lane.b32.xlu0 %v2694_v46, %s2095_s12  ;;  %1292 = vrot.lane.b32.xlu1 %v2703_v56, %s2094_s11  ;;  %v1043_v2 = vadd.f32 %v1039_v35, %v4122_v57  ;;  %v4123_v46 = vld [vmem:[#allocation39_spill] sm:$0xff]  ;;  %v4125_v56 = vld [vmem:[#allocation40_spill] sm:$0xff] }
 0x127   :  { %v4124_v61 = vrot.slane %v4123_v46, 1  ;;  %v4130_v57 = vld [vmem:[#allocation44_spill] sm:$0xff] }
 0x129   :  { %v3242_v63 = vpop.permute.xlu1 %388  ;;  %v1067_v53 = vpop.permute.xlu0 %1066 }
 0x12a   :  { %1268 = vrot.lane.b32.xlu0 %v4120_v13, %s2095_s12  ;;  %1232 = vrot.lane.b32.xlu1 %v4121_v4, %s2094_s11  ;;  %v1071_v10 = vadd.f32 %v1067_v53, %v1043_v2  ;;  %v4131_v2 = vrot.slane %v4130_v57, 1 }
 0x12c   :  { %v1098_v59 = vadd.f32 %v4126_v24, %v1071_v10  ;;  %v4134_v24 = vld [vmem:[#allocation47_spill] sm:$0xff] }
 0x12d   :  { %v1037_v40 = vpop.permute.xlu1 %1036  ;;  %v3251_v43 = vpop.permute.xlu0 %1052 }
 0x12e   :  { %1379 = vrot.lane.b32.xlu0 %v4124_v61, %s2094_s11  ;;  %1320 = vrot.lane.b32.xlu1 %v4125_v56, %s2095_s12  ;;  %v1042_v35 = vadd.f32 %v1037_v40, %v4129_v3  ;;  %v1026_v61 = vmul.f32 %v2355_v21, %v3171_v26  ;;  %v4133_v56 = vld [vmem:[#allocation46_spill] sm:$0xff] }
 0x131   :  { %v1065_v45 = vpop.permute.xlu1 %1064  ;;  %v3258_v13 = vpop.permute.xlu0 %1080 }
 0x132   :  { %1308 = vrot.lane.b32.xlu0 %v4127_v19, %s2094_s11  ;;  %1266 = vrot.lane.b32.xlu1 %v4128_v7, %s2095_s12  ;;  %v1070_v4 = vadd.f32 %v1065_v45, %v1042_v35  ;;  %v4136_v35 = vld [vmem:[#allocation20_spill] sm:$0xff] }
 0x134   :  { %v3266_v53 = vadd.f32 %v2993_v1, %v1070_v4  ;;  %v4135_v1 = vrot.slane %v2794_v9, 2  ;;  %v4140_v9 = vrot.slane %v3005_v15, 2 }
 0x135   :  { %v1051_v10 = vpop.permute.xlu1 %1050 }
 0x136   :  { %1413 = vrot.lane.b32.xlu0 %v4131_v2, %s2095_s12  ;;  %1377 = vrot.lane.b32.xlu1 %v4132_v27, %s2094_s11  ;;  %v3268_v46 = vpop.permute.xlu0 %433  ;;  %v1056_v40 = vadd.f32 %v1051_v10, %v1026_v61  ;;  %v4137_v27 = vld [vmem:[#allocation49_spill] sm:$0xff]  ;;  %v4139_v61 = vld [vmem:[#allocation50_spill] sm:$0xff] }
 0x137   :  { %v4138_v10 = vrot.slane %v4137_v27, 1 }
 0x139   :  { %v1079_v19 = vpop.permute.xlu1 %1078 }
 0x13a   :  { %1336 = vrot.lane.b32.xlu0 %v4133_v56, %s2095_s12  ;;  %1306 = vrot.lane.b32.xlu1 %v4134_v24, %s2094_s11  ;;  %v1124_v7 = vpop.permute.xlu0 %1123  ;;  %v1084_v3 = vadd.f32 %v1079_v19, %v1056_v40  ;;  %v4142_v19 = vld [vmem:[#allocation51_spill] sm:$0xff] }
 0x13b   :  { %v1128_v45 = vadd.f32 %v1124_v7, %v1098_v59  ;;  %v4141_v59 = vld [vmem:[#allocation9_spill] sm:$0xff]  ;;  %v4143_v7 = vrot.slane %v4142_v19, 2  ;;  %v4148_v19 = vld [vmem:[#allocation8_spill] sm:$0xff] }
 0x13c   :  { %v3282_v21 = vadd.f32 %v3055_v49, %v1084_v3  ;;  %v73_v49 = vmul.f32 %v2253_v28, %v4141_v59  ;;  %v4144_v3 = vld [vmem:[#allocation52_spill] sm:$0xff]  ;;  %v79_v15 = vmul.f32 %v3171_v26, %v4141_v59  ;;  %v4147_v28 = vld [vmem:[#allocation55_spill] sm:$0xff] }
 0x13e   :  { %1473 = vrot.lane.b32.xlu0 %v4135_v1, %s2094_s11  ;;  %1411 = vrot.lane.b32.xlu1 %v4136_v35, %s2095_s12  ;;  %v177_v4 = vpop.permute.xlu1 %176  ;;  %v1158_v57 = vpop.permute.xlu0 %1157  ;;  %v95_v1 = vadd.f32 %v3178_v51, %v73_v49 }
 0x13f   :  { %v1162_v2 = vadd.f32 %v1158_v57, %v1128_v45 }
 0x140   :  { %v123_v57 = vadd.f32 %v3200_v38, %v95_v1  ;;  %v4150_v38 = vld [vmem:[#allocation54_spill] sm:$0xff] }
 0x141   :  { %v3291_v56 = vadd.f32 %v4140_v9, %v1162_v2  ;;  %v4145_v2 = vld [vmem:[#allocation53_spill] sm:$0xff]  ;;  %v4151_v1 = vrot.slane %v4150_v38, 2 }
 0x142   :  { %1396 = vrot.lane.b32.xlu0 %v4138_v10, %s2094_s11  ;;  %1334 = vrot.lane.b32.xlu1 %v4139_v61, %s2095_s12  ;;  %v194_v24 = vpop.permute.xlu1 %193  ;;  %v175_v40 = vpop.permute.xlu0 %174  ;;  %v4146_v27 = vrot.slane %v4145_v2, 1  ;;  %v109_v10 = vadd.f32 %v3190_v33, %v79_v15  ;;  %v4152_v2 = vld [vmem:[#allocation18_spill] sm:$0xff] }
 0x143   :  { %v180_v61 = vadd.f32 %v175_v40, %v3188_v30  ;;  %v4153_v15 = vld [vmem:[#allocation58_spill] sm:$0xff] }
 0x144   :  { %v137_v49 = vadd.f32 %v3209_v29, %v109_v10  ;;  %v4155_v29 = vrot.slane %v4154_v37, 1 }
 0x146   :  { %1507 = vrot.lane.b32.xlu0 %v4143_v7, %s2095_s12  ;;  %1471 = vrot.lane.b32.xlu1 %v4144_v3, %s2094_s11  ;;  %v192_v45 = vpop.permute.xlu0 %191  ;;  %v4149_v7 = vrot.slane %v4148_v19, 1  ;;  %v164_v10 = vadd.f32 %v4155_v29, %v137_v49 }
 0x147   :  { %v211_v35 = vpop.permute.xlu1 %210  ;;  %v197_v33 = vadd.f32 %v192_v45, %v3198_v34 }
 0x148   :  { %v151_v59 = vadd.f32 %v4149_v7, %v123_v57  ;;  %v4158_v7 = vld [vmem:[#allocation57_spill] sm:$0xff] }
 0x14a   :  { %1430 = vrot.lane.b32.xlu0 %v4146_v27, %s2095_s12  ;;  %1394 = vrot.lane.b32.xlu1 %v4147_v28, %s2094_s11  ;;  %v209_v51 = vpop.permute.xlu0 %208  ;;  %v181_v27 = vadd.f32 %v177_v4, %v151_v59  ;;  %v198_v4 = vadd.f32 %v194_v24, %v164_v10  ;;  %v4159_v59 = vld [vmem:[#allocation19_spill] sm:$0xff]  ;;  %v331_v24 = vmul.f32 %v4081_v44, %v2334_v62 }
 0x14b   :  { %v228_v9 = vpop.permute.xlu1 %227  ;;  %v214_v3 = vadd.f32 %v209_v51, %v180_v61  ;;  %v4156_v61 = vld [vmem:[#allocation56_spill] sm:$0xff] }
 0x14c   :  { %v215_v19 = vadd.f32 %v211_v35, %v181_v27  ;;  %v4157_v51 = vrot.slane %v4156_v61, 2  ;;  %v232_v38 = vadd.f32 %v228_v9, %v198_v4  ;;  %v4162_v35 = vld [vmem:[#allocation22_spill] sm:$0xff] }
 0x14d   :  { %v245_v30 = vadd.f32 %v4153_v15, %v214_v3  ;;  %v4163_v15 = vld [vmem:[#allocation12_spill] sm:$0xff] }
 0x14e   :  { %1490 = vrot.lane.b32.xlu0 %v4151_v1, %s2094_s11  ;;  %1505 = vrot.lane.b32.xlu1 %v4152_v2, %s2095_s12  ;;  %v4160_v1 = vld [vmem:[#allocation11_spill] sm:$0xff] }
 0x14f   :  { %v4161_v2 = vrot.slane %v4160_v1, 2 }
 0x150   :  { %v272_v40 = vpop.permute.xlu1 %271  ;;  %v226_v28 = vpop.permute.xlu0 %225 }
 0x151   :  { %v231_v57 = vadd.f32 %v226_v28, %v197_v33  ;;  %v246_v37 = vadd.f32 %v4161_v2, %v215_v19  ;;  %v4164_v28 = vrot.slane %v4163_v15, 2 }
 0x152   :  { %1524 = vrot.lane.b32.xlu0 %v4157_v51, %s2095_s12  ;;  %1428 = vrot.lane.b32.xlu1 %v4158_v7, %s2095_s12 }
 0x153   :  { %v258_v34 = vadd.f32 %v4159_v59, %v231_v57  ;;  %v276_v49 = vadd.f32 %v272_v40, %v246_v37  ;;  %v259_v29 = vadd.f32 %v4164_v28, %v232_v38  ;;  %v3337_v57 = vstv %s1955_s14 }
 0x154   :  { %v289_v45 = vpop.permute.xlu1 %288  ;;  %v270_v3 = vpop.permute.xlu0 %269  ;;  %v337_v40 = vmul.f32 %v3337_v57, %v2334_v62  ;;  %v330_v38 = vmul.f32 %v4081_v44, %v2324_v58 }
 0x155   :  { %v293_v9 = vadd.f32 %v289_v45, %v259_v29  ;;  %v275_v19 = vadd.f32 %v270_v3, %v245_v30  ;;  %v336_v30 = vmul.f32 %v3337_v57, %v2324_v58  ;;  %v4166_v58 = vrot.slane %v2951_v12, 1 }
 0x156   :  { %1488 = vrot.lane.b32.xlu1 %v4162_v35, %s2094_s11 }
 0x158   :  { %v306_v27 = vpop.permute.xlu1 %305  ;;  %v287_v33 = vpop.permute.xlu0 %286 }
 0x159   :  { %v310_v10 = vadd.f32 %v306_v27, %v276_v49  ;;  %v292_v2 = vadd.f32 %v287_v33, %v258_v34  ;;  %v4165_v27 = vrot.slane %v2956_v32, 1 }
 0x15a   :  { %1522 = vrot.lane.b32.xlu1 %v2967_v5, %s2095_s12 }
 0x15b   :  { %v333_v61 = vadd.f32 %v331_v24, %v310_v10 }
 0x15c   :  { %v323_v51 = vpop.permute.xlu1 %322  ;;  %v304_v7 = vpop.permute.xlu0 %303 }
 0x15d   :  { %v353_v4 = vadd.f32 %v3217_v25, %v333_v61  ;;  %v327_v59 = vadd.f32 %v323_v51, %v293_v9  ;;  %v309_v1 = vadd.f32 %v304_v7, %v275_v19  ;;  %v4167_v19 = vld [vmem:[#allocation14_spill] sm:$0xff]  ;;  %v4169_v51 = vld [vmem:[#allocation16_spill] sm:$0xff] }
 0x15f   :  { %v339_v37 = vadd.f32 %v337_v40, %v327_v59  ;;  %v332_v35 = vadd.f32 %v330_v38, %v309_v1  ;;  %v381_v5 = vadd.f32 %v3219_v11, %v353_v4  ;;  %v4170_v59 = vld [vmem:[#allocation15_spill] sm:$0xff] }
 0x160   :  { %v451_v45 = vpop.permute.xlu1 %450  ;;  %v321_v3 = vpop.permute.xlu0 %320  ;;  %v4171_v12 = vrot.slane %v4170_v59, 2 }
 0x161   :  { %v367_v62 = vadd.f32 %v3211_v50, %v339_v37  ;;  %v352_v49 = vadd.f32 %v3202_v0, %v332_v35  ;;  %v326_v25 = vadd.f32 %v321_v3, %v292_v2  ;;  %v408_v15 = vadd.f32 %v4165_v27, %v381_v5 }
 0x162   :  { %v3373_v5 = vstv %s584_s15 }
 0x163   :  { %v395_v44 = vadd.f32 %v3228_v6, %v367_v62  ;;  %v338_v34 = vadd.f32 %v336_v30, %v326_v25  ;;  %v438_v33 = vadd.f32 %v3268_v46, %v408_v15  ;;  %v380_v11 = vadd.f32 %v3234_v55, %v352_v49 }
 0x164   :  { %v468_v28 = vpop.permute.xlu1 %467  ;;  %v449_v29 = vpop.permute.xlu0 %448  ;;  %v4168_v6 = vrot.slane %v4167_v19, 2 }
 0x165   :  { %v421_v24 = vadd.f32 %v4166_v58, %v395_v44  ;;  %v366_v50 = vadd.f32 %v3226_v23, %v338_v34  ;;  %v472_v10 = vadd.f32 %v468_v28, %v438_v33  ;;  %v407_v0 = vadd.f32 %v3031_v54, %v380_v11  ;;  %v4172_v11 = vld [vmem:[#allocation17_spill] sm:$0xff] }
 0x167   :  { %v455_v9 = vadd.f32 %v451_v45, %v421_v24  ;;  %v394_v32 = vadd.f32 %v3242_v63, %v366_v50  ;;  %v502_v61 = vadd.f32 %v4168_v6, %v472_v10 }
 0x168   :  { %v485_v40 = vpop.permute.xlu1 %484  ;;  %v466_v46 = vpop.permute.xlu0 %465 }
 0x169   :  { %v420_v55 = vadd.f32 %v4169_v51, %v394_v32  ;;  %v489_v7 = vadd.f32 %v485_v40, %v455_v9  ;;  %v1027_v40 = vmul.f32 %v2372_v39, %v3171_v26  ;;  %v4173_v51 = vld [vmem:[#allocation23_spill] sm:$0xff] }
 0x16b   :  { %v454_v4 = vadd.f32 %v449_v29, %v420_v55  ;;  %v3366_v38 = vadd.f32 %v4171_v12, %v489_v7 }
 0x16c   :  { %v528_v23 = vpop.permute.xlu1 %527  ;;  %v483_v1 = vpop.permute.xlu0 %482 }
 0x16d   :  { %v488_v54 = vadd.f32 %v483_v1, %v454_v4  ;;  %v532_v35 = vadd.f32 %v528_v23, %v502_v61  ;;  %v4174_v23 = vrot.slane %v3011_v16, 1 }
 0x16f   :  { %v3369_v2 = vadd.f32 %v3023_v47, %v488_v54 }
 0x170   :  { %v3371_v63 = vpop.permute.xlu1 %544  ;;  %v526_v37 = vpop.permute.xlu0 %525 }
 0x174   :  { %v562_v45 = vpop.permute.xlu1 %561  ;;  %v3375_v30 = vpop.permute.xlu0 %542 }
 0x175   :  { %v566_v3 = vadd.f32 %v562_v45, %v532_v35 }
 0x177   :  { %v587_v62 = vadd.f32 %v3373_v5, %v566_v3 }
 0x178   :  { %v3378_v49 = vpop.permute.xlu1 %578  ;;  %v560_v25 = vpop.permute.xlu0 %559 }
 0x179   :  { %596 = vrot.lane.b32.xlu1 %v587_v62, %s2096_s16 }
 0x17c   :  { %v432_v47 = vpop.permute.xlu1 %431  ;;  %v3381_v27 = vpop.permute.xlu0 %576 }
 0x17d   :  { %v437_v15 = vadd.f32 %v432_v47, %v407_v0 }
 0x17f   :  { %v471_v44 = vadd.f32 %v466_v46, %v437_v15 }
 0x180   :  { %v1122_v34 = vpop.permute.xlu1 %1121  ;;  %v1218_v33 = vpop.permute.xlu0 %1217 }
 0x181   :  { %v501_v28 = vadd.f32 %v4172_v11, %v471_v44  ;;  %v1127_v58 = vadd.f32 %v1122_v34, %v3266_v53  ;;  %v1222_v32 = vadd.f32 %v1218_v33, %v3291_v56  ;;  %v1057_v53 = vadd.f32 %v3251_v43, %v1027_v40  ;;  %v4176_v44 = vld [vmem:[#allocation13_spill] sm:$0xff] }
 0x182   :  { %v4177_v34 = vrot.slane %v4176_v44, 2 }
 0x183   :  { %v531_v29 = vadd.f32 %v526_v37, %v501_v28  ;;  %v1085_v56 = vadd.f32 %v3258_v13, %v1057_v53 }
 0x184   :  { %v1156_v24 = vpop.permute.xlu1 %1155  ;;  %v1141_v50 = vpop.permute.xlu0 %1140 }
 0x185   :  { %v1161_v10 = vadd.f32 %v1156_v24, %v1127_v58  ;;  %v565_v9 = vadd.f32 %v560_v25, %v531_v29  ;;  %v1111_v1 = vadd.f32 %v4174_v23, %v1085_v56  ;;  %v4175_v25 = vld [vmem:[#allocation59_spill] sm:$0xff]  ;;  %v1283_v58 = vmul.f32 %v2585_v48, %v3337_v57 }
 0x187   :  { %v1191_v19 = vadd.f32 %v3041_v42, %v1161_v10  ;;  %v586_v6 = vadd.f32 %v3373_v5, %v565_v9  ;;  %v1145_v37 = vadd.f32 %v1141_v50, %v1111_v1 }
 0x188   :  { %v1216_v61 = vpop.permute.xlu1 %1215  ;;  %v1252_v0 = vpop.permute.xlu0 %1251 }
 0x189   :  { %v1256_v46 = vadd.f32 %v1252_v0, %v1222_v32  ;;  %594 = vrot.lane.b32.xlu0 %v586_v6, %s2096_s16  ;;  %v1221_v59 = vadd.f32 %v1216_v61, %v1191_v19 }
 0x18b   :  { %v1279_v55 = vadd.f32 %v4173_v51, %v1256_v46 }
 0x18c   :  { %v1139_v7 = vpop.permute.xlu1 %1138  ;;  %v1175_v4 = vpop.permute.xlu0 %1174 }
 0x18d   :  { %v1144_v39 = vadd.f32 %v1139_v7, %v3282_v21  ;;  %v1179_v45 = vadd.f32 %v1175_v4, %v1145_v37  ;;  %v4179_v4 = vrot.slane %v3070_v8, 2 }
 0x18f   :  { %v1205_v33 = vadd.f32 %v4177_v34, %v1179_v45  ;;  %v589_v34 = vstv %s1972_s17 }
 0x190   :  { %v1250_v42 = vpop.permute.xlu1 %1249  ;;  %v1295_v12 = vpop.permute.xlu0 %1294 }
 0x191   :  { %v1255_v54 = vadd.f32 %v1250_v42, %v1221_v59  ;;  %v1299_v62 = vadd.f32 %v1295_v12, %v1279_v55 }
 0x193   :  { %v1278_v26 = vadd.f32 %v3045_v18, %v1255_v54 }
 0x194   :  { %v1173_v35 = vpop.permute.xlu1 %1172  ;;  %v1235_v43 = vpop.permute.xlu0 %1234 }
 0x195   :  { %v1178_v3 = vadd.f32 %v1173_v35, %v1144_v39  ;;  %v1239_v11 = vadd.f32 %v1235_v43, %v1205_v33 }
 0x197   :  { %v1204_v47 = vadd.f32 %v4175_v25, %v1178_v3  ;;  %v548_v25 = vadd.f32 %v3375_v30, %v3369_v2  ;;  %v549_v2 = vadd.f32 %v3371_v63, %v3366_v38 }
 0x198   :  { %v1293_v13 = vpop.permute.xlu1 %1292  ;;  %v1323_v15 = vpop.permute.xlu0 %1322 }
 0x199   :  { %v1327_v16 = vadd.f32 %v1323_v15, %v1299_v62  ;;  %v1298_v24 = vadd.f32 %v1293_v13, %v1278_v26 }
 0x19b   :  { %v1354_v28 = vadd.f32 %v1349_v31, %v1327_v16  ;;  %v1282_v31 = vmul.f32 %v4178_v36, %v3337_v57 }
 0x19c   :  { %v1233_v21 = vpop.permute.xlu1 %1232  ;;  %v1269_v29 = vpop.permute.xlu0 %1268 }
 0x19d   :  { %v1273_v18 = vadd.f32 %v1269_v29, %v1239_v11  ;;  %v1238_v19 = vadd.f32 %v1233_v21, %v1204_v47 }
 0x19f   :  { %v1285_v50 = vadd.f32 %v1283_v58, %v1273_v18 }
 0x1a0   :  { %v1321_v10 = vpop.permute.xlu1 %1320  ;;  %v1380_v9 = vpop.permute.xlu0 %1379 }
 0x1a1   :  { %v1326_v32 = vadd.f32 %v1321_v10, %v1298_v24  ;;  %v1384_v46 = vadd.f32 %v1380_v9, %v1354_v28 }
 0x1a3   :  { %v1353_v6 = vadd.f32 %v3097_v52, %v1326_v32 }
 0x1a4   :  { %v1267_v61 = vpop.permute.xlu1 %1266  ;;  %v1309_v0 = vpop.permute.xlu0 %1308 }
 0x1a5   :  { %v1272_v40 = vadd.f32 %v1267_v61, %v1238_v19  ;;  %v1313_v48 = vadd.f32 %v1309_v0, %v1285_v50 }
 0x1a7   :  { %v1284_v53 = vadd.f32 %v1282_v31, %v1272_v40 }
 0x1a8   :  { %v1378_v51 = vpop.permute.xlu1 %1377  ;;  %v1414_v55 = vpop.permute.xlu0 %1413 }
 0x1a9   :  { %v1418_v7 = vadd.f32 %v1414_v55, %v1384_v46  ;;  %v1383_v23 = vadd.f32 %v1378_v51, %v1353_v6 }
 0x1ab   :  { %v1448_v56 = vadd.f32 %v4179_v4, %v1418_v7 }
 0x1ac   :  { %v1307_v59 = vpop.permute.xlu1 %1306  ;;  %v1337_v42 = vpop.permute.xlu0 %1336 }
 0x1ad   :  { %v1341_v12 = vadd.f32 %v1337_v42, %v1313_v48  ;;  %v1312_v57 = vadd.f32 %v1307_v59, %v1284_v53 }
 0x1af   :  { %v1367_v52 = vadd.f32 %v1362_v14, %v1341_v12  ;;  %v582_v14 = vadd.f32 %v3381_v27, %v548_v25  ;;  %v583_v27 = vadd.f32 %v3378_v49, %v549_v2 }
 0x1b0   :  { %v1412_v1 = vpop.permute.xlu1 %1411  ;;  %v1474_v54 = vpop.permute.xlu0 %1473 }
 0x1b1   :  { %v1417_v37 = vadd.f32 %v1412_v1, %v1383_v23  ;;  %v1478_v45 = vadd.f32 %v1474_v54, %v1448_v56  ;;  %v590_v33 = vadd.f32 %v589_v34, %v582_v14 }
 0x1b3   :  { %v1447_v39 = vadd.f32 %v3107_v22, %v1417_v37 }
 0x1b4   :  { %v1335_v26 = vpop.permute.xlu1 %1334  ;;  %v1397_v35 = vpop.permute.xlu0 %1396 }
 0x1b5   :  { %v1340_v43 = vadd.f32 %v1335_v26, %v1312_v57  ;;  %v1401_v47 = vadd.f32 %v1397_v35, %v1367_v52 }
 0x1b7   :  { %v1366_v8 = vadd.f32 %v3113_v20, %v1340_v43  ;;  %v4180_v20 = vrot.slane %v3089_v17, 2  ;;  %v591_v17 = vadd.f32 %v589_v34, %v583_v27 }
 0x1b8   :  { %v1472_v3 = vpop.permute.xlu1 %1471  ;;  %v1508_v62 = vpop.permute.xlu0 %1507 }
 0x1b9   :  { %v1512_v60 = vadd.f32 %v1508_v62, %v1478_v45  ;;  %v1477_v16 = vadd.f32 %v1472_v3, %v1447_v39 }
 0x1bb   :  { %v1533_v13 = vadd.f32 %v1512_v60, %v3373_v5 }
 0x1bc   :  { %v1395_v15 = vpop.permute.xlu1 %1394  ;;  %v1431_v22 = vpop.permute.xlu0 %1430 }
 0x1bd   :  { %v1435_v44 = vadd.f32 %v1431_v22, %v1401_v47  ;;  %1542 = vrot.lane.b32.xlu0 %v1533_v13, %s2096_s16  ;;  %v1400_v29 = vadd.f32 %v1395_v15, %v1366_v8 }
 0x1bf   :  { %v1461_v11 = vadd.f32 %v4180_v20, %v1435_v44 }
 0x1c0   :  { %v1506_v28 = vpop.permute.xlu1 %1505  ;;  %v1491_v21 = vpop.permute.xlu0 %1490 }
 0x1c1   :  { %v1511_v30 = vadd.f32 %v1506_v28, %v1477_v16  ;;  %794 = vrot.lane.b32.xlu0 %v590_v33, %s2096_s16  ;;  %v1495_v50 = vadd.f32 %v1491_v21, %v1461_v11 }
 0x1c3   :  { %v1532_v18 = vadd.f32 %v1511_v30, %v3373_v5 }
 0x1c4   :  { %v1429_v58 = vpop.permute.xlu1 %1428  ;;  %v1525_v24 = vpop.permute.xlu0 %1524 }
 0x1c5   :  { %v1434_v10 = vadd.f32 %v1429_v58, %v1400_v29  ;;  %1540 = vrot.lane.b32.xlu1 %v1532_v18, %s2096_s16  ;;  %v1529_v9 = vadd.f32 %v1525_v24, %v1495_v50 }
 0x1c7   :  { %v1460_v32 = vadd.f32 %v3118_v41, %v1434_v10  ;;  %v1537_v38 = vadd.f32 %v1529_v9, %v589_v34 }
 0x1c8   :  { %v1489_v19 = vpop.permute.xlu1 %1488 }
 0x1c9   :  { %796 = vrot.lane.b32.xlu1 %v591_v17, %s2096_s16  ;;  %v1494_v63 = vadd.f32 %v1489_v19, %v1460_v32  ;;  %v3592_v19 = vld [vmem:[%s3919_s3 + $0x4] ss:$0 sm:$0xff] }
 0x1cc   :  { %v1523_v6 = vpop.permute.xlu1 %1522 }
 0x1cd   :  { %v1528_v49 = vadd.f32 %v1523_v6, %v1494_v63  ;;  %1735 = vrot.lane.b32.xlu1 %v1537_v38, %s2096_s16  ;;  %v3597_v38 = vld [vmem:[%s3919_s3 + $0x5] ss:$0 sm:$0xff] }
 0x1cf   :  { %v1536_v5 = vadd.f32 %v1528_v49, %v589_v34 }
 0x1d1   :  { %1733 = vrot.lane.b32.xlu0 %v1536_v5, %s2096_s16 }
 0x1eb   :  { %v597_v61 = vpop.permute.xlu1 %596 }
 0x1ec   :  { %v602_v0 = vsel %vm600_vm5, 0.0, %v597_v61 }
 0x1ed   :  { %v605_v40 = vsel %vm603_vm6, %v602_v0, 0.0 }
 0x1ee   :  { %v610_v46 = vrot.slane %v605_v40, 7 }
 0x1fb   :  { %v595_v41 = vpop.permute.xlu0 %594 }
 0x1fc   :  { %v601_v36 = vsel %vm600_vm5, 0.0, %v595_v41  ;;  %v3610_v41 = vld [vmem:[%s3919_s3] ss:$0 sm:$0xff] }
 0x1fd   :  { %v604_v31 = vsel %vm603_vm6, %v601_v36, 0.0  ;;  %v3615_v36 = vld [vmem:[%s3919_s3 + $0x1] ss:$0 sm:$0xff] }
 0x1fe   :  { %v609_v53 = vrot.slane %v604_v31, 7 }
 0x200   :  { %v611_v51 = vsel %vm608_vm7, %v609_v53, %v610_v46  ;;  %v3437_v55 = vsel %vm608_vm7, 0.0, %v609_v53 }
 0x201   :  { %v3440_v7 = vsel %vm615_vm8, %v611_v51, 0.0  ;;  %619 = vrot.lane.b32.xlu0 %v3437_v55, %s2094_s11 }
 0x202   :  { %621 = vrot.lane.b32.xlu1 %v3440_v7, %s2094_s11 }
 0x205   :  { %625 = vrot.lane.b32.xlu0 %v3437_v55, %s2097_s18 }
 0x206   :  { %627 = vrot.lane.b32.xlu1 %v3440_v7, %s2097_s18 }
 0x209   :  { %631 = vrot.lane.b32.xlu0 %v3437_v55, %s2098_s0 }
 0x20a   :  { %633 = vrot.lane.b32.xlu1 %v3440_v7, %s2098_s0 }
 0x20d   :  { %637 = vrot.lane.b32.xlu0 %v3437_v55, %s2099_s19 }
 0x20e   :  { %639 = vrot.lane.b32.xlu1 %v3440_v7, %s2099_s19 }
 0x211   :  { %643 = vrot.lane.b32.xlu0 %v3437_v55, %s2100_s20 }
 0x212   :  { %645 = vrot.lane.b32.xlu1 %v3440_v7, %s2100_s20 }
 0x215   :  { %710 = vrot.lane.b32.xlu0 %v3437_v55, %s2101_s21 }
 0x216   :  { %712 = vrot.lane.b32.xlu1 %v3440_v7, %s2101_s21 }
 0x219   :  { %716 = vrot.lane.b32.xlu0 %v3437_v55, %s2102_s22 }
 0x21a   :  { %718 = vrot.lane.b32.xlu1 %v3440_v7, %s2102_s22 }
 0x21d   :  { %722 = vrot.lane.b32.xlu0 %v3437_v55, %s2103_s23 }
 0x21e   :  { %724 = vrot.lane.b32.xlu1 %v3440_v7, %s2103_s23 }
 0x221   :  { %728 = vrot.lane.b32.xlu0 %v3437_v55, %s2104_s1 }
 0x222   :  { %730 = vrot.lane.b32.xlu1 %v3440_v7, %s2104_s1 }
 0x22f   :  { %v1543_v48 = vpop.permute.xlu0 %1542 }
 0x230   :  { %v1547_v45 = vsel %vm600_vm5, 0.0, %v1543_v48 }
 0x231   :  { %v1549_v3 = vsel %vm603_vm6, %v1547_v45, 0.0 }
 0x232   :  { %v1553_v62 = vrot.slane %v1549_v3, 7 }
 0x233   :  { %v795_v4 = vpop.permute.xlu0 %794 }
 0x234   :  { %v800_v56 = vsel %vm600_vm5, 0.0, %v795_v4 }
 0x235   :  { %v802_v59 = vsel %vm603_vm6, %v800_v56, 0.0 }
 0x236   :  { %v806_v42 = vrot.slane %v802_v59, 7 }
 0x237   :  { %v1541_v12 = vpop.permute.xlu1 %1540 }
 0x238   :  { %v3481_v23 = vsel %vm608_vm7, 0.0, %v806_v42  ;;  %v1546_v26 = vsel %vm600_vm5, 0.0, %v1541_v12 }
 0x239   :  { %815 = vrot.lane.b32.xlu0 %v3481_v23, %s2094_s11  ;;  %v1548_v35 = vsel %vm603_vm6, %v1546_v26, 0.0 }
 0x23a   :  { %v1552_v43 = vrot.slane %v1548_v35, 7 }
 0x23b   :  { %v797_v52 = vpop.permute.xlu1 %796 }
 0x23c   :  { %v801_v1 = vsel %vm600_vm5, 0.0, %v797_v52  ;;  %v3517_v8 = vsel %vm608_vm7, 0.0, %v1552_v43  ;;  %v1554_v25 = vsel %vm608_vm7, %v1552_v43, %v1553_v62 }
 0x23d   :  { %v803_v54 = vsel %vm603_vm6, %v801_v1, 0.0  ;;  %821 = vrot.lane.b32.xlu0 %v3481_v23, %s2097_s18  ;;  %v3530_v60 = vsel %vm615_vm8, %v1554_v25, 0.0 }
 0x23e   :  { %v807_v37 = vrot.slane %v803_v54, 7 }
 0x23f   :  { %v1736_v13 = vpop.permute.xlu1 %1735 }
 0x240   :  { %v808_v57 = vsel %vm608_vm7, %v806_v42, %v807_v37  ;;  %v1740_v33 = vsel %vm600_vm5, 0.0, %v1736_v13  ;;  %v3653_v13 = vld [vmem:[%s3919_s3 + $0x3] ss:$0 sm:$0xff] }
 0x241   :  { %v3491_v39 = vsel %vm615_vm8, %v808_v57, 0.0  ;;  %827 = vrot.lane.b32.xlu0 %v3481_v23, %s2098_s0  ;;  %v1742_v21 = vsel %vm603_vm6, %v1740_v33, 0.0 }
 0x242   :  { %817 = vrot.lane.b32.xlu1 %v3491_v39, %s2094_s11  ;;  %v1746_v27 = vrot.slane %v1742_v21, 7 }
 0x243   :  { %v1734_v14 = vpop.permute.xlu0 %1733 }
 0x244   :  { %v1739_v47 = vsel %vm600_vm5, 0.0, %v1734_v14 }
 0x245   :  { %833 = vrot.lane.b32.xlu0 %v3481_v23, %s2099_s19  ;;  %v1741_v15 = vsel %vm603_vm6, %v1739_v47, 0.0 }
 0x246   :  { %823 = vrot.lane.b32.xlu1 %v3491_v39, %s2097_s18  ;;  %v1745_v44 = vrot.slane %v1741_v15, 7  ;;  %v3658_v15 = vld [vmem:[%s3919_s3 + $0x6] ss:$0 sm:$0xff] }
 0x248   :  { %v3564_v20 = vsel %vm608_vm7, 0.0, %v1745_v44  ;;  %v1747_v24 = vsel %vm608_vm7, %v1745_v44, %v1746_v27 }
 0x249   :  { %839 = vrot.lane.b32.xlu0 %v3481_v23, %s2100_s20  ;;  %v3582_v9 = vsel %vm615_vm8, %v1747_v24, 0.0 }
 0x24a   :  { %829 = vrot.lane.b32.xlu1 %v3491_v39, %s2098_s0 }
 0x24d   :  { %903 = vrot.lane.b32.xlu0 %v3481_v23, %s2101_s21 }
 0x24e   :  { %835 = vrot.lane.b32.xlu1 %v3491_v39, %s2099_s19 }
 0x251   :  { %909 = vrot.lane.b32.xlu0 %v3481_v23, %s2102_s22 }
 0x252   :  { %841 = vrot.lane.b32.xlu1 %v3491_v39, %s2100_s20 }
 0x255   :  { %1561 = vrot.lane.b32.xlu0 %v3517_v8, %s2094_s11 }
 0x256   :  { %905 = vrot.lane.b32.xlu1 %v3491_v39, %s2101_s21 }
 0x259   :  { %1567 = vrot.lane.b32.xlu0 %v3517_v8, %s2097_s18 }
 0x25a   :  { %911 = vrot.lane.b32.xlu1 %v3491_v39, %s2102_s22 }
 0x25d   :  { %1573 = vrot.lane.b32.xlu0 %v3517_v8, %s2098_s0 }
 0x25e   :  { %1563 = vrot.lane.b32.xlu1 %v3530_v60, %s2094_s11 }
 0x261   :  { %1579 = vrot.lane.b32.xlu0 %v3517_v8, %s2099_s19 }
 0x262   :  { %1569 = vrot.lane.b32.xlu1 %v3530_v60, %s2097_s18 }
 0x265   :  { %1585 = vrot.lane.b32.xlu0 %v3517_v8, %s2100_s20 }
 0x266   :  { %1575 = vrot.lane.b32.xlu1 %v3530_v60, %s2098_s0 }
 0x269   :  { %1649 = vrot.lane.b32.xlu0 %v3517_v8, %s2101_s21 }
 0x26a   :  { %1581 = vrot.lane.b32.xlu1 %v3530_v60, %s2099_s19 }
 0x26d   :  { %1655 = vrot.lane.b32.xlu0 %v3517_v8, %s2102_s22 }
 0x26e   :  { %1587 = vrot.lane.b32.xlu1 %v3530_v60, %s2100_s20 }
 0x271   :  { %1661 = vrot.lane.b32.xlu0 %v3517_v8, %s2103_s23 }
 0x272   :  { %1651 = vrot.lane.b32.xlu1 %v3530_v60, %s2101_s21 }
 0x273   :  { %v620_v22 = vpop.permute.xlu0 %619 }
 0x274   :  { %v622_v34 = vpop.permute.xlu1 %621 }
 0x275   :  { %1667 = vrot.lane.b32.xlu0 %v3517_v8, %s2104_s1 }
 0x276   :  { %1657 = vrot.lane.b32.xlu1 %v3530_v60, %s2102_s22 }
 0x277   :  { %v626_v16 = vpop.permute.xlu0 %625 }
 0x278   :  { %v649_v11 = vsel %vm603_vm6, %v620_v22, %v626_v16  ;;  %v628_v28 = vpop.permute.xlu1 %627  ;;  %v3663_v22 = vld [vmem:[%s3919_s3 + $0x7] ss:$0 sm:$0xff] }
 0x279   :  { %v650_v2 = vsel %vm603_vm6, %v622_v34, %v628_v28  ;;  %1754 = vrot.lane.b32.xlu0 %v3564_v20, %s2094_s11 }
 0x27a   :  { %1663 = vrot.lane.b32.xlu1 %v3530_v60, %s2103_s23 }
 0x27b   :  { %v632_v30 = vpop.permute.xlu0 %631 }
 0x27c   :  { %v652_v29 = vsel %vm651_vm9, %v649_v11, %v632_v30  ;;  %v634_v18 = vpop.permute.xlu1 %633 }
 0x27d   :  { %v653_v58 = vsel %vm651_vm9, %v650_v2, %v634_v18  ;;  %1760 = vrot.lane.b32.xlu0 %v3564_v20, %s2097_s18 }
 0x27e   :  { %1669 = vrot.lane.b32.xlu1 %v3530_v60, %s2104_s1 }
 0x27f   :  { %v638_v50 = vpop.permute.xlu0 %637 }
 0x280   :  { %v655_v10 = vsel %vm654_vm10, %v652_v29, %v638_v50  ;;  %v640_v17 = vpop.permute.xlu1 %639 }
 0x281   :  { %v656_v32 = vsel %vm654_vm10, %v653_v58, %v640_v17  ;;  %1766 = vrot.lane.b32.xlu0 %v3564_v20, %s2098_s0 }
 0x282   :  { %1756 = vrot.lane.b32.xlu1 %v3582_v9, %s2094_s11 }
 0x283   :  { %v644_v63 = vpop.permute.xlu0 %643 }
 0x284   :  { %v658_v6 = vsel %vm657_vm11, %v655_v10, %v644_v63  ;;  %v646_v49 = vpop.permute.xlu1 %645 }
 0x285   :  { %v683_v5 = vmul.f32 %v3592_v19, %v658_v6  ;;  %v699_v61 = vmul.f32 %v3597_v38, %v658_v6  ;;  %1772 = vrot.lane.b32.xlu0 %v3564_v20, %s2099_s19  ;;  %v659_v0 = vsel %vm657_vm11, %v656_v32, %v646_v49  ;;  %v665_v14 = vmul.f32 %v3610_v41, %v658_v6 }
 0x286   :  { %1762 = vrot.lane.b32.xlu1 %v3582_v9, %s2097_s18  ;;  %v684_v53 = vmul.f32 %v3592_v19, %v659_v0  ;;  %v700_v51 = vmul.f32 %v3597_v38, %v659_v0  ;;  %v666_v59 = vmul.f32 %v3610_v41, %v659_v0  ;;  %v675_v42 = vmul.f32 %v3615_v36, %v659_v0 }
 0x287   :  { %v711_v40 = vpop.permute.xlu0 %710  ;;  %v687_v31 = vrot.slane %v683_v5, 7  ;;  %v703_v46 = vrot.slane %v699_v61, 7  ;;  %v674_v47 = vmul.f32 %v3615_v36, %v658_v6 }
 0x288   :  { %v713_v48 = vpop.permute.xlu1 %712  ;;  %v688_v4 = vrot.slane %v684_v53, 7  ;;  %v704_v56 = vrot.slane %v700_v51, 7  ;;  %v734_v12 = vsel %vm603_vm6, %v3437_v55, %v711_v40 }
 0x289   :  { %1778 = vrot.lane.b32.xlu0 %v3564_v20, %s2100_s20  ;;  %v735_v37 = vsel %vm603_vm6, %v3440_v7, %v713_v48  ;;  %v3644_v7 = vld [vmem:[%s3919_s3 + $0x2] ss:$0 sm:$0xff]  ;;  %v692_v34 = vadd.f32 %v687_v31, %v665_v14  ;;  %v708_v33 = vadd.f32 %v703_v46, %v674_v47 }
 0x28a   :  { %1768 = vrot.lane.b32.xlu1 %v3582_v9, %s2098_s0  ;;  %v689_v1 = vsel %vm608_vm7, %v687_v31, %v688_v4  ;;  %v705_v54 = vsel %vm608_vm7, %v703_v46, %v704_v56 }
 0x28b   :  { %v717_v52 = vpop.permute.xlu0 %716  ;;  %v693_v35 = vadd.f32 %v689_v1, %v666_v59  ;;  %v709_v43 = vadd.f32 %v705_v54, %v675_v42 }
 0x28c   :  { %v736_v57 = vsel %vm651_vm9, %v734_v12, %v717_v52  ;;  %v719_v26 = vpop.permute.xlu1 %718 }
 0x28d   :  { %v737_v45 = vsel %vm651_vm9, %v735_v37, %v719_v26  ;;  %1842 = vrot.lane.b32.xlu0 %v3564_v20, %s2101_s21  ;;  %v3704_v37 = vld [vmem:[%s3919_s3 + $0x8] ss:$0 sm:$0xff]  ;;  %v3714_v26 = vld [vmem:[%s3919_s3 + $0xc] ss:$0 sm:$0xff] }
 0x28e   :  { %1774 = vrot.lane.b32.xlu1 %v3582_v9, %s2099_s19 }
 0x28f   :  { %v723_v55 = vpop.permute.xlu0 %722 }
 0x290   :  { %v738_v3 = vsel %vm654_vm10, %v736_v57, %v723_v55  ;;  %v725_v62 = vpop.permute.xlu1 %724  ;;  %v3709_v57 = vld [vmem:[%s3919_s3 + $0x9] ss:$0 sm:$0xff] }
 0x291   :  { %v739_v25 = vsel %vm654_vm10, %v737_v45, %v725_v62  ;;  %1848 = vrot.lane.b32.xlu0 %v3564_v20, %s2102_s22 }
 0x292   :  { %1780 = vrot.lane.b32.xlu1 %v3582_v9, %s2100_s20 }
 0x293   :  { %v729_v44 = vpop.permute.xlu0 %728 }
 0x294   :  { %v740_v16 = vsel %vm657_vm11, %v738_v3, %v729_v44  ;;  %v731_v11 = vpop.permute.xlu1 %730 }
 0x295   :  { %v747_v28 = vmul.f32 %v3644_v7, %v740_v16  ;;  %v756_v21 = vmul.f32 %v3653_v13, %v740_v16  ;;  %v765_v2 = vmul.f32 %v3658_v15, %v740_v16  ;;  %v781_v30 = vmul.f32 %v3663_v22, %v740_v16  ;;  %915 = vrot.lane.b32.xlu0 %v3481_v23, %s2103_s23 }
 0x296   :  { %v741_v27 = vsel %vm657_vm11, %v739_v25, %v731_v11  ;;  %1844 = vrot.lane.b32.xlu1 %v3582_v9, %s2101_s21 }
 0x297   :  { %v749_v29 = vadd.f32 %v747_v28, %v692_v34  ;;  %v758_v18 = vadd.f32 %v756_v21, %v708_v33  ;;  %v769_v58 = vrot.slane %v765_v2, 7  ;;  %v785_v24 = vrot.slane %v781_v30, 7 }
 0x298   :  { %v748_v50 = vmul.f32 %v3644_v7, %v741_v27  ;;  %v757_v10 = vmul.f32 %v3653_v13, %v741_v27  ;;  %v766_v17 = vmul.f32 %v3658_v15, %v741_v27  ;;  %v782_v32 = vmul.f32 %v3663_v22, %v741_v27 }
 0x299   :  { %v774_v63 = vadd.f32 %v769_v58, %v749_v29  ;;  %v790_v6 = vadd.f32 %v785_v24, %v758_v18  ;;  %1854 = vrot.lane.b32.xlu0 %v3564_v20, %s2103_s23 }
 0x29a   :  { %v750_v49 = vadd.f32 %v748_v50, %v693_v35  ;;  %v759_v5 = vadd.f32 %v757_v10, %v709_v43  ;;  %v770_v61 = vrot.slane %v766_v17, 7  ;;  %v786_v0 = vrot.slane %v782_v32, 7  ;;  %1850 = vrot.lane.b32.xlu1 %v3582_v9, %s2102_s22  ;;  %v3719_v35 = vld [vmem:[%s3919_s3 + $0xd] ss:$0 sm:$0xff] }
 0x29c   :  { %v771_v40 = vsel %vm608_vm7, %v769_v58, %v770_v61  ;;  %v787_v31 = vsel %vm608_vm7, %v785_v24, %v786_v0 }
 0x29d   :  { %921 = vrot.lane.b32.xlu0 %v3481_v23, %s2104_s1  ;;  %v775_v46 = vadd.f32 %v771_v40, %v750_v49  ;;  %v791_v53 = vadd.f32 %v787_v31, %v759_v5 }
 0x29e   :  { %917 = vrot.lane.b32.xlu1 %v3491_v39, %s2103_s23 }
 0x2a1   :  { %1860 = vrot.lane.b32.xlu0 %v3564_v20, %s2104_s1 }
 0x2a2   :  { %1856 = vrot.lane.b32.xlu1 %v3582_v9, %s2103_s23 }
 0x2a6   :  { %923 = vrot.lane.b32.xlu1 %v3491_v39, %s2104_s1 }
 0x2aa   :  { %1862 = vrot.lane.b32.xlu1 %v3582_v9, %s2104_s1 }
 0x2ab   :  { %v816_v51 = vpop.permute.xlu0 %815 }
 0x2af   :  { %v822_v48 = vpop.permute.xlu0 %821 }
 0x2b0   :  { %v845_v4 = vsel %vm603_vm6, %v816_v51, %v822_v48 }
 0x2b3   :  { %v828_v56 = vpop.permute.xlu0 %827 }
 0x2b4   :  { %v847_v59 = vsel %vm651_vm9, %v845_v4, %v828_v56  ;;  %v818_v42 = vpop.permute.xlu1 %817 }
 0x2b7   :  { %v834_v12 = vpop.permute.xlu0 %833 }
 0x2b8   :  { %v849_v52 = vsel %vm654_vm10, %v847_v59, %v834_v12  ;;  %v824_v1 = vpop.permute.xlu1 %823 }
 0x2b9   :  { %v846_v54 = vsel %vm603_vm6, %v818_v42, %v824_v1 }
 0x2bb   :  { %v840_v43 = vpop.permute.xlu0 %839 }
 0x2bc   :  { %v851_v45 = vsel %vm657_vm11, %v849_v52, %v840_v43  ;;  %v830_v55 = vpop.permute.xlu1 %829 }
 0x2bd   :  { %v858_v3 = vmul.f32 %v3704_v37, %v851_v45  ;;  %v867_v62 = vmul.f32 %v3709_v57, %v851_v45  ;;  %v876_v25 = vmul.f32 %v3714_v26, %v851_v45  ;;  %v892_v14 = vmul.f32 %v3719_v35, %v851_v45 }
 0x2be   :  { %v848_v47 = vsel %vm651_vm9, %v846_v54, %v830_v55 }
 0x2bf   :  { %v860_v44 = vadd.f32 %v858_v3, %v774_v63  ;;  %v869_v34 = vadd.f32 %v867_v62, %v790_v6  ;;  %v880_v33 = vrot.slane %v876_v25, 7  ;;  %v896_v16 = vrot.slane %v892_v14, 7  ;;  %v904_v11 = vpop.permute.xlu0 %903 }
 0x2c0   :  { %v836_v28 = vpop.permute.xlu1 %835  ;;  %v927_v27 = vsel %vm603_vm6, %v3481_v23, %v904_v11 }
 0x2c1   :  { %v3727_v21 = vadd.f32 %v880_v33, %v860_v44  ;;  %v3729_v2 = vadd.f32 %v896_v16, %v869_v34  ;;  %v850_v30 = vsel %vm654_vm10, %v848_v47, %v836_v28 }
 0x2c3   :  { %v910_v29 = vpop.permute.xlu0 %909 }
 0x2c4   :  { %v3735_v18 = vsel %vm651_vm9, %v927_v27, %v910_v29  ;;  %v842_v58 = vpop.permute.xlu1 %841 }
 0x2c5   :  { %v852_v24 = vsel %vm657_vm11, %v850_v30, %v842_v58 }
 0x2c6   :  { %v859_v50 = vmul.f32 %v3704_v37, %v852_v24  ;;  %v868_v10 = vmul.f32 %v3709_v57, %v852_v24  ;;  %v877_v17 = vmul.f32 %v3714_v26, %v852_v24  ;;  %v893_v32 = vmul.f32 %v3719_v35, %v852_v24 }
 0x2c7   :  { %v1562_v63 = vpop.permute.xlu0 %1561 }
 0x2c8   :  { %v861_v6 = vadd.f32 %v859_v50, %v775_v46  ;;  %v870_v49 = vadd.f32 %v868_v10, %v791_v53  ;;  %v881_v5 = vrot.slane %v877_v17, 7  ;;  %v897_v23 = vrot.slane %v893_v32, 7  ;;  %v906_v61 = vpop.permute.xlu1 %905 }
 0x2c9   :  { %v928_v4 = vsel %vm603_vm6, %v3491_v39, %v906_v61 }
 0x2ca   :  { %v882_v0 = vsel %vm608_vm7, %v880_v33, %v881_v5  ;;  %v898_v40 = vsel %vm608_vm7, %v896_v16, %v897_v23 }
 0x2cb   :  { %v1568_v31 = vpop.permute.xlu0 %1567  ;;  %v3744_v51 = vadd.f32 %v882_v0, %v861_v6  ;;  %v3746_v48 = vadd.f32 %v898_v40, %v870_v49 }
 0x2cc   :  { %v912_v56 = vpop.permute.xlu1 %911  ;;  %v1591_v11 = vsel %vm603_vm6, %v1562_v63, %v1568_v31 }
 0x2cd   :  { %v3751_v59 = vsel %vm651_vm9, %v928_v4, %v912_v56 }
 0x2cf   :  { %v1574_v46 = vpop.permute.xlu0 %1573 }
 0x2d0   :  { %v1564_v53 = vpop.permute.xlu1 %1563  ;;  %v1593_v30 = vsel %vm651_vm9, %v1591_v11, %v1574_v46 }
 0x2d3   :  { %v1580_v42 = vpop.permute.xlu0 %1579 }
 0x2d4   :  { %v1570_v12 = vpop.permute.xlu1 %1569  ;;  %v1595_v58 = vsel %vm654_vm10, %v1593_v30, %v1580_v42 }
 0x2d5   :  { %v1592_v27 = vsel %vm603_vm6, %v1564_v53, %v1570_v12 }
 0x2d7   :  { %v1586_v52 = vpop.permute.xlu0 %1585 }
 0x2d8   :  { %v1576_v1 = vpop.permute.xlu1 %1575  ;;  %v1597_v50 = vsel %vm657_vm11, %v1595_v58, %v1586_v52 }
 0x2d9   :  { %v1594_v24 = vsel %vm651_vm9, %v1592_v27, %v1576_v1  ;;  %v1622_v63 = vmul.f32 %v3592_v19, %v1597_v50  ;;  %v1638_v49 = vmul.f32 %v3597_v38, %v1597_v50  ;;  %v1604_v1 = vmul.f32 %v3610_v41, %v1597_v50 }
 0x2db   :  { %v1650_v54 = vpop.permute.xlu0 %1649  ;;  %v1626_v42 = vrot.slane %v1622_v63, 7  ;;  %v1642_v12 = vrot.slane %v1638_v49, 7 }
 0x2dc   :  { %v1582_v43 = vpop.permute.xlu1 %1581  ;;  %v1673_v5 = vsel %vm603_vm6, %v3517_v8, %v1650_v54 }
 0x2dd   :  { %v1596_v10 = vsel %vm654_vm10, %v1594_v24, %v1582_v43 }
 0x2df   :  { %v1656_v45 = vpop.permute.xlu0 %1655 }
 0x2e0   :  { %v1588_v55 = vpop.permute.xlu1 %1587  ;;  %v1675_v23 = vsel %vm651_vm9, %v1673_v5, %v1656_v45 }
 0x2e1   :  { %v1598_v17 = vsel %vm657_vm11, %v1596_v10, %v1588_v55 }
 0x2e2   :  { %v1623_v61 = vmul.f32 %v3592_v19, %v1598_v17  ;;  %v1639_v0 = vmul.f32 %v3597_v38, %v1598_v17  ;;  %v1605_v30 = vmul.f32 %v3610_v41, %v1598_v17  ;;  %v1614_v41 = vmul.f32 %v3615_v36, %v1598_v17 }
 0x2e3   :  { %v1662_v3 = vpop.permute.xlu0 %1661 }
 0x2e4   :  { %v1652_v62 = vpop.permute.xlu1 %1651  ;;  %v1677_v31 = vsel %vm654_vm10, %v1675_v23, %v1662_v3  ;;  %v1627_v52 = vrot.slane %v1623_v61, 7  ;;  %v1643_v38 = vrot.slane %v1639_v0, 7 }
 0x2e5   :  { %v1674_v40 = vsel %vm603_vm6, %v3530_v60, %v1652_v62  ;;  %v1613_v60 = vmul.f32 %v3615_v36, %v1597_v50 }
 0x2e6   :  { %v1628_v27 = vsel %vm608_vm7, %v1626_v42, %v1627_v52  ;;  %v1644_v58 = vsel %vm608_vm7, %v1642_v12, %v1643_v38  ;;  %v3815_v52 = vld [vmem:[%s3919_s3 + $0xa] ss:$0 sm:$0xff] }
 0x2e7   :  { %v1668_v25 = vpop.permute.xlu0 %1667  ;;  %v1632_v61 = vadd.f32 %v1628_v27, %v1605_v30 }
 0x2e8   :  { %v1658_v14 = vpop.permute.xlu1 %1657  ;;  %v1679_v46 = vsel %vm657_vm11, %v1677_v31, %v1668_v25  ;;  %v1648_v31 = vadd.f32 %v1644_v58, %v1614_v41 }
 0x2e9   :  { %v1676_v4 = vsel %vm651_vm9, %v1674_v40, %v1658_v14  ;;  %v1686_v54 = vmul.f32 %v3644_v7, %v1679_v46  ;;  %v1695_v43 = vmul.f32 %v3653_v13, %v1679_v46  ;;  %v1704_v55 = vmul.f32 %v3658_v15, %v1679_v46 }
 0x2ea   :  { %v1720_v3 = vmul.f32 %v3663_v22, %v1679_v46 }
 0x2eb   :  { %v1755_v47 = vpop.permute.xlu0 %1754  ;;  %v1708_v49 = vrot.slane %v1704_v55, 7 }
 0x2ec   :  { %v1664_v39 = vpop.permute.xlu1 %1663  ;;  %v1724_v5 = vrot.slane %v1720_v3, 7 }
 0x2ed   :  { %v1678_v53 = vsel %vm654_vm10, %v1676_v4, %v1664_v39  ;;  %v1631_v39 = vadd.f32 %v1626_v42, %v1604_v1 }
 0x2ef   :  { %v1761_v44 = vpop.permute.xlu0 %1760  ;;  %v1688_v50 = vadd.f32 %v1686_v54, %v1631_v39  ;;  %v3827_v54 = vld [vmem:[%s3919_s3 + $0xe] ss:$0 sm:$0xff] }
 0x2f0   :  { %v1670_v34 = vpop.permute.xlu1 %1669  ;;  %v1784_v62 = vsel %vm603_vm6, %v1755_v47, %v1761_v44 }
 0x2f1   :  { %v1680_v19 = vsel %vm657_vm11, %v1678_v53, %v1670_v34  ;;  %v1647_v34 = vadd.f32 %v1642_v12, %v1613_v60  ;;  %v1713_v53 = vadd.f32 %v1708_v49, %v1688_v50 }
 0x2f2   :  { %v1705_v25 = vmul.f32 %v3658_v15, %v1680_v19  ;;  %v1687_v10 = vmul.f32 %v3644_v7, %v1680_v19  ;;  %v1721_v47 = vmul.f32 %v3663_v22, %v1680_v19  ;;  %v1696_v0 = vmul.f32 %v3653_v13, %v1680_v19 }
 0x2f3   :  { %v1767_v33 = vpop.permute.xlu0 %1766  ;;  %v1697_v63 = vadd.f32 %v1695_v43, %v1647_v34  ;;  %v3832_v43 = vld [vmem:[%s3919_s3 + $0xf] ss:$0 sm:$0xff] }
 0x2f4   :  { %v1757_v16 = vpop.permute.xlu1 %1756  ;;  %v1786_v11 = vsel %vm651_vm9, %v1784_v62, %v1767_v33  ;;  %v1709_v33 = vrot.slane %v1705_v25, 7  ;;  %v1689_v4 = vadd.f32 %v1687_v10, %v1632_v61  ;;  %v1725_v46 = vrot.slane %v1721_v47, 7 }
 0x2f5   :  { %v1729_v13 = vadd.f32 %v1724_v5, %v1697_v63  ;;  %v1698_v12 = vadd.f32 %v1696_v0, %v1648_v31 }
 0x2f6   :  { %v1726_v62 = vsel %vm608_vm7, %v1724_v5, %v1725_v46 }
 0x2f7   :  { %v1773_v28 = vpop.permute.xlu0 %1772 }
 0x2f8   :  { %v1763_v29 = vpop.permute.xlu1 %1762  ;;  %v1788_v24 = vsel %vm654_vm10, %v1786_v11, %v1773_v28 }
 0x2f9   :  { %v1785_v28 = vsel %vm603_vm6, %v1757_v16, %v1763_v29  ;;  %v1710_v29 = vsel %vm608_vm7, %v1708_v49, %v1709_v33 }
 0x2fa   :  { %v1714_v3 = vadd.f32 %v1710_v29, %v1689_v4 }
 0x2fb   :  { %v1779_v32 = vpop.permute.xlu0 %1778 }
 0x2fc   :  { %v1769_v6 = vpop.permute.xlu1 %1768  ;;  %v1790_v15 = vsel %vm657_vm11, %v1788_v24, %v1779_v32 }
 0x2fd   :  { %v1797_v7 = vmul.f32 %v3704_v37, %v1790_v15  ;;  %v1806_v22 = vmul.f32 %v3709_v57, %v1790_v15  ;;  %v3801_v32 = vmul.f32 %v3714_v26, %v1790_v15  ;;  %v3804_v40 = vmul.f32 %v3719_v35, %v1790_v15 }
 0x2fe   :  { %v1787_v36 = vsel %vm651_vm9, %v1785_v28, %v1769_v6  ;;  %v3820_v6 = vld [vmem:[%s3919_s3 + $0xb] ss:$0 sm:$0xff] }
 0x2ff   :  { %v3772_v56 = vpop.permute.xlu0 %1842  ;;  %v1799_v38 = vadd.f32 %v1797_v7, %v1713_v53  ;;  %v1819_v1 = vrot.slane %v3801_v32, 7  ;;  %v1835_v60 = vrot.slane %v3804_v40, 7  ;;  %v1730_v7 = vadd.f32 %v1726_v62, %v1698_v12 }
 0x300   :  { %v1775_v8 = vpop.permute.xlu1 %1774  ;;  %v1866_v55 = vsel %vm603_vm6, %v3564_v20, %v3772_v56 }
 0x301   :  { %v1789_v16 = vsel %vm654_vm10, %v1787_v36, %v1775_v8  ;;  %v1808_v8 = vadd.f32 %v1806_v22, %v1729_v13  ;;  %v1824_v50 = vadd.f32 %v1819_v1, %v1799_v38 }
 0x303   :  { %v1849_v45 = vpop.permute.xlu0 %1848 }
 0x304   :  { %v1781_v14 = vpop.permute.xlu1 %1780  ;;  %v1868_v39 = vsel %vm651_vm9, %v1866_v55, %v1849_v45 }
 0x305   :  { %v1791_v19 = vsel %vm657_vm11, %v1789_v16, %v1781_v14 }
 0x306   :  { %v1816_v34 = vmul.f32 %v3714_v26, %v1791_v19  ;;  %v1832_v11 = vmul.f32 %v3719_v35, %v1791_v19  ;;  %v1798_v10 = vmul.f32 %v3704_v37, %v1791_v19  ;;  %v1807_v63 = vmul.f32 %v3709_v57, %v1791_v19 }
 0x307   :  { %v916_v44 = vpop.permute.xlu0 %915 }
 0x308   :  { %v3793_v23 = vpop.permute.xlu1 %1844  ;;  %v931_v25 = vsel %vm654_vm10, %v3735_v18, %v916_v44  ;;  %v1840_v18 = vadd.f32 %v1835_v60, %v1808_v8  ;;  %v1820_v49 = vrot.slane %v1816_v34, 7  ;;  %v1836_v5 = vrot.slane %v1832_v11, 7 }
 0x309   :  { %v1800_v22 = vadd.f32 %v1798_v10, %v1714_v3  ;;  %v1809_v40 = vadd.f32 %v1807_v63, %v1730_v7 }
 0x30a   :  { %v1821_v13 = vsel %vm608_vm7, %v1819_v1, %v1820_v49  ;;  %v1837_v16 = vsel %vm608_vm7, %v1835_v60, %v1836_v5 }
 0x30b   :  { %v1855_v17 = vpop.permute.xlu0 %1854  ;;  %v1825_v60 = vadd.f32 %v1821_v13, %v1800_v22 }
 0x30c   :  { %v3809_v42 = vpop.permute.xlu1 %1850  ;;  %v1870_v45 = vsel %vm654_vm10, %v1868_v39, %v1855_v17  ;;  %v1867_v17 = vsel %vm603_vm6, %v3582_v9, %v3793_v23 }
 0x30f   :  { %v922_v14 = vpop.permute.xlu0 %921 }
 0x310   :  { %v933_v30 = vsel %vm657_vm11, %v931_v25, %v922_v14  ;;  %v918_v27 = vpop.permute.xlu1 %917  ;;  %v1841_v25 = vadd.f32 %v1837_v16, %v1809_v40 }
 0x311   :  { %v940_v58 = vmul.f32 %v3815_v52, %v933_v30  ;;  %v949_v20 = vmul.f32 %v3820_v6, %v933_v30  ;;  %v958_v56 = vmul.f32 %v3827_v54, %v933_v30  ;;  %v974_v24 = vmul.f32 %v3832_v43, %v933_v30 }
 0x312   :  { %v932_v31 = vsel %vm654_vm10, %v3751_v59, %v918_v27  ;;  %v1869_v59 = vsel %vm651_vm9, %v1867_v17, %v3809_v42 }
 0x313   :  { %v942_v26 = vadd.f32 %v940_v58, %v3727_v21  ;;  %v951_v35 = vadd.f32 %v949_v20, %v3729_v2  ;;  %v962_v47 = vrot.slane %v958_v56, 7  ;;  %v978_v15 = vrot.slane %v974_v24, 7  ;;  %v1861_v44 = vpop.permute.xlu0 %1860 }
 0x314   :  { %v1872_v33 = vsel %vm657_vm11, %v1870_v45, %v1861_v44  ;;  %v1857_v41 = vpop.permute.xlu1 %1856 }
 0x315   :  { %v967_v61 = vadd.f32 %v962_v47, %v942_v26  ;;  %v983_v0 = vadd.f32 %v978_v15, %v951_v35  ;;  %v1879_v37 = vmul.f32 %v3815_v52, %v1872_v33  ;;  %v1888_v28 = vmul.f32 %v3820_v6, %v1872_v33 }
 0x316   :  { %v1897_v21 = vmul.f32 %v3827_v54, %v1872_v33  ;;  %v1913_v2 = vmul.f32 %v3832_v43, %v1872_v33  ;;  %v1871_v9 = vsel %vm654_vm10, %v1869_v59, %v1857_v41 }
 0x317   :  { %986 = vst.msk [vmem:[%s3920_s4 - $0x1] sm:$0xfe] %vm985_vm12, %v967_v61  ;;  %1989 = vst.msk [vmem:[%s3920_s4 + $0xf] sm:$0xfe] %vm985_vm12, %v983_v0  ;;  %v1881_v57 = vadd.f32 %v1879_v37, %v1824_v50  ;;  %v1890_v32 = vadd.f32 %v1888_v28, %v1840_v18 }
 0x318   :  { %v1901_v4 = vrot.slane %v1897_v21, 7  ;;  %v1917_v46 = vrot.slane %v1913_v2, 7  ;;  %v924_v36 = vpop.permute.xlu1 %923 }
 0x319   :  { %v934_v53 = vsel %vm657_vm11, %v932_v31, %v924_v36 }
 0x31a   :  { %v1906_v29 = vadd.f32 %v1901_v4, %v1881_v57  ;;  %v1922_v12 = vadd.f32 %v1917_v46, %v1890_v32  ;;  %v941_v19 = vmul.f32 %v3815_v52, %v934_v53  ;;  %v950_v38 = vmul.f32 %v3820_v6, %v934_v53 }
 0x31b   :  { %v959_v8 = vmul.f32 %v3827_v54, %v934_v53  ;;  %v975_v55 = vmul.f32 %v3832_v43, %v934_v53 }
 0x31c   :  { %2045 = vst.msk [vmem:[%s3920_s4 + $0x1f] sm:$0xfe] %vm985_vm12, %v1906_v29  ;;  %2047 = vst.msk [vmem:[%s3920_s4 + $0x2f] sm:$0xfe] %vm985_vm12, %v1922_v12  ;;  %v943_v23 = vadd.f32 %v941_v19, %v3744_v51  ;;  %v952_v42 = vadd.f32 %v950_v38, %v3746_v48  ;;  %v1863_v1 = vpop.permute.xlu1 %1862 }
 0x31d   :  { %v963_v3 = vrot.slane %v959_v8, 7  ;;  %v979_v62 = vrot.slane %v975_v55, 7  ;;  %v1873_v14 = vsel %vm657_vm11, %v1871_v9, %v1863_v1 }
 0x31e   :  { %v1880_v39 = vmul.f32 %v3815_v52, %v1873_v14  ;;  %v1889_v34 = vmul.f32 %v3820_v6, %v1873_v14  ;;  %v1898_v11 = vmul.f32 %v3827_v54, %v1873_v14  ;;  %v1914_v30 = vmul.f32 %v3832_v43, %v1873_v14 }
 0x31f   :  { %v964_v51 = vsel %vm608_vm7, %v962_v47, %v963_v3  ;;  %v980_v48 = vsel %vm608_vm7, %v978_v15, %v979_v62 }
 0x320   :  { %v968_v27 = vadd.f32 %v964_v51, %v943_v23  ;;  %v984_v58 = vadd.f32 %v980_v48, %v952_v42  ;;  %v1882_v20 = vadd.f32 %v1880_v39, %v1825_v60  ;;  %v1891_v56 = vadd.f32 %v1889_v34, %v1841_v25 }
 0x321   :  { %v1902_v24 = vrot.slane %v1898_v11, 7  ;;  %v1918_v50 = vrot.slane %v1914_v30, 7 }
 0x322   :  { %988 = vst.msk [vmem:[%s3920_s4 + $0x7] sm:$0xf] %vm987_vm13, %v968_v27  ;;  %1990 = vst.msk [vmem:[%s3920_s4 + $0x17] sm:$0xf] %vm987_vm13, %v984_v58 }
 0x323   :  { %v1903_v52 = vsel %vm608_vm7, %v1901_v4, %v1902_v24  ;;  %v1919_v6 = vsel %vm608_vm7, %v1917_v46, %v1918_v50 }
 0x324   :  { %v1907_v54 = vadd.f32 %v1903_v52, %v1882_v20  ;;  %v1923_v43 = vadd.f32 %v1919_v6, %v1891_v56 }
 0x326   :  { %2046 = vst.msk [vmem:[%s3920_s4 + $0x27] sm:$0xf] %vm987_vm13, %v1907_v54  ;;  %2048 = vst.msk [vmem:[%s3920_s4 + $0x37] sm:$0xf] %vm987_vm13, %v1923_v43 }
 0x327   :  { %1934 = vsyncpa [#allocation3], 1 }
 0x328   :  { %1935 = vsyncpa [#allocation5], 1 }

</bundles_post_ra>
